<compile_context>
chip_gen: v6e
topology: v6e:2x2x1
jax: 0.10.0
libtpu: 0.0.40
codegen_flags: <defaults>
</compile_context>

<pallas_src>
import functools

import jax
import jax.numpy as jnp
from jax import lax
from jax.experimental import pallas as pl
from jax.experimental.pallas import tpu as pltpu

EPS = 1e-6
LANES = 128
SUBLANES = 8
TARGET_TILE_BYTES = 4 << 20       # ~4 MiB of DMA per input per grid step
SMALL_FAST_PATH_ELEMS = 1 << 17   # below this, plain JAX beats kernel launch cost


def _rmse_partial_kernel(x_ref, y_ref, acc_ref, *,
                         rows_valid, tm, cpc, mask_possible):
    """Accumulate sum((x - y)^2) into an (8,128) f32 partial-sum block per slice."""
    c = pl.program_id(0)   # parallel slice (TensorCore on v7x)
    j = pl.program_id(1)   # reduction chunk within the slice

    @pl.when(j == 0)
    def _():
        acc_ref[...] = jnp.zeros_like(acc_ref)

    d = x_ref[...].astype(jnp.float32) - y_ref[...].astype(jnp.float32)
    sq = d * d

    def fold(v):
        # (tm,128) -> (8,128) with pure VPU adds; no cross-lane reduction.
        return jnp.sum(v.reshape(tm // SUBLANES, SUBLANES, LANES), axis=0)

    if mask_possible:
        block_start = (c * cpc + j) * tm
        is_partial = block_start + tm > rows_valid

        # Fast path: full in-range block, no iota/compare/select at all.
        @pl.when(jnp.logical_not(is_partial))
        def _():
            acc_ref[...] += fold(sq)

        # Slow path: final overhanging block and/or core 1's phantom chunk.
        @pl.when(is_partial)
        def _():
            rid = block_start + lax.broadcasted_iota(jnp.int32, (tm, LANES), 0)
            acc_ref[...] += fold(jnp.where(rid < rows_valid, sq, 0.0))
    else:
        acc_ref[...] += fold(sq)


def rmse_loss(x, y, *, target_tile_bytes=TARGET_TILE_BYTES):
    assert x.shape == y.shape, "x and y must have the same shape"
    n = x.size

    # Small-input fast path: kernel launch + DMA setup dwarfs the work.
    if n < SMALL_FAST_PATH_ELEMS:
        d = x.astype(jnp.float32) - y.astype(jnp.float32)
        return jnp.sqrt(jnp.mean(d * d) + EPS)

    xf = x.reshape(-1)
    yf = y.reshape(-1)

    # Lane tail (< 128 elements, only when n % 128 != 0): summed in plain JAX.
    # TODO(synk): for lane-unaligned n the prefix slice below may still cost
    # one HBM copy per input; a manual-DMA 1D tail path would remove it, but
    # losses over image/feature tensors are essentially always 128-aligned.
    n_main = (n // LANES) * LANES
    tail_sum = jnp.float32(0.0)
    if n_main != n:
        dt = xf[n_main:].astype(jnp.float32) - yf[n_main:].astype(jnp.float32)
        tail_sum = jnp.sum(dt * dt)
        xf = xf[:n_main]
        yf = yf[:n_main]

    rows = n_main // LANES
    x2d = xf.reshape(rows, LANES)
    y2d = yf.reshape(rows, LANES)

    # Dtype-scaled row tile: keep DMA bytes/step ~target_tile_bytes per input
    # while respecting the sublane packing grain (8/16/32 rows for 4/2/1-byte
    # dtypes).  tm is always <= rows, so only the last block can overhang.
    x_item = x2d.dtype.itemsize
    y_item = y2d.dtype.itemsize
    row_grain = max(8, 32 // max(min(x_item, y_item), 1))
    target_rows = max(row_grain, target_tile_bytes // (LANES * max(x_item, y_item)))
    tm = min(int(target_rows), rows)
    tm = max(row_grain, (tm // row_grain) * row_grain)

    num_blocks = pl.cdiv(rows, tm)
    ncores = 2 if num_blocks >= 2 else 1   # always 2-way split when possible
    cpc = pl.cdiv(num_blocks, ncores)      # reduction chunks per slice
    mask_possible = (rows % tm != 0) or (num_blocks % ncores != 0)
    last_block = num_blocks - 1

    def in_map(c, j):
        # Clamp so core 1's phantom chunk (odd block count) never DMAs a fully
        # out-of-range block; its contribution is masked to zero in-kernel.
        return (jnp.minimum(c * cpc + j, last_block), 0)

    # 2 inputs x 2 pipeline buffers of (tm,128) plus headroom for the output
    # block and internal scratch; safe on all generations (v7x TC: 64 MiB).
    tile_bytes = tm * LANES * (x_item + y_item)
    vmem_limit = int(min(48 << 20, 2 * tile_bytes + (8 << 20)))

    kernel = functools.partial(
        _rmse_partial_kernel,
        rows_valid=rows, tm=tm, cpc=cpc, mask_possible=mask_possible)

    partials = pl.pallas_call(
        kernel,
        out_shape=jax.ShapeDtypeStruct((ncores * SUBLANES, LANES), jnp.float32),
        grid_spec=pltpu.PrefetchScalarGridSpec(
            num_scalar_prefetch=0,
            grid=(ncores, cpc),
            in_specs=[
                pl.BlockSpec((tm, LANES), in_map),
                pl.BlockSpec((tm, LANES), in_map),
            ],
            out_specs=pl.BlockSpec((SUBLANES, LANES), lambda c, j: (c, 0)),
        ),
        compiler_params=pltpu.CompilerParams(
            dimension_semantics=("parallel", "arbitrary"),
            vmem_limit_bytes=vmem_limit,
        ),
    )(x2d, y2d)

    # Final cross-lane reduce + mean + sqrt (tiny) in plain JAX.  f32 partial
    # sums are plenty for a loss; widen/pairwise-sum if tighter accuracy is
    # ever needed for N >~ 1e9.
    mse = (jnp.sum(partials) + tail_sum) / jnp.float32(n)
    return jnp.sqrt(mse + EPS)


if __name__ == "__main__":
    key = jax.random.PRNGKey(0)
    cases = [
        ((2, 4, 16, 16), {}),                                 # small: plain-JAX fast path
        ((4, 8, 128, 128), {}),                               # aligned, single-block kernel path
        ((3, 5, 97, 113), {}),                                # lane-unaligned: 2-way split + row mask + JAX tail
        ((4, 8, 128, 130), {"target_tile_bytes": 1 << 19}),   # odd block count: multi-chunk + phantom chunk
    ]
    for shape, kwargs in cases:
        key, kx, ky = jax.random.split(key, 3)
        x = jax.random.normal(kx, shape, dtype=jnp.float32)
        y = jax.random.normal(ky, shape, dtype=jnp.float32)
        loss = jax.block_until_ready(rmse_loss(x, y, **kwargs))
        ref = jnp.sqrt(jnp.mean((x - y) ** 2) + EPS)
        assert jnp.allclose(loss, ref, rtol=2e-5, atol=1e-6), (shape, loss, ref)
    print("KERNEL_OK")
</pallas_src>

<mosaic_0001>
module attributes {stable_mosaic.version = 11 : i64} {
  func.func @_rmse_partial_kernel(%arg0: i32, %arg1: i32, %arg2: memref<4096x128xf32, #tpu.memory_space<vmem>>, %arg3: memref<4096x128xf32, #tpu.memory_space<vmem>>, %arg4: memref<8x128xf32, #tpu.memory_space<vmem>>) attributes {dimension_semantics = [#tpu.dimension_semantics<parallel>, #tpu.dimension_semantics<arbitrary>], iteration_bounds = array<i64: 1, 1>, scalar_prefetch = 0 : i64, scratch_operands = 0 : i64, tpu.core_type = #tpu.core_type<tc>, window_params = [{transform_indices = @transform_0, window_bounds = array<i64: 4096, 128>}, {transform_indices = @transform_1, window_bounds = array<i64: 4096, 128>}, {transform_indices = @transform_2, window_bounds = array<i64: 8, 128>}]} {
    %c0_i32 = arith.constant 0 : i32
    %0 = arith.cmpi eq, %arg1, %c0_i32 : i32
    %1 = arith.extui %0 : i1 to i32
    %c0_i32_0 = arith.constant 0 : i32
    %2 = arith.cmpi ne, %1, %c0_i32_0 : i32
    scf.if %2 {
      %cst_8 = arith.constant 0.000000e+00 : f32
      %12 = vector.broadcast %cst_8 : f32 to vector<8x128xf32>
      %c0_9 = arith.constant 0 : index
      %c0_10 = arith.constant 0 : index
      %13 = vector.load %arg4[%c0_9, %c0_10] : memref<8x128xf32, #tpu.memory_space<vmem>>, vector<8x128xf32>
      tpu.vector_store %arg4[%c0_9, %c0_10], %12 {strides = array<i32>} : memref<8x128xf32, #tpu.memory_space<vmem>>, vector<8x128xf32>,
    } else {
    }
    %c0 = arith.constant 0 : index
    %c0_1 = arith.constant 0 : index
    %3 = vector.load %arg2[%c0, %c0_1] : memref<4096x128xf32, #tpu.memory_space<vmem>>, vector<4096x128xf32>
    %c0_2 = arith.constant 0 : index
    %c0_3 = arith.constant 0 : index
    %4 = vector.load %arg3[%c0_2, %c0_3] : memref<4096x128xf32, #tpu.memory_space<vmem>>, vector<4096x128xf32>
    %5 = arith.subf %3, %4 : vector<4096x128xf32>
    %6 = arith.mulf %5, %5 : vector<4096x128xf32>
    %c0_4 = arith.constant 0 : index
    %c0_5 = arith.constant 0 : index
    %7 = vector.load %arg4[%c0_4, %c0_5] : memref<8x128xf32, #tpu.memory_space<vmem>>, vector<8x128xf32>
    %8 = vector.shape_cast %6 : vector<4096x128xf32> to vector<512x8x128xf32>
    %cst = arith.constant dense<0.000000e+00> : vector<8x128xf32>
    %9 = vector.multi_reduction <add>, %8, %cst [0] : vector<512x8x128xf32> to vector<8x128xf32>
    %10 = arith.addf %7, %9 : vector<8x128xf32>
    %c0_6 = arith.constant 0 : index
    %c0_7 = arith.constant 0 : index
    %11 = vector.load %arg4[%c0_6, %c0_7] : memref<8x128xf32, #tpu.memory_space<vmem>>, vector<8x128xf32>
    tpu.vector_store %arg4[%c0_6, %c0_7], %10 {strides = array<i32>} : memref<8x128xf32, #tpu.memory_space<vmem>>, vector<8x128xf32>,
    return
  }
  func.func @transform_0(%arg0: i32, %arg1: i32) -> (i32, i32) {
    %c1_i32 = arith.constant 1 : i32
    %0 = arith.muli %arg0, %c1_i32 : i32
    %1 = arith.addi %0, %arg1 : i32
    %c0_i32 = arith.constant 0 : i32
    %2 = arith.minsi %1, %c0_i32 : i32
    %c0_i32_0 = arith.constant 0 : i32
    %c0_i32_1 = arith.constant 0 : i32
    return %2, %c0_i32_0 : i32, i32
  }
  func.func @transform_1(%arg0: i32, %arg1: i32) -> (i32, i32) {
    %c1_i32 = arith.constant 1 : i32
    %0 = arith.muli %arg0, %c1_i32 : i32
    %1 = arith.addi %0, %arg1 : i32
    %c0_i32 = arith.constant 0 : i32
    %2 = arith.minsi %1, %c0_i32 : i32
    %c0_i32_0 = arith.constant 0 : i32
    %c0_i32_1 = arith.constant 0 : i32
    return %2, %c0_i32_0 : i32, i32
  }
  func.func @transform_2(%arg0: i32, %arg1: i32) -> (i32, i32) {
    %c0_i32 = arith.constant 0 : i32
    %c0_i32_0 = arith.constant 0 : i32
    return %arg0, %c0_i32 : i32, i32
  }
}

</mosaic_0001>

<bundles_post_ra>
// kernel: tpu_custom_call.1
= control target key start
LH: loop header
LB: loop body
LE: loop exit
PB: predicated region body
PF: predicated region fallthrough
CT: control target
= control target key end

     0   :  { %7 = vsyncpa [#allocation3], 0  ;;  %s2748_s0 = inlined_call_operand.hbm [shape: f32[4096,128], index: 0, kind: input, shape index: {}]   ;;  %s2749_s1 = inlined_call_operand.hbm [shape: f32[4096,128], index: 1, kind: input, shape index: {}]   ;;  %s2750_s2 = inlined_call_operand.hbm [shape: f32[8,128], index: 2, kind: output, shape index: {}]  }
   0x1   :  { %8 = vsyncpa [#allocation6], 0 }
   0x2   :  { %9 = vsyncpa [#allocation4], 0  ;;  %s2719_s9 = smov [#allocation2]  }
   0x3   :  { %s21_s10 = sshll.u32 %s2719_s9, 4  ;;  %s22_s10 = int_to_ptr.vmem [resolvable:$true] %s21_s10 }
   0x4   :  { %s2661_s11 = scalar_lea.vmem %s22_s10, 65536  ;;  %p2666_p1 = scmp.lt.s32.totalorder %s22_s10, %s22_s10 }
   0x5   :  { %p2662_p0 = scmp.ne.s32.totalorder %s22_s10, %s2661_s11  ;;  %p2667_p2 = scmp.lt.s32.totalorder %s2661_s11, %s2661_s11 }
   0x7   :  { %p2668_p3 = por %p2667_p2, %p2666_p1 }
   0x9   :  { %p2669_p4 = pnand %p2668_p3, %p2662_p0 }
   0xb   :  { %2672 = shalt.err (!%p2669_p4)
}
   0xc   :  { %s2720_s12 = smov 128   ;;  %s2721_s13 = smov 8  }
   0xd   :  { %27 = dma.hbm_to_vmem [thread:$0]  %s2748_s0, 65536, %s22_s10, [#allocation3], %s2720_s12, %s2720_s12, %s2721_s13  }
   0xe   :  { %s2722_s16 = smov [#allocation5]  }
   0xf   :  { %s39_s17 = sshll.u32 %s2722_s16, 4  ;;  %s40_s17 = int_to_ptr.vmem [resolvable:$true] %s39_s17 }
  0x10   :  { %s2681_s18 = scalar_lea.vmem %s40_s17, 65536  ;;  %p2686_p6 = scmp.lt.s32.totalorder %s40_s17, %s40_s17 }
  0x11   :  { %p2682_p5 = scmp.ne.s32.totalorder %s40_s17, %s2681_s18  ;;  %p2687_p7 = scmp.lt.s32.totalorder %s2681_s18, %s2681_s18 }
  0x13   :  { %p2688_p8 = por %p2687_p7, %p2686_p6 }
  0x15   :  { %p2689_p9 = pnand %p2688_p8, %p2682_p5 }
  0x17   :  { %2692 = shalt.err (!%p2689_p9)
}
  0x18   :  { %45 = dma.hbm_to_vmem [thread:$0]  %s2749_s1, 65536, %s40_s17, [#allocation6], %s2720_s12, %s2720_s12, %s2721_s13  }
  0x19   :  { %2713 = dma.done.wait [#allocation3], 65536  }
  0x1a   :  { %2714 = vsyncadd [#allocation3], 4294901760 }
  0x1b   :  { %2715 = dma.done.wait [#allocation6], 65536  }
  0x1c   :  { %2716 = vsyncadd [#allocation6], 4294901760  ;;  %v65_v0 = vld [vmem:[#allocation2] sm:$0xff]  ;;  %v66_v1 = vld [vmem:[#allocation2 + $0x8] sm:$0xff]  ;;  %s2723_s0 = smov [#allocation7]  }
  0x1d   :  { %v577_v2 = vld [vmem:[#allocation5] sm:$0xff]  ;;  %v578_v3 = vld [vmem:[#allocation5 + $0x8] sm:$0xff]  ;;  %v67_v4 = vld [vmem:[#allocation2 + $0x10] sm:$0xff]  ;;  %s2633_s1 = sshll.u32 %s2723_s0, 4  ;;  %s2634_s1 = int_to_ptr.vmem [resolvable:$true] %s2633_s1 }
  0x1e   :  { %v579_v5 = vld [vmem:[#allocation5 + $0x10] sm:$0xff]  ;;  %v1089_v6 = vsub.f32 %v65_v0, %v577_v2  ;;  %v1090_v7 = vsub.f32 %v66_v1, %v578_v3  ;;  %v68_v8 = vld [vmem:[#allocation2 + $0x18] sm:$0xff]  ;;  %v69_v11 = vld [vmem:[#allocation2 + $0x20] sm:$0xff]  ;;  %s2693_s21 = scalar_lea.vmem %s2634_s1, 128  ;;  %p2698_p11 = scmp.lt.s32.totalorder %s2634_s1, %s2634_s1 }
  0x1f   :  { %v580_v9 = vld [vmem:[#allocation5 + $0x18] sm:$0xff]  ;;  %v1091_v10 = vsub.f32 %v67_v4, %v579_v5  ;;  %v581_v12 = vld [vmem:[#allocation5 + $0x20] sm:$0xff]  ;;  %v70_v16 = vld [vmem:[#allocation2 + $0x28] sm:$0xff]  ;;  %p2694_p10 = scmp.ne.s32.totalorder %s2634_s1, %s2693_s21  ;;  %p2699_p12 = scmp.lt.s32.totalorder %s2693_s21, %s2693_s21 }
  0x20   :  { %v1092_v13 = vsub.f32 %v68_v8, %v580_v9  ;;  %v1601_v14 = vmul.f32 %v1089_v6, %v1089_v6  ;;  %v1602_v15 = vmul.f32 %v1090_v7, %v1090_v7  ;;  %v582_v17 = vld [vmem:[#allocation5 + $0x28] sm:$0xff]  ;;  %v1093_v18 = vsub.f32 %v69_v11, %v581_v12  ;;  %v71_v20 = vld [vmem:[#allocation2 + $0x30] sm:$0xff]  ;;  %v72_v25 = vld [vmem:[#allocation2 + $0x38] sm:$0xff] }
  0x21   :  { %v1603_v19 = vmul.f32 %v1091_v10, %v1091_v10  ;;  %v583_v21 = vld [vmem:[#allocation5 + $0x30] sm:$0xff]  ;;  %v1094_v22 = vsub.f32 %v70_v16, %v582_v17  ;;  %v584_v26 = vld [vmem:[#allocation5 + $0x38] sm:$0xff]  ;;  %v73_v30 = vld [vmem:[#allocation2 + $0x40] sm:$0xff]  ;;  %p2700_p13 = por %p2699_p12, %p2698_p11 }
  0x22   :  { %v1604_v23 = vmul.f32 %v1092_v13, %v1092_v13  ;;  %v2114_v24 = vadd.f32 %v1602_v15, %v1601_v14  ;;  %v1095_v27 = vsub.f32 %v71_v20, %v583_v21  ;;  %v1605_v28 = vmul.f32 %v1093_v18, %v1093_v18  ;;  %v585_v31 = vld [vmem:[#allocation5 + $0x40] sm:$0xff]  ;;  %v74_v35 = vld [vmem:[#allocation2 + $0x48] sm:$0xff]  ;;  %v75_v40 = vld [vmem:[#allocation2 + $0x50] sm:$0xff] }
  0x23   :  { %v1096_v32 = vsub.f32 %v72_v25, %v584_v26  ;;  %v1606_v33 = vmul.f32 %v1094_v22, %v1094_v22  ;;  %v586_v36 = vld [vmem:[#allocation5 + $0x48] sm:$0xff]  ;;  %v1097_v37 = vsub.f32 %v73_v30, %v585_v31  ;;  %v587_v41 = vld [vmem:[#allocation5 + $0x50] sm:$0xff]  ;;  %v76_v45 = vld [vmem:[#allocation2 + $0x58] sm:$0xff]  ;;  %p2701_p0 = pnand %p2700_p13, %p2694_p10 }
  0x24   :  { %v2115_v29 = vadd.f32 %v2114_v24, %v1603_v19  ;;  %v1607_v38 = vmul.f32 %v1095_v27, %v1095_v27  ;;  %v1098_v42 = vsub.f32 %v74_v35, %v586_v36  ;;  %v588_v46 = vld [vmem:[#allocation5 + $0x58] sm:$0xff]  ;;  %v1099_v47 = vsub.f32 %v75_v40, %v587_v41  ;;  %v77_v50 = vld [vmem:[#allocation2 + $0x60] sm:$0xff]  ;;  %v78_v55 = vld [vmem:[#allocation2 + $0x68] sm:$0xff] }
  0x25   :  { %v1608_v43 = vmul.f32 %v1096_v32, %v1096_v32  ;;  %v1609_v48 = vmul.f32 %v1097_v37, %v1097_v37  ;;  %v589_v51 = vld [vmem:[#allocation5 + $0x60] sm:$0xff]  ;;  %v1100_v52 = vsub.f32 %v76_v45, %v588_v46  ;;  %v590_v56 = vld [vmem:[#allocation5 + $0x68] sm:$0xff]  ;;  %v79_v60 = vld [vmem:[#allocation2 + $0x70] sm:$0xff] }
  0x26   :  { %v2116_v34 = vadd.f32 %v2115_v29, %v1604_v23  ;;  %v1610_v53 = vmul.f32 %v1098_v42, %v1098_v42  ;;  %v1101_v57 = vsub.f32 %v77_v50, %v589_v51  ;;  %v1611_v58 = vmul.f32 %v1099_v47, %v1099_v47  ;;  %v591_v61 = vld [vmem:[#allocation5 + $0x70] sm:$0xff]  ;;  %v80_v1 = vld [vmem:[#allocation2 + $0x78] sm:$0xff]  ;;  %v81_v6 = vld [vmem:[#allocation2 + $0x80] sm:$0xff] }
  0x27   :  { %v1102_v62 = vsub.f32 %v78_v55, %v590_v56  ;;  %v1612_v63 = vmul.f32 %v1100_v52, %v1100_v52  ;;  %v592_v2 = vld [vmem:[#allocation5 + $0x78] sm:$0xff]  ;;  %v1103_v3 = vsub.f32 %v79_v60, %v591_v61  ;;  %v593_v7 = vld [vmem:[#allocation5 + $0x80] sm:$0xff]  ;;  %v82_v11 = vld [vmem:[#allocation2 + $0x88] sm:$0xff] }
  0x28   :  { %v2117_v39 = vadd.f32 %v2116_v34, %v1605_v28  ;;  %v1613_v4 = vmul.f32 %v1101_v57, %v1101_v57  ;;  %v1104_v8 = vsub.f32 %v80_v1, %v592_v2  ;;  %v594_v12 = vld [vmem:[#allocation5 + $0x88] sm:$0xff]  ;;  %v1105_v13 = vsub.f32 %v81_v6, %v593_v7  ;;  %v83_v16 = vld [vmem:[#allocation2 + $0x90] sm:$0xff]  ;;  %v84_v21 = vld [vmem:[#allocation2 + $0x98] sm:$0xff] }
  0x29   :  { %v1614_v9 = vmul.f32 %v1102_v62, %v1102_v62  ;;  %v1615_v14 = vmul.f32 %v1103_v3, %v1103_v3  ;;  %v595_v17 = vld [vmem:[#allocation5 + $0x90] sm:$0xff]  ;;  %v1106_v18 = vsub.f32 %v82_v11, %v594_v12  ;;  %v596_v22 = vld [vmem:[#allocation5 + $0x98] sm:$0xff]  ;;  %v85_v26 = vld [vmem:[#allocation2 + $0xa0] sm:$0xff] }
  0x2a   :  { %v2118_v44 = vadd.f32 %v2117_v39, %v1606_v33  ;;  %v1616_v19 = vmul.f32 %v1104_v8, %v1104_v8  ;;  %v1107_v23 = vsub.f32 %v83_v16, %v595_v17  ;;  %v1617_v24 = vmul.f32 %v1105_v13, %v1105_v13  ;;  %v597_v27 = vld [vmem:[#allocation5 + $0xa0] sm:$0xff]  ;;  %v86_v31 = vld [vmem:[#allocation2 + $0xa8] sm:$0xff]  ;;  %v87_v36 = vld [vmem:[#allocation2 + $0xb0] sm:$0xff] }
  0x2b   :  { %v1108_v28 = vsub.f32 %v84_v21, %v596_v22  ;;  %v1618_v29 = vmul.f32 %v1106_v18, %v1106_v18  ;;  %v598_v32 = vld [vmem:[#allocation5 + $0xa8] sm:$0xff]  ;;  %v1109_v33 = vsub.f32 %v85_v26, %v597_v27  ;;  %v599_v37 = vld [vmem:[#allocation5 + $0xb0] sm:$0xff]  ;;  %v88_v41 = vld [vmem:[#allocation2 + $0xb8] sm:$0xff] }
  0x2c   :  { %v2119_v49 = vadd.f32 %v2118_v44, %v1607_v38  ;;  %v1619_v34 = vmul.f32 %v1107_v23, %v1107_v23  ;;  %v1110_v38 = vsub.f32 %v86_v31, %v598_v32  ;;  %v600_v42 = vld [vmem:[#allocation5 + $0xb8] sm:$0xff]  ;;  %v89_v46 = vld [vmem:[#allocation2 + $0xc0] sm:$0xff]  ;;  %v90_v51 = vld [vmem:[#allocation2 + $0xc8] sm:$0xff] }
  0x2d   :  { %v1620_v39 = vmul.f32 %v1108_v28, %v1108_v28  ;;  %v1621_v44 = vmul.f32 %v1109_v33, %v1109_v33  ;;  %v601_v47 = vld [vmem:[#allocation5 + $0xc0] sm:$0xff]  ;;  %v602_v52 = vld [vmem:[#allocation5 + $0xc8] sm:$0xff]  ;;  %v91_v56 = vld [vmem:[#allocation2 + $0xd0] sm:$0xff] }
  0x2e   :  { %v2120_v54 = vadd.f32 %v2119_v49, %v1608_v43  ;;  %v1111_v43 = vsub.f32 %v87_v36, %v599_v37  ;;  %v1622_v49 = vmul.f32 %v1110_v38, %v1110_v38  ;;  %v603_v57 = vld [vmem:[#allocation5 + $0xd0] sm:$0xff]  ;;  %v92_v61 = vld [vmem:[#allocation2 + $0xd8] sm:$0xff]  ;;  %v93_v2 = vld [vmem:[#allocation2 + $0xe0] sm:$0xff] }
  0x2f   :  { %v604_v62 = vld [vmem:[#allocation5 + $0xd8] sm:$0xff]  ;;  %v605_v3 = vld [vmem:[#allocation5 + $0xe0] sm:$0xff]  ;;  %v94_v7 = vld [vmem:[#allocation2 + $0xe8] sm:$0xff] }
  0x30   :  { %v2121_v59 = vadd.f32 %v2120_v54, %v1609_v48  ;;  %v1112_v48 = vsub.f32 %v88_v41, %v600_v42  ;;  %v1623_v54 = vmul.f32 %v1111_v43, %v1111_v43  ;;  %v606_v8 = vld [vmem:[#allocation5 + $0xe8] sm:$0xff]  ;;  %v95_v12 = vld [vmem:[#allocation2 + $0xf0] sm:$0xff]  ;;  %v96_v17 = vld [vmem:[#allocation2 + $0xf8] sm:$0xff] }
  0x31   :  { %v607_v13 = vld [vmem:[#allocation5 + $0xf0] sm:$0xff]  ;;  %v608_v18 = vld [vmem:[#allocation5 + $0xf8] sm:$0xff]  ;;  %v97_v22 = vld [vmem:[#allocation2 + $0x100] sm:$0xff] }
  0x32   :  { %v2122_v0 = vadd.f32 %v2121_v59, %v1610_v53  ;;  %v1113_v53 = vsub.f32 %v89_v46, %v601_v47  ;;  %v1624_v59 = vmul.f32 %v1112_v48, %v1112_v48  ;;  %v609_v23 = vld [vmem:[#allocation5 + $0x100] sm:$0xff]  ;;  %v98_v27 = vld [vmem:[#allocation2 + $0x108] sm:$0xff]  ;;  %v99_v32 = vld [vmem:[#allocation2 + $0x110] sm:$0xff] }
  0x33   :  { %v610_v28 = vld [vmem:[#allocation5 + $0x108] sm:$0xff]  ;;  %v611_v33 = vld [vmem:[#allocation5 + $0x110] sm:$0xff]  ;;  %v100_v37 = vld [vmem:[#allocation2 + $0x118] sm:$0xff] }
  0x34   :  { %v2123_v5 = vadd.f32 %v2122_v0, %v1611_v58  ;;  %v1114_v58 = vsub.f32 %v90_v51, %v602_v52  ;;  %v1625_v0 = vmul.f32 %v1113_v53, %v1113_v53  ;;  %v612_v38 = vld [vmem:[#allocation5 + $0x118] sm:$0xff]  ;;  %v101_v42 = vld [vmem:[#allocation2 + $0x120] sm:$0xff]  ;;  %v102_v47 = vld [vmem:[#allocation2 + $0x128] sm:$0xff] }
  0x35   :  { %v613_v43 = vld [vmem:[#allocation5 + $0x120] sm:$0xff]  ;;  %v614_v48 = vld [vmem:[#allocation5 + $0x128] sm:$0xff]  ;;  %v103_v52 = vld [vmem:[#allocation2 + $0x130] sm:$0xff] }
  0x36   :  { %v2124_v10 = vadd.f32 %v2123_v5, %v1612_v63  ;;  %v1115_v63 = vsub.f32 %v91_v56, %v603_v57  ;;  %v1626_v5 = vmul.f32 %v1114_v58, %v1114_v58  ;;  %v615_v53 = vld [vmem:[#allocation5 + $0x130] sm:$0xff]  ;;  %v104_v57 = vld [vmem:[#allocation2 + $0x138] sm:$0xff] }
  0x37   :  { %v616_v58 = vld [vmem:[#allocation5 + $0x138] sm:$0xff] }
  0x38   :  { %v2125_v15 = vadd.f32 %v2124_v10, %v1613_v4  ;;  %v1116_v4 = vsub.f32 %v92_v61, %v604_v62  ;;  %v1627_v10 = vmul.f32 %v1115_v63, %v1115_v63  ;;  %v105_v62 = vld [vmem:[#allocation2 + $0x140] sm:$0xff] }
  0x39   :  { %v617_v63 = vld [vmem:[#allocation5 + $0x140] sm:$0xff] }
  0x3a   :  { %v2126_v20 = vadd.f32 %v2125_v15, %v1614_v9  ;;  %v1117_v9 = vsub.f32 %v93_v2, %v605_v3  ;;  %v1628_v15 = vmul.f32 %v1116_v4, %v1116_v4  ;;  %v106_v3 = vld [vmem:[#allocation2 + $0x148] sm:$0xff] }
  0x3b   :  { %v618_v4 = vld [vmem:[#allocation5 + $0x148] sm:$0xff] }
  0x3c   :  { %v2127_v25 = vadd.f32 %v2126_v20, %v1615_v14  ;;  %v1118_v14 = vsub.f32 %v94_v7, %v606_v8  ;;  %v1629_v20 = vmul.f32 %v1117_v9, %v1117_v9  ;;  %v107_v8 = vld [vmem:[#allocation2 + $0x150] sm:$0xff] }
  0x3d   :  { %v619_v9 = vld [vmem:[#allocation5 + $0x150] sm:$0xff] }
  0x3e   :  { %v2128_v30 = vadd.f32 %v2127_v25, %v1616_v19  ;;  %v1119_v19 = vsub.f32 %v95_v12, %v607_v13  ;;  %v1630_v25 = vmul.f32 %v1118_v14, %v1118_v14  ;;  %v108_v13 = vld [vmem:[#allocation2 + $0x158] sm:$0xff] }
  0x3f   :  { %v620_v14 = vld [vmem:[#allocation5 + $0x158] sm:$0xff] }
  0x40   :  { %v2129_v35 = vadd.f32 %v2128_v30, %v1617_v24  ;;  %v1120_v24 = vsub.f32 %v96_v17, %v608_v18  ;;  %v1631_v30 = vmul.f32 %v1119_v19, %v1119_v19  ;;  %v109_v18 = vld [vmem:[#allocation2 + $0x160] sm:$0xff] }
  0x41   :  { %v621_v19 = vld [vmem:[#allocation5 + $0x160] sm:$0xff] }
  0x42   :  { %v2130_v40 = vadd.f32 %v2129_v35, %v1618_v29  ;;  %v1121_v29 = vsub.f32 %v97_v22, %v609_v23  ;;  %v1632_v35 = vmul.f32 %v1120_v24, %v1120_v24  ;;  %v110_v23 = vld [vmem:[#allocation2 + $0x168] sm:$0xff] }
  0x43   :  { %v622_v24 = vld [vmem:[#allocation5 + $0x168] sm:$0xff] }
  0x44   :  { %v2131_v45 = vadd.f32 %v2130_v40, %v1619_v34  ;;  %v1122_v34 = vsub.f32 %v98_v27, %v610_v28  ;;  %v1633_v40 = vmul.f32 %v1121_v29, %v1121_v29  ;;  %v111_v28 = vld [vmem:[#allocation2 + $0x170] sm:$0xff] }
  0x45   :  { %v623_v29 = vld [vmem:[#allocation5 + $0x170] sm:$0xff] }
  0x46   :  { %v2132_v50 = vadd.f32 %v2131_v45, %v1620_v39  ;;  %v1123_v39 = vsub.f32 %v99_v32, %v611_v33  ;;  %v1634_v45 = vmul.f32 %v1122_v34, %v1122_v34  ;;  %v112_v33 = vld [vmem:[#allocation2 + $0x178] sm:$0xff] }
  0x47   :  { %v624_v34 = vld [vmem:[#allocation5 + $0x178] sm:$0xff] }
  0x48   :  { %v2133_v55 = vadd.f32 %v2132_v50, %v1621_v44  ;;  %v1124_v44 = vsub.f32 %v100_v37, %v612_v38  ;;  %v1635_v50 = vmul.f32 %v1123_v39, %v1123_v39  ;;  %v113_v38 = vld [vmem:[#allocation2 + $0x180] sm:$0xff] }
  0x49   :  { %v625_v39 = vld [vmem:[#allocation5 + $0x180] sm:$0xff] }
  0x4a   :  { %v2134_v60 = vadd.f32 %v2133_v55, %v1622_v49  ;;  %v1125_v49 = vsub.f32 %v101_v42, %v613_v43  ;;  %v1636_v55 = vmul.f32 %v1124_v44, %v1124_v44  ;;  %v114_v43 = vld [vmem:[#allocation2 + $0x188] sm:$0xff] }
  0x4b   :  { %v626_v44 = vld [vmem:[#allocation5 + $0x188] sm:$0xff] }
  0x4c   :  { %v2135_v1 = vadd.f32 %v2134_v60, %v1623_v54  ;;  %v1126_v54 = vsub.f32 %v102_v47, %v614_v48  ;;  %v1637_v60 = vmul.f32 %v1125_v49, %v1125_v49  ;;  %v115_v48 = vld [vmem:[#allocation2 + $0x190] sm:$0xff] }
  0x4d   :  { %v627_v49 = vld [vmem:[#allocation5 + $0x190] sm:$0xff] }
  0x4e   :  { %v2136_v6 = vadd.f32 %v2135_v1, %v1624_v59  ;;  %v1127_v59 = vsub.f32 %v103_v52, %v615_v53  ;;  %v1638_v1 = vmul.f32 %v1126_v54, %v1126_v54  ;;  %v116_v53 = vld [vmem:[#allocation2 + $0x198] sm:$0xff] }
  0x4f   :  { %v628_v54 = vld [vmem:[#allocation5 + $0x198] sm:$0xff] }
  0x50   :  { %v2137_v11 = vadd.f32 %v2136_v6, %v1625_v0  ;;  %v1128_v0 = vsub.f32 %v104_v57, %v616_v58  ;;  %v1639_v6 = vmul.f32 %v1127_v59, %v1127_v59  ;;  %v117_v58 = vld [vmem:[#allocation2 + $0x1a0] sm:$0xff] }
  0x51   :  { %v629_v59 = vld [vmem:[#allocation5 + $0x1a0] sm:$0xff] }
  0x52   :  { %v2138_v16 = vadd.f32 %v2137_v11, %v1626_v5  ;;  %v1129_v5 = vsub.f32 %v105_v62, %v617_v63  ;;  %v1640_v11 = vmul.f32 %v1128_v0, %v1128_v0  ;;  %v118_v63 = vld [vmem:[#allocation2 + $0x1a8] sm:$0xff] }
  0x53   :  { %v630_v0 = vld [vmem:[#allocation5 + $0x1a8] sm:$0xff] }
  0x54   :  { %v2139_v21 = vadd.f32 %v2138_v16, %v1627_v10  ;;  %v1130_v10 = vsub.f32 %v106_v3, %v618_v4  ;;  %v1641_v16 = vmul.f32 %v1129_v5, %v1129_v5  ;;  %v119_v4 = vld [vmem:[#allocation2 + $0x1b0] sm:$0xff] }
  0x55   :  { %v631_v5 = vld [vmem:[#allocation5 + $0x1b0] sm:$0xff] }
  0x56   :  { %v2140_v26 = vadd.f32 %v2139_v21, %v1628_v15  ;;  %v1131_v15 = vsub.f32 %v107_v8, %v619_v9  ;;  %v1642_v21 = vmul.f32 %v1130_v10, %v1130_v10  ;;  %v120_v9 = vld [vmem:[#allocation2 + $0x1b8] sm:$0xff] }
  0x57   :  { %v632_v10 = vld [vmem:[#allocation5 + $0x1b8] sm:$0xff] }
  0x58   :  { %v2141_v31 = vadd.f32 %v2140_v26, %v1629_v20  ;;  %v1132_v20 = vsub.f32 %v108_v13, %v620_v14  ;;  %v1643_v26 = vmul.f32 %v1131_v15, %v1131_v15  ;;  %v121_v14 = vld [vmem:[#allocation2 + $0x1c0] sm:$0xff] }
  0x59   :  { %v633_v15 = vld [vmem:[#allocation5 + $0x1c0] sm:$0xff] }
  0x5a   :  { %v2142_v36 = vadd.f32 %v2141_v31, %v1630_v25  ;;  %v1133_v25 = vsub.f32 %v109_v18, %v621_v19  ;;  %v1644_v31 = vmul.f32 %v1132_v20, %v1132_v20  ;;  %v122_v19 = vld [vmem:[#allocation2 + $0x1c8] sm:$0xff] }
  0x5b   :  { %v634_v20 = vld [vmem:[#allocation5 + $0x1c8] sm:$0xff] }
  0x5c   :  { %v2143_v41 = vadd.f32 %v2142_v36, %v1631_v30  ;;  %v1134_v30 = vsub.f32 %v110_v23, %v622_v24  ;;  %v1645_v36 = vmul.f32 %v1133_v25, %v1133_v25  ;;  %v123_v24 = vld [vmem:[#allocation2 + $0x1d0] sm:$0xff] }
  0x5d   :  { %v635_v25 = vld [vmem:[#allocation5 + $0x1d0] sm:$0xff] }
  0x5e   :  { %v2144_v46 = vadd.f32 %v2143_v41, %v1632_v35  ;;  %v1135_v35 = vsub.f32 %v111_v28, %v623_v29  ;;  %v1646_v41 = vmul.f32 %v1134_v30, %v1134_v30  ;;  %v124_v29 = vld [vmem:[#allocation2 + $0x1d8] sm:$0xff] }
  0x5f   :  { %v636_v30 = vld [vmem:[#allocation5 + $0x1d8] sm:$0xff] }
  0x60   :  { %v2145_v51 = vadd.f32 %v2144_v46, %v1633_v40  ;;  %v1136_v40 = vsub.f32 %v112_v33, %v624_v34  ;;  %v1647_v46 = vmul.f32 %v1135_v35, %v1135_v35  ;;  %v125_v34 = vld [vmem:[#allocation2 + $0x1e0] sm:$0xff] }
  0x61   :  { %v637_v35 = vld [vmem:[#allocation5 + $0x1e0] sm:$0xff] }
  0x62   :  { %v2146_v56 = vadd.f32 %v2145_v51, %v1634_v45  ;;  %v1137_v45 = vsub.f32 %v113_v38, %v625_v39  ;;  %v1648_v51 = vmul.f32 %v1136_v40, %v1136_v40  ;;  %v126_v39 = vld [vmem:[#allocation2 + $0x1e8] sm:$0xff] }
  0x63   :  { %v638_v40 = vld [vmem:[#allocation5 + $0x1e8] sm:$0xff] }
  0x64   :  { %v2147_v61 = vadd.f32 %v2146_v56, %v1635_v50  ;;  %v1138_v50 = vsub.f32 %v114_v43, %v626_v44  ;;  %v1649_v56 = vmul.f32 %v1137_v45, %v1137_v45  ;;  %v127_v44 = vld [vmem:[#allocation2 + $0x1f0] sm:$0xff] }
  0x65   :  { %v639_v45 = vld [vmem:[#allocation5 + $0x1f0] sm:$0xff] }
  0x66   :  { %v2148_v2 = vadd.f32 %v2147_v61, %v1636_v55  ;;  %v1139_v55 = vsub.f32 %v115_v48, %v627_v49  ;;  %v1650_v61 = vmul.f32 %v1138_v50, %v1138_v50  ;;  %v128_v49 = vld [vmem:[#allocation2 + $0x1f8] sm:$0xff] }
  0x67   :  { %v640_v50 = vld [vmem:[#allocation5 + $0x1f8] sm:$0xff] }
  0x68   :  { %v2149_v7 = vadd.f32 %v2148_v2, %v1637_v60  ;;  %v1140_v60 = vsub.f32 %v116_v53, %v628_v54  ;;  %v1651_v2 = vmul.f32 %v1139_v55, %v1139_v55  ;;  %v129_v54 = vld [vmem:[#allocation2 + $0x200] sm:$0xff] }
  0x69   :  { %v641_v55 = vld [vmem:[#allocation5 + $0x200] sm:$0xff] }
  0x6a   :  { %v2150_v12 = vadd.f32 %v2149_v7, %v1638_v1  ;;  %v1141_v1 = vsub.f32 %v117_v58, %v629_v59  ;;  %v1652_v7 = vmul.f32 %v1140_v60, %v1140_v60  ;;  %v130_v59 = vld [vmem:[#allocation2 + $0x208] sm:$0xff] }
  0x6b   :  { %v642_v60 = vld [vmem:[#allocation5 + $0x208] sm:$0xff] }
  0x6c   :  { %v2151_v17 = vadd.f32 %v2150_v12, %v1639_v6  ;;  %v1142_v6 = vsub.f32 %v118_v63, %v630_v0  ;;  %v1653_v12 = vmul.f32 %v1141_v1, %v1141_v1  ;;  %v131_v0 = vld [vmem:[#allocation2 + $0x210] sm:$0xff] }
  0x6d   :  { %v643_v1 = vld [vmem:[#allocation5 + $0x210] sm:$0xff] }
  0x6e   :  { %v2152_v22 = vadd.f32 %v2151_v17, %v1640_v11  ;;  %v1143_v11 = vsub.f32 %v119_v4, %v631_v5  ;;  %v1654_v17 = vmul.f32 %v1142_v6, %v1142_v6  ;;  %v132_v5 = vld [vmem:[#allocation2 + $0x218] sm:$0xff] }
  0x6f   :  { %v644_v6 = vld [vmem:[#allocation5 + $0x218] sm:$0xff] }
  0x70   :  { %v2153_v27 = vadd.f32 %v2152_v22, %v1641_v16  ;;  %v1144_v16 = vsub.f32 %v120_v9, %v632_v10  ;;  %v1655_v22 = vmul.f32 %v1143_v11, %v1143_v11  ;;  %v133_v10 = vld [vmem:[#allocation2 + $0x220] sm:$0xff] }
  0x71   :  { %v645_v11 = vld [vmem:[#allocation5 + $0x220] sm:$0xff] }
  0x72   :  { %v2154_v32 = vadd.f32 %v2153_v27, %v1642_v21  ;;  %v1145_v21 = vsub.f32 %v121_v14, %v633_v15  ;;  %v1656_v27 = vmul.f32 %v1144_v16, %v1144_v16  ;;  %v134_v15 = vld [vmem:[#allocation2 + $0x228] sm:$0xff] }
  0x73   :  { %v646_v16 = vld [vmem:[#allocation5 + $0x228] sm:$0xff] }
  0x74   :  { %v2155_v37 = vadd.f32 %v2154_v32, %v1643_v26  ;;  %v1146_v26 = vsub.f32 %v122_v19, %v634_v20  ;;  %v1657_v32 = vmul.f32 %v1145_v21, %v1145_v21  ;;  %v135_v20 = vld [vmem:[#allocation2 + $0x230] sm:$0xff] }
  0x75   :  { %v647_v21 = vld [vmem:[#allocation5 + $0x230] sm:$0xff] }
  0x76   :  { %v2156_v42 = vadd.f32 %v2155_v37, %v1644_v31  ;;  %v1147_v31 = vsub.f32 %v123_v24, %v635_v25  ;;  %v1658_v37 = vmul.f32 %v1146_v26, %v1146_v26  ;;  %v136_v25 = vld [vmem:[#allocation2 + $0x238] sm:$0xff] }
  0x77   :  { %v648_v26 = vld [vmem:[#allocation5 + $0x238] sm:$0xff] }
  0x78   :  { %v2157_v47 = vadd.f32 %v2156_v42, %v1645_v36  ;;  %v1148_v36 = vsub.f32 %v124_v29, %v636_v30  ;;  %v1659_v42 = vmul.f32 %v1147_v31, %v1147_v31  ;;  %v137_v30 = vld [vmem:[#allocation2 + $0x240] sm:$0xff] }
  0x79   :  { %v649_v31 = vld [vmem:[#allocation5 + $0x240] sm:$0xff] }
  0x7a   :  { %v2158_v52 = vadd.f32 %v2157_v47, %v1646_v41  ;;  %v1149_v41 = vsub.f32 %v125_v34, %v637_v35  ;;  %v1660_v47 = vmul.f32 %v1148_v36, %v1148_v36  ;;  %v138_v35 = vld [vmem:[#allocation2 + $0x248] sm:$0xff] }
  0x7b   :  { %v650_v36 = vld [vmem:[#allocation5 + $0x248] sm:$0xff] }
  0x7c   :  { %v2159_v57 = vadd.f32 %v2158_v52, %v1647_v46  ;;  %v1150_v46 = vsub.f32 %v126_v39, %v638_v40  ;;  %v1661_v52 = vmul.f32 %v1149_v41, %v1149_v41  ;;  %v139_v40 = vld [vmem:[#allocation2 + $0x250] sm:$0xff] }
  0x7d   :  { %v651_v41 = vld [vmem:[#allocation5 + $0x250] sm:$0xff] }
  0x7e   :  { %v2160_v62 = vadd.f32 %v2159_v57, %v1648_v51  ;;  %v1151_v51 = vsub.f32 %v127_v44, %v639_v45  ;;  %v1662_v57 = vmul.f32 %v1150_v46, %v1150_v46  ;;  %v140_v45 = vld [vmem:[#allocation2 + $0x258] sm:$0xff] }
  0x7f   :  { %v652_v46 = vld [vmem:[#allocation5 + $0x258] sm:$0xff] }
  0x80   :  { %v2161_v3 = vadd.f32 %v2160_v62, %v1649_v56  ;;  %v1152_v56 = vsub.f32 %v128_v49, %v640_v50  ;;  %v1663_v62 = vmul.f32 %v1151_v51, %v1151_v51  ;;  %v141_v50 = vld [vmem:[#allocation2 + $0x260] sm:$0xff] }
  0x81   :  { %v653_v51 = vld [vmem:[#allocation5 + $0x260] sm:$0xff] }
  0x82   :  { %v2162_v8 = vadd.f32 %v2161_v3, %v1650_v61  ;;  %v1153_v61 = vsub.f32 %v129_v54, %v641_v55  ;;  %v1664_v3 = vmul.f32 %v1152_v56, %v1152_v56  ;;  %v142_v55 = vld [vmem:[#allocation2 + $0x268] sm:$0xff] }
  0x83   :  { %v654_v56 = vld [vmem:[#allocation5 + $0x268] sm:$0xff] }
  0x84   :  { %v2163_v13 = vadd.f32 %v2162_v8, %v1651_v2  ;;  %v1154_v2 = vsub.f32 %v130_v59, %v642_v60  ;;  %v1665_v8 = vmul.f32 %v1153_v61, %v1153_v61  ;;  %v143_v60 = vld [vmem:[#allocation2 + $0x270] sm:$0xff] }
  0x85   :  { %v655_v61 = vld [vmem:[#allocation5 + $0x270] sm:$0xff] }
  0x86   :  { %v2164_v18 = vadd.f32 %v2163_v13, %v1652_v7  ;;  %v1155_v7 = vsub.f32 %v131_v0, %v643_v1  ;;  %v1666_v13 = vmul.f32 %v1154_v2, %v1154_v2  ;;  %v144_v1 = vld [vmem:[#allocation2 + $0x278] sm:$0xff] }
  0x87   :  { %v656_v2 = vld [vmem:[#allocation5 + $0x278] sm:$0xff] }
  0x88   :  { %v2165_v23 = vadd.f32 %v2164_v18, %v1653_v12  ;;  %v1156_v12 = vsub.f32 %v132_v5, %v644_v6  ;;  %v1667_v18 = vmul.f32 %v1155_v7, %v1155_v7  ;;  %v145_v6 = vld [vmem:[#allocation2 + $0x280] sm:$0xff] }
  0x89   :  { %v657_v7 = vld [vmem:[#allocation5 + $0x280] sm:$0xff] }
  0x8a   :  { %v2166_v28 = vadd.f32 %v2165_v23, %v1654_v17  ;;  %v1157_v17 = vsub.f32 %v133_v10, %v645_v11  ;;  %v1668_v23 = vmul.f32 %v1156_v12, %v1156_v12  ;;  %v146_v11 = vld [vmem:[#allocation2 + $0x288] sm:$0xff] }
  0x8b   :  { %v658_v12 = vld [vmem:[#allocation5 + $0x288] sm:$0xff] }
  0x8c   :  { %v2167_v33 = vadd.f32 %v2166_v28, %v1655_v22  ;;  %v1158_v22 = vsub.f32 %v134_v15, %v646_v16  ;;  %v1669_v28 = vmul.f32 %v1157_v17, %v1157_v17  ;;  %v147_v16 = vld [vmem:[#allocation2 + $0x290] sm:$0xff] }
  0x8d   :  { %v659_v17 = vld [vmem:[#allocation5 + $0x290] sm:$0xff] }
  0x8e   :  { %v2168_v38 = vadd.f32 %v2167_v33, %v1656_v27  ;;  %v1159_v27 = vsub.f32 %v135_v20, %v647_v21  ;;  %v1670_v33 = vmul.f32 %v1158_v22, %v1158_v22  ;;  %v148_v21 = vld [vmem:[#allocation2 + $0x298] sm:$0xff] }
  0x8f   :  { %v660_v22 = vld [vmem:[#allocation5 + $0x298] sm:$0xff] }
  0x90   :  { %v2169_v43 = vadd.f32 %v2168_v38, %v1657_v32  ;;  %v1160_v32 = vsub.f32 %v136_v25, %v648_v26  ;;  %v1671_v38 = vmul.f32 %v1159_v27, %v1159_v27  ;;  %v149_v26 = vld [vmem:[#allocation2 + $0x2a0] sm:$0xff] }
  0x91   :  { %v661_v27 = vld [vmem:[#allocation5 + $0x2a0] sm:$0xff] }
  0x92   :  { %v2170_v48 = vadd.f32 %v2169_v43, %v1658_v37  ;;  %v1161_v37 = vsub.f32 %v137_v30, %v649_v31  ;;  %v1672_v43 = vmul.f32 %v1160_v32, %v1160_v32  ;;  %v150_v31 = vld [vmem:[#allocation2 + $0x2a8] sm:$0xff] }
  0x93   :  { %v662_v32 = vld [vmem:[#allocation5 + $0x2a8] sm:$0xff] }
  0x94   :  { %v2171_v53 = vadd.f32 %v2170_v48, %v1659_v42  ;;  %v1162_v42 = vsub.f32 %v138_v35, %v650_v36  ;;  %v1673_v48 = vmul.f32 %v1161_v37, %v1161_v37  ;;  %v151_v36 = vld [vmem:[#allocation2 + $0x2b0] sm:$0xff] }
  0x95   :  { %v663_v37 = vld [vmem:[#allocation5 + $0x2b0] sm:$0xff] }
  0x96   :  { %v2172_v58 = vadd.f32 %v2171_v53, %v1660_v47  ;;  %v1163_v47 = vsub.f32 %v139_v40, %v651_v41  ;;  %v1674_v53 = vmul.f32 %v1162_v42, %v1162_v42  ;;  %v152_v41 = vld [vmem:[#allocation2 + $0x2b8] sm:$0xff] }
  0x97   :  { %v664_v42 = vld [vmem:[#allocation5 + $0x2b8] sm:$0xff] }
  0x98   :  { %v2173_v63 = vadd.f32 %v2172_v58, %v1661_v52  ;;  %v1164_v52 = vsub.f32 %v140_v45, %v652_v46  ;;  %v1675_v58 = vmul.f32 %v1163_v47, %v1163_v47  ;;  %v153_v46 = vld [vmem:[#allocation2 + $0x2c0] sm:$0xff] }
  0x99   :  { %v665_v47 = vld [vmem:[#allocation5 + $0x2c0] sm:$0xff] }
  0x9a   :  { %v2174_v4 = vadd.f32 %v2173_v63, %v1662_v57  ;;  %v1165_v57 = vsub.f32 %v141_v50, %v653_v51  ;;  %v1676_v63 = vmul.f32 %v1164_v52, %v1164_v52  ;;  %v154_v51 = vld [vmem:[#allocation2 + $0x2c8] sm:$0xff] }
  0x9b   :  { %v666_v52 = vld [vmem:[#allocation5 + $0x2c8] sm:$0xff] }
  0x9c   :  { %v2175_v9 = vadd.f32 %v2174_v4, %v1663_v62  ;;  %v1166_v62 = vsub.f32 %v142_v55, %v654_v56  ;;  %v1677_v4 = vmul.f32 %v1165_v57, %v1165_v57  ;;  %v155_v56 = vld [vmem:[#allocation2 + $0x2d0] sm:$0xff] }
  0x9d   :  { %v667_v57 = vld [vmem:[#allocation5 + $0x2d0] sm:$0xff] }
  0x9e   :  { %v2176_v14 = vadd.f32 %v2175_v9, %v1664_v3  ;;  %v1167_v3 = vsub.f32 %v143_v60, %v655_v61  ;;  %v1678_v9 = vmul.f32 %v1166_v62, %v1166_v62  ;;  %v156_v61 = vld [vmem:[#allocation2 + $0x2d8] sm:$0xff] }
  0x9f   :  { %v668_v62 = vld [vmem:[#allocation5 + $0x2d8] sm:$0xff] }
  0xa0   :  { %v2177_v19 = vadd.f32 %v2176_v14, %v1665_v8  ;;  %v1168_v8 = vsub.f32 %v144_v1, %v656_v2  ;;  %v1679_v14 = vmul.f32 %v1167_v3, %v1167_v3  ;;  %v157_v2 = vld [vmem:[#allocation2 + $0x2e0] sm:$0xff] }
  0xa1   :  { %v669_v3 = vld [vmem:[#allocation5 + $0x2e0] sm:$0xff] }
  0xa2   :  { %v2178_v24 = vadd.f32 %v2177_v19, %v1666_v13  ;;  %v1169_v13 = vsub.f32 %v145_v6, %v657_v7  ;;  %v1680_v19 = vmul.f32 %v1168_v8, %v1168_v8  ;;  %v158_v7 = vld [vmem:[#allocation2 + $0x2e8] sm:$0xff] }
  0xa3   :  { %v670_v8 = vld [vmem:[#allocation5 + $0x2e8] sm:$0xff] }
  0xa4   :  { %v2179_v29 = vadd.f32 %v2178_v24, %v1667_v18  ;;  %v1170_v18 = vsub.f32 %v146_v11, %v658_v12  ;;  %v1681_v24 = vmul.f32 %v1169_v13, %v1169_v13  ;;  %v159_v12 = vld [vmem:[#allocation2 + $0x2f0] sm:$0xff] }
  0xa5   :  { %v671_v13 = vld [vmem:[#allocation5 + $0x2f0] sm:$0xff] }
  0xa6   :  { %v2180_v34 = vadd.f32 %v2179_v29, %v1668_v23  ;;  %v1171_v23 = vsub.f32 %v147_v16, %v659_v17  ;;  %v1682_v29 = vmul.f32 %v1170_v18, %v1170_v18  ;;  %v160_v17 = vld [vmem:[#allocation2 + $0x2f8] sm:$0xff] }
  0xa7   :  { %v672_v18 = vld [vmem:[#allocation5 + $0x2f8] sm:$0xff] }
  0xa8   :  { %v2181_v39 = vadd.f32 %v2180_v34, %v1669_v28  ;;  %v1172_v28 = vsub.f32 %v148_v21, %v660_v22  ;;  %v1683_v34 = vmul.f32 %v1171_v23, %v1171_v23  ;;  %v161_v22 = vld [vmem:[#allocation2 + $0x300] sm:$0xff] }
  0xa9   :  { %v673_v23 = vld [vmem:[#allocation5 + $0x300] sm:$0xff] }
  0xaa   :  { %v2182_v44 = vadd.f32 %v2181_v39, %v1670_v33  ;;  %v1173_v33 = vsub.f32 %v149_v26, %v661_v27  ;;  %v1684_v39 = vmul.f32 %v1172_v28, %v1172_v28  ;;  %v162_v27 = vld [vmem:[#allocation2 + $0x308] sm:$0xff] }
  0xab   :  { %v674_v28 = vld [vmem:[#allocation5 + $0x308] sm:$0xff] }
  0xac   :  { %v2183_v49 = vadd.f32 %v2182_v44, %v1671_v38  ;;  %v1174_v38 = vsub.f32 %v150_v31, %v662_v32  ;;  %v1685_v44 = vmul.f32 %v1173_v33, %v1173_v33  ;;  %v163_v32 = vld [vmem:[#allocation2 + $0x310] sm:$0xff] }
  0xad   :  { %v675_v33 = vld [vmem:[#allocation5 + $0x310] sm:$0xff] }
  0xae   :  { %v2184_v54 = vadd.f32 %v2183_v49, %v1672_v43  ;;  %v1175_v43 = vsub.f32 %v151_v36, %v663_v37  ;;  %v1686_v49 = vmul.f32 %v1174_v38, %v1174_v38  ;;  %v164_v37 = vld [vmem:[#allocation2 + $0x318] sm:$0xff] }
  0xaf   :  { %v676_v38 = vld [vmem:[#allocation5 + $0x318] sm:$0xff] }
  0xb0   :  { %v2185_v59 = vadd.f32 %v2184_v54, %v1673_v48  ;;  %v1176_v48 = vsub.f32 %v152_v41, %v664_v42  ;;  %v1687_v54 = vmul.f32 %v1175_v43, %v1175_v43  ;;  %v165_v42 = vld [vmem:[#allocation2 + $0x320] sm:$0xff] }
  0xb1   :  { %v677_v43 = vld [vmem:[#allocation5 + $0x320] sm:$0xff] }
  0xb2   :  { %v2186_v0 = vadd.f32 %v2185_v59, %v1674_v53  ;;  %v1177_v53 = vsub.f32 %v153_v46, %v665_v47  ;;  %v1688_v59 = vmul.f32 %v1176_v48, %v1176_v48  ;;  %v166_v47 = vld [vmem:[#allocation2 + $0x328] sm:$0xff] }
  0xb3   :  { %v678_v48 = vld [vmem:[#allocation5 + $0x328] sm:$0xff] }
  0xb4   :  { %v2187_v5 = vadd.f32 %v2186_v0, %v1675_v58  ;;  %v1178_v58 = vsub.f32 %v154_v51, %v666_v52  ;;  %v1689_v0 = vmul.f32 %v1177_v53, %v1177_v53  ;;  %v167_v52 = vld [vmem:[#allocation2 + $0x330] sm:$0xff] }
  0xb5   :  { %v679_v53 = vld [vmem:[#allocation5 + $0x330] sm:$0xff] }
  0xb6   :  { %v2188_v10 = vadd.f32 %v2187_v5, %v1676_v63  ;;  %v1179_v63 = vsub.f32 %v155_v56, %v667_v57  ;;  %v1690_v5 = vmul.f32 %v1178_v58, %v1178_v58  ;;  %v168_v57 = vld [vmem:[#allocation2 + $0x338] sm:$0xff] }
  0xb7   :  { %v680_v58 = vld [vmem:[#allocation5 + $0x338] sm:$0xff] }
  0xb8   :  { %v2189_v15 = vadd.f32 %v2188_v10, %v1677_v4  ;;  %v1180_v4 = vsub.f32 %v156_v61, %v668_v62  ;;  %v1691_v10 = vmul.f32 %v1179_v63, %v1179_v63  ;;  %v169_v62 = vld [vmem:[#allocation2 + $0x340] sm:$0xff] }
  0xb9   :  { %v681_v63 = vld [vmem:[#allocation5 + $0x340] sm:$0xff] }
  0xba   :  { %v2190_v20 = vadd.f32 %v2189_v15, %v1678_v9  ;;  %v1181_v9 = vsub.f32 %v157_v2, %v669_v3  ;;  %v1692_v15 = vmul.f32 %v1180_v4, %v1180_v4  ;;  %v170_v3 = vld [vmem:[#allocation2 + $0x348] sm:$0xff] }
  0xbb   :  { %v682_v4 = vld [vmem:[#allocation5 + $0x348] sm:$0xff] }
  0xbc   :  { %v2191_v25 = vadd.f32 %v2190_v20, %v1679_v14  ;;  %v1182_v14 = vsub.f32 %v158_v7, %v670_v8  ;;  %v1693_v20 = vmul.f32 %v1181_v9, %v1181_v9  ;;  %v171_v8 = vld [vmem:[#allocation2 + $0x350] sm:$0xff] }
  0xbd   :  { %v683_v9 = vld [vmem:[#allocation5 + $0x350] sm:$0xff] }
  0xbe   :  { %v2192_v30 = vadd.f32 %v2191_v25, %v1680_v19  ;;  %v1183_v19 = vsub.f32 %v159_v12, %v671_v13  ;;  %v1694_v25 = vmul.f32 %v1182_v14, %v1182_v14  ;;  %v172_v13 = vld [vmem:[#allocation2 + $0x358] sm:$0xff] }
  0xbf   :  { %v684_v14 = vld [vmem:[#allocation5 + $0x358] sm:$0xff] }
  0xc0   :  { %v2193_v35 = vadd.f32 %v2192_v30, %v1681_v24  ;;  %v1184_v24 = vsub.f32 %v160_v17, %v672_v18  ;;  %v1695_v30 = vmul.f32 %v1183_v19, %v1183_v19  ;;  %v173_v18 = vld [vmem:[#allocation2 + $0x360] sm:$0xff] }
  0xc1   :  { %v685_v19 = vld [vmem:[#allocation5 + $0x360] sm:$0xff] }
  0xc2   :  { %v2194_v40 = vadd.f32 %v2193_v35, %v1682_v29  ;;  %v1185_v29 = vsub.f32 %v161_v22, %v673_v23  ;;  %v1696_v35 = vmul.f32 %v1184_v24, %v1184_v24  ;;  %v174_v23 = vld [vmem:[#allocation2 + $0x368] sm:$0xff] }
  0xc3   :  { %v686_v24 = vld [vmem:[#allocation5 + $0x368] sm:$0xff] }
  0xc4   :  { %v2195_v45 = vadd.f32 %v2194_v40, %v1683_v34  ;;  %v1186_v34 = vsub.f32 %v162_v27, %v674_v28  ;;  %v1697_v40 = vmul.f32 %v1185_v29, %v1185_v29  ;;  %v175_v28 = vld [vmem:[#allocation2 + $0x370] sm:$0xff] }
  0xc5   :  { %v687_v29 = vld [vmem:[#allocation5 + $0x370] sm:$0xff] }
  0xc6   :  { %v2196_v50 = vadd.f32 %v2195_v45, %v1684_v39  ;;  %v1187_v39 = vsub.f32 %v163_v32, %v675_v33  ;;  %v1698_v45 = vmul.f32 %v1186_v34, %v1186_v34  ;;  %v176_v33 = vld [vmem:[#allocation2 + $0x378] sm:$0xff] }
  0xc7   :  { %v688_v34 = vld [vmem:[#allocation5 + $0x378] sm:$0xff] }
  0xc8   :  { %v2197_v55 = vadd.f32 %v2196_v50, %v1685_v44  ;;  %v1188_v44 = vsub.f32 %v164_v37, %v676_v38  ;;  %v1699_v50 = vmul.f32 %v1187_v39, %v1187_v39  ;;  %v177_v38 = vld [vmem:[#allocation2 + $0x380] sm:$0xff] }
  0xc9   :  { %v689_v39 = vld [vmem:[#allocation5 + $0x380] sm:$0xff] }
  0xca   :  { %v2198_v60 = vadd.f32 %v2197_v55, %v1686_v49  ;;  %v1189_v49 = vsub.f32 %v165_v42, %v677_v43  ;;  %v1700_v55 = vmul.f32 %v1188_v44, %v1188_v44  ;;  %v178_v43 = vld [vmem:[#allocation2 + $0x388] sm:$0xff] }
  0xcb   :  { %v690_v44 = vld [vmem:[#allocation5 + $0x388] sm:$0xff] }
  0xcc   :  { %v2199_v1 = vadd.f32 %v2198_v60, %v1687_v54  ;;  %v1190_v54 = vsub.f32 %v166_v47, %v678_v48  ;;  %v1701_v60 = vmul.f32 %v1189_v49, %v1189_v49  ;;  %v179_v48 = vld [vmem:[#allocation2 + $0x390] sm:$0xff] }
  0xcd   :  { %v691_v49 = vld [vmem:[#allocation5 + $0x390] sm:$0xff] }
  0xce   :  { %v2200_v6 = vadd.f32 %v2199_v1, %v1688_v59  ;;  %v1191_v59 = vsub.f32 %v167_v52, %v679_v53  ;;  %v1702_v1 = vmul.f32 %v1190_v54, %v1190_v54  ;;  %v180_v53 = vld [vmem:[#allocation2 + $0x398] sm:$0xff] }
  0xcf   :  { %v692_v54 = vld [vmem:[#allocation5 + $0x398] sm:$0xff] }
  0xd0   :  { %v2201_v11 = vadd.f32 %v2200_v6, %v1689_v0  ;;  %v1192_v0 = vsub.f32 %v168_v57, %v680_v58  ;;  %v1703_v6 = vmul.f32 %v1191_v59, %v1191_v59  ;;  %v181_v58 = vld [vmem:[#allocation2 + $0x3a0] sm:$0xff] }
  0xd1   :  { %v693_v59 = vld [vmem:[#allocation5 + $0x3a0] sm:$0xff] }
  0xd2   :  { %v2202_v16 = vadd.f32 %v2201_v11, %v1690_v5  ;;  %v1193_v5 = vsub.f32 %v169_v62, %v681_v63  ;;  %v1704_v11 = vmul.f32 %v1192_v0, %v1192_v0  ;;  %v182_v63 = vld [vmem:[#allocation2 + $0x3a8] sm:$0xff] }
  0xd3   :  { %v694_v0 = vld [vmem:[#allocation5 + $0x3a8] sm:$0xff] }
  0xd4   :  { %v2203_v21 = vadd.f32 %v2202_v16, %v1691_v10  ;;  %v1194_v10 = vsub.f32 %v170_v3, %v682_v4  ;;  %v1705_v16 = vmul.f32 %v1193_v5, %v1193_v5  ;;  %v183_v4 = vld [vmem:[#allocation2 + $0x3b0] sm:$0xff] }
  0xd5   :  { %v695_v5 = vld [vmem:[#allocation5 + $0x3b0] sm:$0xff] }
  0xd6   :  { %v2204_v26 = vadd.f32 %v2203_v21, %v1692_v15  ;;  %v1195_v15 = vsub.f32 %v171_v8, %v683_v9  ;;  %v1706_v21 = vmul.f32 %v1194_v10, %v1194_v10  ;;  %v184_v9 = vld [vmem:[#allocation2 + $0x3b8] sm:$0xff] }
  0xd7   :  { %v696_v10 = vld [vmem:[#allocation5 + $0x3b8] sm:$0xff] }
  0xd8   :  { %v2205_v31 = vadd.f32 %v2204_v26, %v1693_v20  ;;  %v1196_v20 = vsub.f32 %v172_v13, %v684_v14  ;;  %v1707_v26 = vmul.f32 %v1195_v15, %v1195_v15  ;;  %v185_v14 = vld [vmem:[#allocation2 + $0x3c0] sm:$0xff] }
  0xd9   :  { %v697_v15 = vld [vmem:[#allocation5 + $0x3c0] sm:$0xff] }
  0xda   :  { %v2206_v36 = vadd.f32 %v2205_v31, %v1694_v25  ;;  %v1197_v25 = vsub.f32 %v173_v18, %v685_v19  ;;  %v1708_v31 = vmul.f32 %v1196_v20, %v1196_v20  ;;  %v186_v19 = vld [vmem:[#allocation2 + $0x3c8] sm:$0xff] }
  0xdb   :  { %v698_v20 = vld [vmem:[#allocation5 + $0x3c8] sm:$0xff] }
  0xdc   :  { %v2207_v41 = vadd.f32 %v2206_v36, %v1695_v30  ;;  %v1198_v30 = vsub.f32 %v174_v23, %v686_v24  ;;  %v1709_v36 = vmul.f32 %v1197_v25, %v1197_v25  ;;  %v187_v24 = vld [vmem:[#allocation2 + $0x3d0] sm:$0xff] }
  0xdd   :  { %v699_v25 = vld [vmem:[#allocation5 + $0x3d0] sm:$0xff] }
  0xde   :  { %v2208_v46 = vadd.f32 %v2207_v41, %v1696_v35  ;;  %v1199_v35 = vsub.f32 %v175_v28, %v687_v29  ;;  %v1710_v41 = vmul.f32 %v1198_v30, %v1198_v30  ;;  %v188_v29 = vld [vmem:[#allocation2 + $0x3d8] sm:$0xff] }
  0xdf   :  { %v700_v30 = vld [vmem:[#allocation5 + $0x3d8] sm:$0xff] }
  0xe0   :  { %v2209_v51 = vadd.f32 %v2208_v46, %v1697_v40  ;;  %v1200_v40 = vsub.f32 %v176_v33, %v688_v34  ;;  %v1711_v46 = vmul.f32 %v1199_v35, %v1199_v35  ;;  %v189_v34 = vld [vmem:[#allocation2 + $0x3e0] sm:$0xff] }
  0xe1   :  { %v701_v35 = vld [vmem:[#allocation5 + $0x3e0] sm:$0xff] }
  0xe2   :  { %v2210_v56 = vadd.f32 %v2209_v51, %v1698_v45  ;;  %v1201_v45 = vsub.f32 %v177_v38, %v689_v39  ;;  %v1712_v51 = vmul.f32 %v1200_v40, %v1200_v40  ;;  %v190_v39 = vld [vmem:[#allocation2 + $0x3e8] sm:$0xff] }
  0xe3   :  { %v702_v40 = vld [vmem:[#allocation5 + $0x3e8] sm:$0xff] }
  0xe4   :  { %v2211_v61 = vadd.f32 %v2210_v56, %v1699_v50  ;;  %v1202_v50 = vsub.f32 %v178_v43, %v690_v44  ;;  %v1713_v56 = vmul.f32 %v1201_v45, %v1201_v45  ;;  %v191_v44 = vld [vmem:[#allocation2 + $0x3f0] sm:$0xff] }
  0xe5   :  { %v703_v45 = vld [vmem:[#allocation5 + $0x3f0] sm:$0xff] }
  0xe6   :  { %v2212_v2 = vadd.f32 %v2211_v61, %v1700_v55  ;;  %v1203_v55 = vsub.f32 %v179_v48, %v691_v49  ;;  %v1714_v61 = vmul.f32 %v1202_v50, %v1202_v50  ;;  %v192_v49 = vld [vmem:[#allocation2 + $0x3f8] sm:$0xff] }
  0xe7   :  { %v704_v50 = vld [vmem:[#allocation5 + $0x3f8] sm:$0xff] }
  0xe8   :  { %v2213_v7 = vadd.f32 %v2212_v2, %v1701_v60  ;;  %v1204_v60 = vsub.f32 %v180_v53, %v692_v54  ;;  %v1715_v2 = vmul.f32 %v1203_v55, %v1203_v55  ;;  %v193_v54 = vld [vmem:[#allocation2 + $0x400] sm:$0xff] }
  0xe9   :  { %v705_v55 = vld [vmem:[#allocation5 + $0x400] sm:$0xff] }
  0xea   :  { %v2214_v12 = vadd.f32 %v2213_v7, %v1702_v1  ;;  %v1205_v1 = vsub.f32 %v181_v58, %v693_v59  ;;  %v1716_v7 = vmul.f32 %v1204_v60, %v1204_v60  ;;  %v194_v59 = vld [vmem:[#allocation2 + $0x408] sm:$0xff] }
  0xeb   :  { %v706_v60 = vld [vmem:[#allocation5 + $0x408] sm:$0xff] }
  0xec   :  { %v2215_v17 = vadd.f32 %v2214_v12, %v1703_v6  ;;  %v1206_v6 = vsub.f32 %v182_v63, %v694_v0  ;;  %v1717_v12 = vmul.f32 %v1205_v1, %v1205_v1  ;;  %v195_v0 = vld [vmem:[#allocation2 + $0x410] sm:$0xff] }
  0xed   :  { %v707_v1 = vld [vmem:[#allocation5 + $0x410] sm:$0xff] }
  0xee   :  { %v2216_v22 = vadd.f32 %v2215_v17, %v1704_v11  ;;  %v1207_v11 = vsub.f32 %v183_v4, %v695_v5  ;;  %v1718_v17 = vmul.f32 %v1206_v6, %v1206_v6  ;;  %v196_v5 = vld [vmem:[#allocation2 + $0x418] sm:$0xff] }
  0xef   :  { %v708_v6 = vld [vmem:[#allocation5 + $0x418] sm:$0xff] }
  0xf0   :  { %v2217_v27 = vadd.f32 %v2216_v22, %v1705_v16  ;;  %v1208_v16 = vsub.f32 %v184_v9, %v696_v10  ;;  %v1719_v22 = vmul.f32 %v1207_v11, %v1207_v11  ;;  %v197_v10 = vld [vmem:[#allocation2 + $0x420] sm:$0xff] }
  0xf1   :  { %v709_v11 = vld [vmem:[#allocation5 + $0x420] sm:$0xff] }
  0xf2   :  { %v2218_v32 = vadd.f32 %v2217_v27, %v1706_v21  ;;  %v1209_v21 = vsub.f32 %v185_v14, %v697_v15  ;;  %v1720_v27 = vmul.f32 %v1208_v16, %v1208_v16  ;;  %v198_v15 = vld [vmem:[#allocation2 + $0x428] sm:$0xff] }
  0xf3   :  { %v710_v16 = vld [vmem:[#allocation5 + $0x428] sm:$0xff] }
  0xf4   :  { %v2219_v37 = vadd.f32 %v2218_v32, %v1707_v26  ;;  %v1210_v26 = vsub.f32 %v186_v19, %v698_v20  ;;  %v1721_v32 = vmul.f32 %v1209_v21, %v1209_v21  ;;  %v199_v20 = vld [vmem:[#allocation2 + $0x430] sm:$0xff] }
  0xf5   :  { %v711_v21 = vld [vmem:[#allocation5 + $0x430] sm:$0xff] }
  0xf6   :  { %v2220_v42 = vadd.f32 %v2219_v37, %v1708_v31  ;;  %v1211_v31 = vsub.f32 %v187_v24, %v699_v25  ;;  %v1722_v37 = vmul.f32 %v1210_v26, %v1210_v26  ;;  %v200_v25 = vld [vmem:[#allocation2 + $0x438] sm:$0xff] }
  0xf7   :  { %v712_v26 = vld [vmem:[#allocation5 + $0x438] sm:$0xff] }
  0xf8   :  { %v2221_v47 = vadd.f32 %v2220_v42, %v1709_v36  ;;  %v1212_v36 = vsub.f32 %v188_v29, %v700_v30  ;;  %v1723_v42 = vmul.f32 %v1211_v31, %v1211_v31  ;;  %v201_v30 = vld [vmem:[#allocation2 + $0x440] sm:$0xff] }
  0xf9   :  { %v713_v31 = vld [vmem:[#allocation5 + $0x440] sm:$0xff] }
  0xfa   :  { %v2222_v52 = vadd.f32 %v2221_v47, %v1710_v41  ;;  %v1213_v41 = vsub.f32 %v189_v34, %v701_v35  ;;  %v1724_v47 = vmul.f32 %v1212_v36, %v1212_v36  ;;  %v202_v35 = vld [vmem:[#allocation2 + $0x448] sm:$0xff] }
  0xfb   :  { %v714_v36 = vld [vmem:[#allocation5 + $0x448] sm:$0xff] }
  0xfc   :  { %v2223_v57 = vadd.f32 %v2222_v52, %v1711_v46  ;;  %v1214_v46 = vsub.f32 %v190_v39, %v702_v40  ;;  %v1725_v52 = vmul.f32 %v1213_v41, %v1213_v41  ;;  %v203_v40 = vld [vmem:[#allocation2 + $0x450] sm:$0xff] }
  0xfd   :  { %v715_v41 = vld [vmem:[#allocation5 + $0x450] sm:$0xff] }
  0xfe   :  { %v2224_v62 = vadd.f32 %v2223_v57, %v1712_v51  ;;  %v1215_v51 = vsub.f32 %v191_v44, %v703_v45  ;;  %v1726_v57 = vmul.f32 %v1214_v46, %v1214_v46  ;;  %v204_v45 = vld [vmem:[#allocation2 + $0x458] sm:$0xff] }
  0xff   :  { %v716_v46 = vld [vmem:[#allocation5 + $0x458] sm:$0xff] }
 0x100   :  { %v2225_v3 = vadd.f32 %v2224_v62, %v1713_v56  ;;  %v1216_v56 = vsub.f32 %v192_v49, %v704_v50  ;;  %v1727_v62 = vmul.f32 %v1215_v51, %v1215_v51  ;;  %v205_v50 = vld [vmem:[#allocation2 + $0x460] sm:$0xff] }
 0x101   :  { %v717_v51 = vld [vmem:[#allocation5 + $0x460] sm:$0xff] }
 0x102   :  { %v2226_v8 = vadd.f32 %v2225_v3, %v1714_v61  ;;  %v1217_v61 = vsub.f32 %v193_v54, %v705_v55  ;;  %v1728_v3 = vmul.f32 %v1216_v56, %v1216_v56  ;;  %v206_v55 = vld [vmem:[#allocation2 + $0x468] sm:$0xff] }
 0x103   :  { %v718_v56 = vld [vmem:[#allocation5 + $0x468] sm:$0xff] }
 0x104   :  { %v2227_v13 = vadd.f32 %v2226_v8, %v1715_v2  ;;  %v1218_v2 = vsub.f32 %v194_v59, %v706_v60  ;;  %v1729_v8 = vmul.f32 %v1217_v61, %v1217_v61  ;;  %v207_v60 = vld [vmem:[#allocation2 + $0x470] sm:$0xff] }
 0x105   :  { %v719_v61 = vld [vmem:[#allocation5 + $0x470] sm:$0xff] }
 0x106   :  { %v2228_v18 = vadd.f32 %v2227_v13, %v1716_v7  ;;  %v1219_v7 = vsub.f32 %v195_v0, %v707_v1  ;;  %v1730_v13 = vmul.f32 %v1218_v2, %v1218_v2  ;;  %v208_v1 = vld [vmem:[#allocation2 + $0x478] sm:$0xff] }
 0x107   :  { %v720_v2 = vld [vmem:[#allocation5 + $0x478] sm:$0xff] }
 0x108   :  { %v2229_v23 = vadd.f32 %v2228_v18, %v1717_v12  ;;  %v1220_v12 = vsub.f32 %v196_v5, %v708_v6  ;;  %v1731_v18 = vmul.f32 %v1219_v7, %v1219_v7  ;;  %v209_v6 = vld [vmem:[#allocation2 + $0x480] sm:$0xff] }
 0x109   :  { %v721_v7 = vld [vmem:[#allocation5 + $0x480] sm:$0xff] }
 0x10a   :  { %v2230_v28 = vadd.f32 %v2229_v23, %v1718_v17  ;;  %v1221_v17 = vsub.f32 %v197_v10, %v709_v11  ;;  %v1732_v23 = vmul.f32 %v1220_v12, %v1220_v12  ;;  %v210_v11 = vld [vmem:[#allocation2 + $0x488] sm:$0xff] }
 0x10b   :  { %v722_v12 = vld [vmem:[#allocation5 + $0x488] sm:$0xff] }
 0x10c   :  { %v2231_v33 = vadd.f32 %v2230_v28, %v1719_v22  ;;  %v1222_v22 = vsub.f32 %v198_v15, %v710_v16  ;;  %v1733_v28 = vmul.f32 %v1221_v17, %v1221_v17  ;;  %v211_v16 = vld [vmem:[#allocation2 + $0x490] sm:$0xff] }
 0x10d   :  { %v723_v17 = vld [vmem:[#allocation5 + $0x490] sm:$0xff] }
 0x10e   :  { %v2232_v38 = vadd.f32 %v2231_v33, %v1720_v27  ;;  %v1223_v27 = vsub.f32 %v199_v20, %v711_v21  ;;  %v1734_v33 = vmul.f32 %v1222_v22, %v1222_v22  ;;  %v212_v21 = vld [vmem:[#allocation2 + $0x498] sm:$0xff] }
 0x10f   :  { %v724_v22 = vld [vmem:[#allocation5 + $0x498] sm:$0xff] }
 0x110   :  { %v2233_v43 = vadd.f32 %v2232_v38, %v1721_v32  ;;  %v1224_v32 = vsub.f32 %v200_v25, %v712_v26  ;;  %v1735_v38 = vmul.f32 %v1223_v27, %v1223_v27  ;;  %v213_v26 = vld [vmem:[#allocation2 + $0x4a0] sm:$0xff] }
 0x111   :  { %v725_v27 = vld [vmem:[#allocation5 + $0x4a0] sm:$0xff] }
 0x112   :  { %v2234_v48 = vadd.f32 %v2233_v43, %v1722_v37  ;;  %v1225_v37 = vsub.f32 %v201_v30, %v713_v31  ;;  %v1736_v43 = vmul.f32 %v1224_v32, %v1224_v32  ;;  %v214_v31 = vld [vmem:[#allocation2 + $0x4a8] sm:$0xff] }
 0x113   :  { %v726_v32 = vld [vmem:[#allocation5 + $0x4a8] sm:$0xff] }
 0x114   :  { %v2235_v53 = vadd.f32 %v2234_v48, %v1723_v42  ;;  %v1226_v42 = vsub.f32 %v202_v35, %v714_v36  ;;  %v1737_v48 = vmul.f32 %v1225_v37, %v1225_v37  ;;  %v215_v36 = vld [vmem:[#allocation2 + $0x4b0] sm:$0xff] }
 0x115   :  { %v727_v37 = vld [vmem:[#allocation5 + $0x4b0] sm:$0xff] }
 0x116   :  { %v2236_v58 = vadd.f32 %v2235_v53, %v1724_v47  ;;  %v1227_v47 = vsub.f32 %v203_v40, %v715_v41  ;;  %v1738_v53 = vmul.f32 %v1226_v42, %v1226_v42  ;;  %v216_v41 = vld [vmem:[#allocation2 + $0x4b8] sm:$0xff] }
 0x117   :  { %v728_v42 = vld [vmem:[#allocation5 + $0x4b8] sm:$0xff] }
 0x118   :  { %v2237_v63 = vadd.f32 %v2236_v58, %v1725_v52  ;;  %v1228_v52 = vsub.f32 %v204_v45, %v716_v46  ;;  %v1739_v58 = vmul.f32 %v1227_v47, %v1227_v47  ;;  %v217_v46 = vld [vmem:[#allocation2 + $0x4c0] sm:$0xff] }
 0x119   :  { %v729_v47 = vld [vmem:[#allocation5 + $0x4c0] sm:$0xff] }
 0x11a   :  { %v2238_v4 = vadd.f32 %v2237_v63, %v1726_v57  ;;  %v1229_v57 = vsub.f32 %v205_v50, %v717_v51  ;;  %v1740_v63 = vmul.f32 %v1228_v52, %v1228_v52  ;;  %v218_v51 = vld [vmem:[#allocation2 + $0x4c8] sm:$0xff] }
 0x11b   :  { %v730_v52 = vld [vmem:[#allocation5 + $0x4c8] sm:$0xff] }
 0x11c   :  { %v2239_v9 = vadd.f32 %v2238_v4, %v1727_v62  ;;  %v1230_v62 = vsub.f32 %v206_v55, %v718_v56  ;;  %v1741_v4 = vmul.f32 %v1229_v57, %v1229_v57  ;;  %v219_v56 = vld [vmem:[#allocation2 + $0x4d0] sm:$0xff] }
 0x11d   :  { %v731_v57 = vld [vmem:[#allocation5 + $0x4d0] sm:$0xff] }
 0x11e   :  { %v2240_v14 = vadd.f32 %v2239_v9, %v1728_v3  ;;  %v1231_v3 = vsub.f32 %v207_v60, %v719_v61  ;;  %v1742_v9 = vmul.f32 %v1230_v62, %v1230_v62  ;;  %v220_v61 = vld [vmem:[#allocation2 + $0x4d8] sm:$0xff] }
 0x11f   :  { %v732_v62 = vld [vmem:[#allocation5 + $0x4d8] sm:$0xff] }
 0x120   :  { %v2241_v19 = vadd.f32 %v2240_v14, %v1729_v8  ;;  %v1232_v8 = vsub.f32 %v208_v1, %v720_v2  ;;  %v1743_v14 = vmul.f32 %v1231_v3, %v1231_v3  ;;  %v221_v2 = vld [vmem:[#allocation2 + $0x4e0] sm:$0xff] }
 0x121   :  { %v733_v3 = vld [vmem:[#allocation5 + $0x4e0] sm:$0xff] }
 0x122   :  { %v2242_v24 = vadd.f32 %v2241_v19, %v1730_v13  ;;  %v1233_v13 = vsub.f32 %v209_v6, %v721_v7  ;;  %v1744_v19 = vmul.f32 %v1232_v8, %v1232_v8  ;;  %v222_v7 = vld [vmem:[#allocation2 + $0x4e8] sm:$0xff] }
 0x123   :  { %v734_v8 = vld [vmem:[#allocation5 + $0x4e8] sm:$0xff] }
 0x124   :  { %v2243_v29 = vadd.f32 %v2242_v24, %v1731_v18  ;;  %v1234_v18 = vsub.f32 %v210_v11, %v722_v12  ;;  %v1745_v24 = vmul.f32 %v1233_v13, %v1233_v13  ;;  %v223_v12 = vld [vmem:[#allocation2 + $0x4f0] sm:$0xff] }
 0x125   :  { %v735_v13 = vld [vmem:[#allocation5 + $0x4f0] sm:$0xff] }
 0x126   :  { %v2244_v34 = vadd.f32 %v2243_v29, %v1732_v23  ;;  %v1235_v23 = vsub.f32 %v211_v16, %v723_v17  ;;  %v1746_v29 = vmul.f32 %v1234_v18, %v1234_v18  ;;  %v224_v17 = vld [vmem:[#allocation2 + $0x4f8] sm:$0xff] }
 0x127   :  { %v736_v18 = vld [vmem:[#allocation5 + $0x4f8] sm:$0xff] }
 0x128   :  { %v2245_v39 = vadd.f32 %v2244_v34, %v1733_v28  ;;  %v1236_v28 = vsub.f32 %v212_v21, %v724_v22  ;;  %v1747_v34 = vmul.f32 %v1235_v23, %v1235_v23  ;;  %v225_v22 = vld [vmem:[#allocation2 + $0x500] sm:$0xff] }
 0x129   :  { %v737_v23 = vld [vmem:[#allocation5 + $0x500] sm:$0xff] }
 0x12a   :  { %v2246_v44 = vadd.f32 %v2245_v39, %v1734_v33  ;;  %v1237_v33 = vsub.f32 %v213_v26, %v725_v27  ;;  %v1748_v39 = vmul.f32 %v1236_v28, %v1236_v28  ;;  %v226_v27 = vld [vmem:[#allocation2 + $0x508] sm:$0xff] }
 0x12b   :  { %v738_v28 = vld [vmem:[#allocation5 + $0x508] sm:$0xff] }
 0x12c   :  { %v2247_v49 = vadd.f32 %v2246_v44, %v1735_v38  ;;  %v1238_v38 = vsub.f32 %v214_v31, %v726_v32  ;;  %v1749_v44 = vmul.f32 %v1237_v33, %v1237_v33  ;;  %v227_v32 = vld [vmem:[#allocation2 + $0x510] sm:$0xff] }
 0x12d   :  { %v739_v33 = vld [vmem:[#allocation5 + $0x510] sm:$0xff] }
 0x12e   :  { %v2248_v54 = vadd.f32 %v2247_v49, %v1736_v43  ;;  %v1239_v43 = vsub.f32 %v215_v36, %v727_v37  ;;  %v1750_v49 = vmul.f32 %v1238_v38, %v1238_v38  ;;  %v228_v37 = vld [vmem:[#allocation2 + $0x518] sm:$0xff] }
 0x12f   :  { %v740_v38 = vld [vmem:[#allocation5 + $0x518] sm:$0xff] }
 0x130   :  { %v2249_v59 = vadd.f32 %v2248_v54, %v1737_v48  ;;  %v1240_v48 = vsub.f32 %v216_v41, %v728_v42  ;;  %v1751_v54 = vmul.f32 %v1239_v43, %v1239_v43  ;;  %v229_v42 = vld [vmem:[#allocation2 + $0x520] sm:$0xff] }
 0x131   :  { %v741_v43 = vld [vmem:[#allocation5 + $0x520] sm:$0xff] }
 0x132   :  { %v2250_v0 = vadd.f32 %v2249_v59, %v1738_v53  ;;  %v1241_v53 = vsub.f32 %v217_v46, %v729_v47  ;;  %v1752_v59 = vmul.f32 %v1240_v48, %v1240_v48  ;;  %v230_v47 = vld [vmem:[#allocation2 + $0x528] sm:$0xff] }
 0x133   :  { %v742_v48 = vld [vmem:[#allocation5 + $0x528] sm:$0xff] }
 0x134   :  { %v2251_v5 = vadd.f32 %v2250_v0, %v1739_v58  ;;  %v1242_v58 = vsub.f32 %v218_v51, %v730_v52  ;;  %v1753_v0 = vmul.f32 %v1241_v53, %v1241_v53  ;;  %v231_v52 = vld [vmem:[#allocation2 + $0x530] sm:$0xff] }
 0x135   :  { %v743_v53 = vld [vmem:[#allocation5 + $0x530] sm:$0xff] }
 0x136   :  { %v2252_v10 = vadd.f32 %v2251_v5, %v1740_v63  ;;  %v1243_v63 = vsub.f32 %v219_v56, %v731_v57  ;;  %v1754_v5 = vmul.f32 %v1242_v58, %v1242_v58  ;;  %v232_v57 = vld [vmem:[#allocation2 + $0x538] sm:$0xff] }
 0x137   :  { %v744_v58 = vld [vmem:[#allocation5 + $0x538] sm:$0xff] }
 0x138   :  { %v2253_v15 = vadd.f32 %v2252_v10, %v1741_v4  ;;  %v1244_v4 = vsub.f32 %v220_v61, %v732_v62  ;;  %v1755_v10 = vmul.f32 %v1243_v63, %v1243_v63  ;;  %v233_v62 = vld [vmem:[#allocation2 + $0x540] sm:$0xff] }
 0x139   :  { %v745_v63 = vld [vmem:[#allocation5 + $0x540] sm:$0xff] }
 0x13a   :  { %v2254_v20 = vadd.f32 %v2253_v15, %v1742_v9  ;;  %v1245_v9 = vsub.f32 %v221_v2, %v733_v3  ;;  %v1756_v15 = vmul.f32 %v1244_v4, %v1244_v4  ;;  %v234_v3 = vld [vmem:[#allocation2 + $0x548] sm:$0xff] }
 0x13b   :  { %v746_v4 = vld [vmem:[#allocation5 + $0x548] sm:$0xff] }
 0x13c   :  { %v2255_v25 = vadd.f32 %v2254_v20, %v1743_v14  ;;  %v1246_v14 = vsub.f32 %v222_v7, %v734_v8  ;;  %v1757_v20 = vmul.f32 %v1245_v9, %v1245_v9  ;;  %v235_v8 = vld [vmem:[#allocation2 + $0x550] sm:$0xff] }
 0x13d   :  { %v747_v9 = vld [vmem:[#allocation5 + $0x550] sm:$0xff] }
 0x13e   :  { %v2256_v30 = vadd.f32 %v2255_v25, %v1744_v19  ;;  %v1247_v19 = vsub.f32 %v223_v12, %v735_v13  ;;  %v1758_v25 = vmul.f32 %v1246_v14, %v1246_v14  ;;  %v236_v13 = vld [vmem:[#allocation2 + $0x558] sm:$0xff] }
 0x13f   :  { %v748_v14 = vld [vmem:[#allocation5 + $0x558] sm:$0xff] }
 0x140   :  { %v2257_v35 = vadd.f32 %v2256_v30, %v1745_v24  ;;  %v1248_v24 = vsub.f32 %v224_v17, %v736_v18  ;;  %v1759_v30 = vmul.f32 %v1247_v19, %v1247_v19  ;;  %v237_v18 = vld [vmem:[#allocation2 + $0x560] sm:$0xff] }
 0x141   :  { %v749_v19 = vld [vmem:[#allocation5 + $0x560] sm:$0xff] }
 0x142   :  { %v2258_v40 = vadd.f32 %v2257_v35, %v1746_v29  ;;  %v1249_v29 = vsub.f32 %v225_v22, %v737_v23  ;;  %v1760_v35 = vmul.f32 %v1248_v24, %v1248_v24  ;;  %v238_v23 = vld [vmem:[#allocation2 + $0x568] sm:$0xff] }
 0x143   :  { %v750_v24 = vld [vmem:[#allocation5 + $0x568] sm:$0xff] }
 0x144   :  { %v2259_v45 = vadd.f32 %v2258_v40, %v1747_v34  ;;  %v1250_v34 = vsub.f32 %v226_v27, %v738_v28  ;;  %v1761_v40 = vmul.f32 %v1249_v29, %v1249_v29  ;;  %v239_v28 = vld [vmem:[#allocation2 + $0x570] sm:$0xff] }
 0x145   :  { %v751_v29 = vld [vmem:[#allocation5 + $0x570] sm:$0xff] }
 0x146   :  { %v2260_v50 = vadd.f32 %v2259_v45, %v1748_v39  ;;  %v1251_v39 = vsub.f32 %v227_v32, %v739_v33  ;;  %v1762_v45 = vmul.f32 %v1250_v34, %v1250_v34  ;;  %v240_v33 = vld [vmem:[#allocation2 + $0x578] sm:$0xff] }
 0x147   :  { %v752_v34 = vld [vmem:[#allocation5 + $0x578] sm:$0xff] }
 0x148   :  { %v2261_v55 = vadd.f32 %v2260_v50, %v1749_v44  ;;  %v1252_v44 = vsub.f32 %v228_v37, %v740_v38  ;;  %v1763_v50 = vmul.f32 %v1251_v39, %v1251_v39  ;;  %v241_v38 = vld [vmem:[#allocation2 + $0x580] sm:$0xff] }
 0x149   :  { %v753_v39 = vld [vmem:[#allocation5 + $0x580] sm:$0xff] }
 0x14a   :  { %v2262_v60 = vadd.f32 %v2261_v55, %v1750_v49  ;;  %v1253_v49 = vsub.f32 %v229_v42, %v741_v43  ;;  %v1764_v55 = vmul.f32 %v1252_v44, %v1252_v44  ;;  %v242_v43 = vld [vmem:[#allocation2 + $0x588] sm:$0xff] }
 0x14b   :  { %v754_v44 = vld [vmem:[#allocation5 + $0x588] sm:$0xff] }
 0x14c   :  { %v2263_v1 = vadd.f32 %v2262_v60, %v1751_v54  ;;  %v1254_v54 = vsub.f32 %v230_v47, %v742_v48  ;;  %v1765_v60 = vmul.f32 %v1253_v49, %v1253_v49  ;;  %v243_v48 = vld [vmem:[#allocation2 + $0x590] sm:$0xff] }
 0x14d   :  { %v755_v49 = vld [vmem:[#allocation5 + $0x590] sm:$0xff] }
 0x14e   :  { %v2264_v6 = vadd.f32 %v2263_v1, %v1752_v59  ;;  %v1255_v59 = vsub.f32 %v231_v52, %v743_v53  ;;  %v1766_v1 = vmul.f32 %v1254_v54, %v1254_v54  ;;  %v244_v53 = vld [vmem:[#allocation2 + $0x598] sm:$0xff] }
 0x14f   :  { %v756_v54 = vld [vmem:[#allocation5 + $0x598] sm:$0xff] }
 0x150   :  { %v2265_v11 = vadd.f32 %v2264_v6, %v1753_v0  ;;  %v1256_v0 = vsub.f32 %v232_v57, %v744_v58  ;;  %v1767_v6 = vmul.f32 %v1255_v59, %v1255_v59  ;;  %v245_v58 = vld [vmem:[#allocation2 + $0x5a0] sm:$0xff] }
 0x151   :  { %v757_v59 = vld [vmem:[#allocation5 + $0x5a0] sm:$0xff] }
 0x152   :  { %v2266_v16 = vadd.f32 %v2265_v11, %v1754_v5  ;;  %v1257_v5 = vsub.f32 %v233_v62, %v745_v63  ;;  %v1768_v11 = vmul.f32 %v1256_v0, %v1256_v0  ;;  %v246_v63 = vld [vmem:[#allocation2 + $0x5a8] sm:$0xff] }
 0x153   :  { %v758_v0 = vld [vmem:[#allocation5 + $0x5a8] sm:$0xff] }
 0x154   :  { %v2267_v21 = vadd.f32 %v2266_v16, %v1755_v10  ;;  %v1258_v10 = vsub.f32 %v234_v3, %v746_v4  ;;  %v1769_v16 = vmul.f32 %v1257_v5, %v1257_v5  ;;  %v247_v4 = vld [vmem:[#allocation2 + $0x5b0] sm:$0xff] }
 0x155   :  { %v759_v5 = vld [vmem:[#allocation5 + $0x5b0] sm:$0xff] }
 0x156   :  { %v2268_v26 = vadd.f32 %v2267_v21, %v1756_v15  ;;  %v1259_v15 = vsub.f32 %v235_v8, %v747_v9  ;;  %v1770_v21 = vmul.f32 %v1258_v10, %v1258_v10  ;;  %v248_v9 = vld [vmem:[#allocation2 + $0x5b8] sm:$0xff] }
 0x157   :  { %v760_v10 = vld [vmem:[#allocation5 + $0x5b8] sm:$0xff] }
 0x158   :  { %v2269_v31 = vadd.f32 %v2268_v26, %v1757_v20  ;;  %v1260_v20 = vsub.f32 %v236_v13, %v748_v14  ;;  %v1771_v26 = vmul.f32 %v1259_v15, %v1259_v15  ;;  %v249_v14 = vld [vmem:[#allocation2 + $0x5c0] sm:$0xff] }
 0x159   :  { %v761_v15 = vld [vmem:[#allocation5 + $0x5c0] sm:$0xff] }
 0x15a   :  { %v2270_v36 = vadd.f32 %v2269_v31, %v1758_v25  ;;  %v1261_v25 = vsub.f32 %v237_v18, %v749_v19  ;;  %v1772_v31 = vmul.f32 %v1260_v20, %v1260_v20  ;;  %v250_v19 = vld [vmem:[#allocation2 + $0x5c8] sm:$0xff] }
 0x15b   :  { %v762_v20 = vld [vmem:[#allocation5 + $0x5c8] sm:$0xff] }
 0x15c   :  { %v2271_v41 = vadd.f32 %v2270_v36, %v1759_v30  ;;  %v1262_v30 = vsub.f32 %v238_v23, %v750_v24  ;;  %v1773_v36 = vmul.f32 %v1261_v25, %v1261_v25  ;;  %v251_v24 = vld [vmem:[#allocation2 + $0x5d0] sm:$0xff] }
 0x15d   :  { %v763_v25 = vld [vmem:[#allocation5 + $0x5d0] sm:$0xff] }
 0x15e   :  { %v2272_v46 = vadd.f32 %v2271_v41, %v1760_v35  ;;  %v1263_v35 = vsub.f32 %v239_v28, %v751_v29  ;;  %v1774_v41 = vmul.f32 %v1262_v30, %v1262_v30  ;;  %v252_v29 = vld [vmem:[#allocation2 + $0x5d8] sm:$0xff] }
 0x15f   :  { %v764_v30 = vld [vmem:[#allocation5 + $0x5d8] sm:$0xff] }
 0x160   :  { %v2273_v51 = vadd.f32 %v2272_v46, %v1761_v40  ;;  %v1264_v40 = vsub.f32 %v240_v33, %v752_v34  ;;  %v1775_v46 = vmul.f32 %v1263_v35, %v1263_v35  ;;  %v253_v34 = vld [vmem:[#allocation2 + $0x5e0] sm:$0xff] }
 0x161   :  { %v765_v35 = vld [vmem:[#allocation5 + $0x5e0] sm:$0xff] }
 0x162   :  { %v2274_v56 = vadd.f32 %v2273_v51, %v1762_v45  ;;  %v1265_v45 = vsub.f32 %v241_v38, %v753_v39  ;;  %v1776_v51 = vmul.f32 %v1264_v40, %v1264_v40  ;;  %v254_v39 = vld [vmem:[#allocation2 + $0x5e8] sm:$0xff] }
 0x163   :  { %v766_v40 = vld [vmem:[#allocation5 + $0x5e8] sm:$0xff] }
 0x164   :  { %v2275_v61 = vadd.f32 %v2274_v56, %v1763_v50  ;;  %v1266_v50 = vsub.f32 %v242_v43, %v754_v44  ;;  %v1777_v56 = vmul.f32 %v1265_v45, %v1265_v45  ;;  %v255_v44 = vld [vmem:[#allocation2 + $0x5f0] sm:$0xff] }
 0x165   :  { %v767_v45 = vld [vmem:[#allocation5 + $0x5f0] sm:$0xff] }
 0x166   :  { %v2276_v2 = vadd.f32 %v2275_v61, %v1764_v55  ;;  %v1267_v55 = vsub.f32 %v243_v48, %v755_v49  ;;  %v1778_v61 = vmul.f32 %v1266_v50, %v1266_v50  ;;  %v256_v49 = vld [vmem:[#allocation2 + $0x5f8] sm:$0xff] }
 0x167   :  { %v768_v50 = vld [vmem:[#allocation5 + $0x5f8] sm:$0xff] }
 0x168   :  { %v2277_v7 = vadd.f32 %v2276_v2, %v1765_v60  ;;  %v1268_v60 = vsub.f32 %v244_v53, %v756_v54  ;;  %v1779_v2 = vmul.f32 %v1267_v55, %v1267_v55  ;;  %v257_v54 = vld [vmem:[#allocation2 + $0x600] sm:$0xff] }
 0x169   :  { %v769_v55 = vld [vmem:[#allocation5 + $0x600] sm:$0xff] }
 0x16a   :  { %v2278_v12 = vadd.f32 %v2277_v7, %v1766_v1  ;;  %v1269_v1 = vsub.f32 %v245_v58, %v757_v59  ;;  %v1780_v7 = vmul.f32 %v1268_v60, %v1268_v60  ;;  %v258_v59 = vld [vmem:[#allocation2 + $0x608] sm:$0xff] }
 0x16b   :  { %v770_v60 = vld [vmem:[#allocation5 + $0x608] sm:$0xff] }
 0x16c   :  { %v2279_v17 = vadd.f32 %v2278_v12, %v1767_v6  ;;  %v1270_v6 = vsub.f32 %v246_v63, %v758_v0  ;;  %v1781_v12 = vmul.f32 %v1269_v1, %v1269_v1  ;;  %v259_v0 = vld [vmem:[#allocation2 + $0x610] sm:$0xff] }
 0x16d   :  { %v771_v1 = vld [vmem:[#allocation5 + $0x610] sm:$0xff] }
 0x16e   :  { %v2280_v22 = vadd.f32 %v2279_v17, %v1768_v11  ;;  %v1271_v11 = vsub.f32 %v247_v4, %v759_v5  ;;  %v1782_v17 = vmul.f32 %v1270_v6, %v1270_v6  ;;  %v260_v5 = vld [vmem:[#allocation2 + $0x618] sm:$0xff] }
 0x16f   :  { %v772_v6 = vld [vmem:[#allocation5 + $0x618] sm:$0xff] }
 0x170   :  { %v2281_v27 = vadd.f32 %v2280_v22, %v1769_v16  ;;  %v1272_v16 = vsub.f32 %v248_v9, %v760_v10  ;;  %v1783_v22 = vmul.f32 %v1271_v11, %v1271_v11  ;;  %v261_v10 = vld [vmem:[#allocation2 + $0x620] sm:$0xff] }
 0x171   :  { %v773_v11 = vld [vmem:[#allocation5 + $0x620] sm:$0xff] }
 0x172   :  { %v2282_v32 = vadd.f32 %v2281_v27, %v1770_v21  ;;  %v1273_v21 = vsub.f32 %v249_v14, %v761_v15  ;;  %v1784_v27 = vmul.f32 %v1272_v16, %v1272_v16  ;;  %v262_v15 = vld [vmem:[#allocation2 + $0x628] sm:$0xff] }
 0x173   :  { %v774_v16 = vld [vmem:[#allocation5 + $0x628] sm:$0xff] }
 0x174   :  { %v2283_v37 = vadd.f32 %v2282_v32, %v1771_v26  ;;  %v1274_v26 = vsub.f32 %v250_v19, %v762_v20  ;;  %v1785_v32 = vmul.f32 %v1273_v21, %v1273_v21  ;;  %v263_v20 = vld [vmem:[#allocation2 + $0x630] sm:$0xff] }
 0x175   :  { %v775_v21 = vld [vmem:[#allocation5 + $0x630] sm:$0xff] }
 0x176   :  { %v2284_v42 = vadd.f32 %v2283_v37, %v1772_v31  ;;  %v1275_v31 = vsub.f32 %v251_v24, %v763_v25  ;;  %v1786_v37 = vmul.f32 %v1274_v26, %v1274_v26  ;;  %v264_v25 = vld [vmem:[#allocation2 + $0x638] sm:$0xff] }
 0x177   :  { %v776_v26 = vld [vmem:[#allocation5 + $0x638] sm:$0xff] }
 0x178   :  { %v2285_v47 = vadd.f32 %v2284_v42, %v1773_v36  ;;  %v1276_v36 = vsub.f32 %v252_v29, %v764_v30  ;;  %v1787_v42 = vmul.f32 %v1275_v31, %v1275_v31  ;;  %v265_v30 = vld [vmem:[#allocation2 + $0x640] sm:$0xff] }
 0x179   :  { %v777_v31 = vld [vmem:[#allocation5 + $0x640] sm:$0xff] }
 0x17a   :  { %v2286_v52 = vadd.f32 %v2285_v47, %v1774_v41  ;;  %v1277_v41 = vsub.f32 %v253_v34, %v765_v35  ;;  %v1788_v47 = vmul.f32 %v1276_v36, %v1276_v36  ;;  %v266_v35 = vld [vmem:[#allocation2 + $0x648] sm:$0xff] }
 0x17b   :  { %v778_v36 = vld [vmem:[#allocation5 + $0x648] sm:$0xff] }
 0x17c   :  { %v2287_v57 = vadd.f32 %v2286_v52, %v1775_v46  ;;  %v1278_v46 = vsub.f32 %v254_v39, %v766_v40  ;;  %v1789_v52 = vmul.f32 %v1277_v41, %v1277_v41  ;;  %v267_v40 = vld [vmem:[#allocation2 + $0x650] sm:$0xff] }
 0x17d   :  { %v779_v41 = vld [vmem:[#allocation5 + $0x650] sm:$0xff] }
 0x17e   :  { %v2288_v62 = vadd.f32 %v2287_v57, %v1776_v51  ;;  %v1279_v51 = vsub.f32 %v255_v44, %v767_v45  ;;  %v1790_v57 = vmul.f32 %v1278_v46, %v1278_v46  ;;  %v268_v45 = vld [vmem:[#allocation2 + $0x658] sm:$0xff] }
 0x17f   :  { %v780_v46 = vld [vmem:[#allocation5 + $0x658] sm:$0xff] }
 0x180   :  { %v2289_v3 = vadd.f32 %v2288_v62, %v1777_v56  ;;  %v1280_v56 = vsub.f32 %v256_v49, %v768_v50  ;;  %v1791_v62 = vmul.f32 %v1279_v51, %v1279_v51  ;;  %v269_v50 = vld [vmem:[#allocation2 + $0x660] sm:$0xff] }
 0x181   :  { %v781_v51 = vld [vmem:[#allocation5 + $0x660] sm:$0xff] }
 0x182   :  { %v2290_v8 = vadd.f32 %v2289_v3, %v1778_v61  ;;  %v1281_v61 = vsub.f32 %v257_v54, %v769_v55  ;;  %v1792_v3 = vmul.f32 %v1280_v56, %v1280_v56  ;;  %v270_v55 = vld [vmem:[#allocation2 + $0x668] sm:$0xff] }
 0x183   :  { %v782_v56 = vld [vmem:[#allocation5 + $0x668] sm:$0xff] }
 0x184   :  { %v2291_v13 = vadd.f32 %v2290_v8, %v1779_v2  ;;  %v1282_v2 = vsub.f32 %v258_v59, %v770_v60  ;;  %v1793_v8 = vmul.f32 %v1281_v61, %v1281_v61  ;;  %v271_v60 = vld [vmem:[#allocation2 + $0x670] sm:$0xff] }
 0x185   :  { %v783_v61 = vld [vmem:[#allocation5 + $0x670] sm:$0xff] }
 0x186   :  { %v2292_v18 = vadd.f32 %v2291_v13, %v1780_v7  ;;  %v1283_v7 = vsub.f32 %v259_v0, %v771_v1  ;;  %v1794_v13 = vmul.f32 %v1282_v2, %v1282_v2  ;;  %v272_v1 = vld [vmem:[#allocation2 + $0x678] sm:$0xff] }
 0x187   :  { %v784_v2 = vld [vmem:[#allocation5 + $0x678] sm:$0xff] }
 0x188   :  { %v2293_v23 = vadd.f32 %v2292_v18, %v1781_v12  ;;  %v1284_v12 = vsub.f32 %v260_v5, %v772_v6  ;;  %v1795_v18 = vmul.f32 %v1283_v7, %v1283_v7  ;;  %v273_v6 = vld [vmem:[#allocation2 + $0x680] sm:$0xff] }
 0x189   :  { %v785_v7 = vld [vmem:[#allocation5 + $0x680] sm:$0xff] }
 0x18a   :  { %v2294_v28 = vadd.f32 %v2293_v23, %v1782_v17  ;;  %v1285_v17 = vsub.f32 %v261_v10, %v773_v11  ;;  %v1796_v23 = vmul.f32 %v1284_v12, %v1284_v12  ;;  %v274_v11 = vld [vmem:[#allocation2 + $0x688] sm:$0xff] }
 0x18b   :  { %v786_v12 = vld [vmem:[#allocation5 + $0x688] sm:$0xff] }
 0x18c   :  { %v2295_v33 = vadd.f32 %v2294_v28, %v1783_v22  ;;  %v1286_v22 = vsub.f32 %v262_v15, %v774_v16  ;;  %v1797_v28 = vmul.f32 %v1285_v17, %v1285_v17  ;;  %v275_v16 = vld [vmem:[#allocation2 + $0x690] sm:$0xff] }
 0x18d   :  { %v787_v17 = vld [vmem:[#allocation5 + $0x690] sm:$0xff] }
 0x18e   :  { %v2296_v38 = vadd.f32 %v2295_v33, %v1784_v27  ;;  %v1287_v27 = vsub.f32 %v263_v20, %v775_v21  ;;  %v1798_v33 = vmul.f32 %v1286_v22, %v1286_v22  ;;  %v276_v21 = vld [vmem:[#allocation2 + $0x698] sm:$0xff] }
 0x18f   :  { %v788_v22 = vld [vmem:[#allocation5 + $0x698] sm:$0xff] }
 0x190   :  { %v2297_v43 = vadd.f32 %v2296_v38, %v1785_v32  ;;  %v1288_v32 = vsub.f32 %v264_v25, %v776_v26  ;;  %v1799_v38 = vmul.f32 %v1287_v27, %v1287_v27  ;;  %v277_v26 = vld [vmem:[#allocation2 + $0x6a0] sm:$0xff] }
 0x191   :  { %v789_v27 = vld [vmem:[#allocation5 + $0x6a0] sm:$0xff] }
 0x192   :  { %v2298_v48 = vadd.f32 %v2297_v43, %v1786_v37  ;;  %v1289_v37 = vsub.f32 %v265_v30, %v777_v31  ;;  %v1800_v43 = vmul.f32 %v1288_v32, %v1288_v32  ;;  %v278_v31 = vld [vmem:[#allocation2 + $0x6a8] sm:$0xff] }
 0x193   :  { %v790_v32 = vld [vmem:[#allocation5 + $0x6a8] sm:$0xff] }
 0x194   :  { %v2299_v53 = vadd.f32 %v2298_v48, %v1787_v42  ;;  %v1290_v42 = vsub.f32 %v266_v35, %v778_v36  ;;  %v1801_v48 = vmul.f32 %v1289_v37, %v1289_v37  ;;  %v279_v36 = vld [vmem:[#allocation2 + $0x6b0] sm:$0xff] }
 0x195   :  { %v791_v37 = vld [vmem:[#allocation5 + $0x6b0] sm:$0xff] }
 0x196   :  { %v2300_v58 = vadd.f32 %v2299_v53, %v1788_v47  ;;  %v1291_v47 = vsub.f32 %v267_v40, %v779_v41  ;;  %v1802_v53 = vmul.f32 %v1290_v42, %v1290_v42  ;;  %v280_v41 = vld [vmem:[#allocation2 + $0x6b8] sm:$0xff] }
 0x197   :  { %v792_v42 = vld [vmem:[#allocation5 + $0x6b8] sm:$0xff] }
 0x198   :  { %v2301_v63 = vadd.f32 %v2300_v58, %v1789_v52  ;;  %v1292_v52 = vsub.f32 %v268_v45, %v780_v46  ;;  %v1803_v58 = vmul.f32 %v1291_v47, %v1291_v47  ;;  %v281_v46 = vld [vmem:[#allocation2 + $0x6c0] sm:$0xff] }
 0x199   :  { %v793_v47 = vld [vmem:[#allocation5 + $0x6c0] sm:$0xff] }
 0x19a   :  { %v2302_v4 = vadd.f32 %v2301_v63, %v1790_v57  ;;  %v1293_v57 = vsub.f32 %v269_v50, %v781_v51  ;;  %v1804_v63 = vmul.f32 %v1292_v52, %v1292_v52  ;;  %v282_v51 = vld [vmem:[#allocation2 + $0x6c8] sm:$0xff] }
 0x19b   :  { %v794_v52 = vld [vmem:[#allocation5 + $0x6c8] sm:$0xff] }
 0x19c   :  { %v2303_v9 = vadd.f32 %v2302_v4, %v1791_v62  ;;  %v1294_v62 = vsub.f32 %v270_v55, %v782_v56  ;;  %v1805_v4 = vmul.f32 %v1293_v57, %v1293_v57  ;;  %v283_v56 = vld [vmem:[#allocation2 + $0x6d0] sm:$0xff] }
 0x19d   :  { %v795_v57 = vld [vmem:[#allocation5 + $0x6d0] sm:$0xff] }
 0x19e   :  { %v2304_v14 = vadd.f32 %v2303_v9, %v1792_v3  ;;  %v1295_v3 = vsub.f32 %v271_v60, %v783_v61  ;;  %v1806_v9 = vmul.f32 %v1294_v62, %v1294_v62  ;;  %v284_v61 = vld [vmem:[#allocation2 + $0x6d8] sm:$0xff] }
 0x19f   :  { %v796_v62 = vld [vmem:[#allocation5 + $0x6d8] sm:$0xff] }
 0x1a0   :  { %v2305_v19 = vadd.f32 %v2304_v14, %v1793_v8  ;;  %v1296_v8 = vsub.f32 %v272_v1, %v784_v2  ;;  %v1807_v14 = vmul.f32 %v1295_v3, %v1295_v3  ;;  %v285_v2 = vld [vmem:[#allocation2 + $0x6e0] sm:$0xff] }
 0x1a1   :  { %v797_v3 = vld [vmem:[#allocation5 + $0x6e0] sm:$0xff] }
 0x1a2   :  { %v2306_v24 = vadd.f32 %v2305_v19, %v1794_v13  ;;  %v1297_v13 = vsub.f32 %v273_v6, %v785_v7  ;;  %v1808_v19 = vmul.f32 %v1296_v8, %v1296_v8  ;;  %v286_v7 = vld [vmem:[#allocation2 + $0x6e8] sm:$0xff] }
 0x1a3   :  { %v798_v8 = vld [vmem:[#allocation5 + $0x6e8] sm:$0xff] }
 0x1a4   :  { %v2307_v29 = vadd.f32 %v2306_v24, %v1795_v18  ;;  %v1298_v18 = vsub.f32 %v274_v11, %v786_v12  ;;  %v1809_v24 = vmul.f32 %v1297_v13, %v1297_v13  ;;  %v287_v12 = vld [vmem:[#allocation2 + $0x6f0] sm:$0xff] }
 0x1a5   :  { %v799_v13 = vld [vmem:[#allocation5 + $0x6f0] sm:$0xff] }
 0x1a6   :  { %v2308_v34 = vadd.f32 %v2307_v29, %v1796_v23  ;;  %v1299_v23 = vsub.f32 %v275_v16, %v787_v17  ;;  %v1810_v29 = vmul.f32 %v1298_v18, %v1298_v18  ;;  %v288_v17 = vld [vmem:[#allocation2 + $0x6f8] sm:$0xff] }
 0x1a7   :  { %v800_v18 = vld [vmem:[#allocation5 + $0x6f8] sm:$0xff] }
 0x1a8   :  { %v2309_v39 = vadd.f32 %v2308_v34, %v1797_v28  ;;  %v1300_v28 = vsub.f32 %v276_v21, %v788_v22  ;;  %v1811_v34 = vmul.f32 %v1299_v23, %v1299_v23  ;;  %v289_v22 = vld [vmem:[#allocation2 + $0x700] sm:$0xff] }
 0x1a9   :  { %v801_v23 = vld [vmem:[#allocation5 + $0x700] sm:$0xff] }
 0x1aa   :  { %v2310_v44 = vadd.f32 %v2309_v39, %v1798_v33  ;;  %v1301_v33 = vsub.f32 %v277_v26, %v789_v27  ;;  %v1812_v39 = vmul.f32 %v1300_v28, %v1300_v28  ;;  %v290_v27 = vld [vmem:[#allocation2 + $0x708] sm:$0xff] }
 0x1ab   :  { %v802_v28 = vld [vmem:[#allocation5 + $0x708] sm:$0xff] }
 0x1ac   :  { %v2311_v49 = vadd.f32 %v2310_v44, %v1799_v38  ;;  %v1302_v38 = vsub.f32 %v278_v31, %v790_v32  ;;  %v1813_v44 = vmul.f32 %v1301_v33, %v1301_v33  ;;  %v291_v32 = vld [vmem:[#allocation2 + $0x710] sm:$0xff] }
 0x1ad   :  { %v803_v33 = vld [vmem:[#allocation5 + $0x710] sm:$0xff] }
 0x1ae   :  { %v2312_v54 = vadd.f32 %v2311_v49, %v1800_v43  ;;  %v1303_v43 = vsub.f32 %v279_v36, %v791_v37  ;;  %v1814_v49 = vmul.f32 %v1302_v38, %v1302_v38  ;;  %v292_v37 = vld [vmem:[#allocation2 + $0x718] sm:$0xff] }
 0x1af   :  { %v804_v38 = vld [vmem:[#allocation5 + $0x718] sm:$0xff] }
 0x1b0   :  { %v2313_v59 = vadd.f32 %v2312_v54, %v1801_v48  ;;  %v1304_v48 = vsub.f32 %v280_v41, %v792_v42  ;;  %v1815_v54 = vmul.f32 %v1303_v43, %v1303_v43  ;;  %v293_v42 = vld [vmem:[#allocation2 + $0x720] sm:$0xff] }
 0x1b1   :  { %v805_v43 = vld [vmem:[#allocation5 + $0x720] sm:$0xff] }
 0x1b2   :  { %v2314_v0 = vadd.f32 %v2313_v59, %v1802_v53  ;;  %v1305_v53 = vsub.f32 %v281_v46, %v793_v47  ;;  %v1816_v59 = vmul.f32 %v1304_v48, %v1304_v48  ;;  %v294_v47 = vld [vmem:[#allocation2 + $0x728] sm:$0xff] }
 0x1b3   :  { %v806_v48 = vld [vmem:[#allocation5 + $0x728] sm:$0xff] }
 0x1b4   :  { %v2315_v5 = vadd.f32 %v2314_v0, %v1803_v58  ;;  %v1306_v58 = vsub.f32 %v282_v51, %v794_v52  ;;  %v1817_v0 = vmul.f32 %v1305_v53, %v1305_v53  ;;  %v295_v52 = vld [vmem:[#allocation2 + $0x730] sm:$0xff] }
 0x1b5   :  { %v807_v53 = vld [vmem:[#allocation5 + $0x730] sm:$0xff] }
 0x1b6   :  { %v2316_v10 = vadd.f32 %v2315_v5, %v1804_v63  ;;  %v1307_v63 = vsub.f32 %v283_v56, %v795_v57  ;;  %v1818_v5 = vmul.f32 %v1306_v58, %v1306_v58  ;;  %v296_v57 = vld [vmem:[#allocation2 + $0x738] sm:$0xff] }
 0x1b7   :  { %v808_v58 = vld [vmem:[#allocation5 + $0x738] sm:$0xff] }
 0x1b8   :  { %v2317_v15 = vadd.f32 %v2316_v10, %v1805_v4  ;;  %v1308_v4 = vsub.f32 %v284_v61, %v796_v62  ;;  %v1819_v10 = vmul.f32 %v1307_v63, %v1307_v63  ;;  %v297_v62 = vld [vmem:[#allocation2 + $0x740] sm:$0xff] }
 0x1b9   :  { %v809_v63 = vld [vmem:[#allocation5 + $0x740] sm:$0xff] }
 0x1ba   :  { %v2318_v20 = vadd.f32 %v2317_v15, %v1806_v9  ;;  %v1309_v9 = vsub.f32 %v285_v2, %v797_v3  ;;  %v1820_v15 = vmul.f32 %v1308_v4, %v1308_v4  ;;  %v298_v3 = vld [vmem:[#allocation2 + $0x748] sm:$0xff] }
 0x1bb   :  { %v810_v4 = vld [vmem:[#allocation5 + $0x748] sm:$0xff] }
 0x1bc   :  { %v2319_v25 = vadd.f32 %v2318_v20, %v1807_v14  ;;  %v1310_v14 = vsub.f32 %v286_v7, %v798_v8  ;;  %v1821_v20 = vmul.f32 %v1309_v9, %v1309_v9  ;;  %v299_v8 = vld [vmem:[#allocation2 + $0x750] sm:$0xff] }
 0x1bd   :  { %v811_v9 = vld [vmem:[#allocation5 + $0x750] sm:$0xff] }
 0x1be   :  { %v2320_v30 = vadd.f32 %v2319_v25, %v1808_v19  ;;  %v1311_v19 = vsub.f32 %v287_v12, %v799_v13  ;;  %v1822_v25 = vmul.f32 %v1310_v14, %v1310_v14  ;;  %v300_v13 = vld [vmem:[#allocation2 + $0x758] sm:$0xff] }
 0x1bf   :  { %v812_v14 = vld [vmem:[#allocation5 + $0x758] sm:$0xff] }
 0x1c0   :  { %v2321_v35 = vadd.f32 %v2320_v30, %v1809_v24  ;;  %v1312_v24 = vsub.f32 %v288_v17, %v800_v18  ;;  %v1823_v30 = vmul.f32 %v1311_v19, %v1311_v19  ;;  %v301_v18 = vld [vmem:[#allocation2 + $0x760] sm:$0xff] }
 0x1c1   :  { %v813_v19 = vld [vmem:[#allocation5 + $0x760] sm:$0xff] }
 0x1c2   :  { %v2322_v40 = vadd.f32 %v2321_v35, %v1810_v29  ;;  %v1313_v29 = vsub.f32 %v289_v22, %v801_v23  ;;  %v1824_v35 = vmul.f32 %v1312_v24, %v1312_v24  ;;  %v302_v23 = vld [vmem:[#allocation2 + $0x768] sm:$0xff] }
 0x1c3   :  { %v814_v24 = vld [vmem:[#allocation5 + $0x768] sm:$0xff] }
 0x1c4   :  { %v2323_v45 = vadd.f32 %v2322_v40, %v1811_v34  ;;  %v1314_v34 = vsub.f32 %v290_v27, %v802_v28  ;;  %v1825_v40 = vmul.f32 %v1313_v29, %v1313_v29  ;;  %v303_v28 = vld [vmem:[#allocation2 + $0x770] sm:$0xff] }
 0x1c5   :  { %v815_v29 = vld [vmem:[#allocation5 + $0x770] sm:$0xff] }
 0x1c6   :  { %v2324_v50 = vadd.f32 %v2323_v45, %v1812_v39  ;;  %v1315_v39 = vsub.f32 %v291_v32, %v803_v33  ;;  %v1826_v45 = vmul.f32 %v1314_v34, %v1314_v34  ;;  %v304_v33 = vld [vmem:[#allocation2 + $0x778] sm:$0xff] }
 0x1c7   :  { %v816_v34 = vld [vmem:[#allocation5 + $0x778] sm:$0xff] }
 0x1c8   :  { %v2325_v55 = vadd.f32 %v2324_v50, %v1813_v44  ;;  %v1316_v44 = vsub.f32 %v292_v37, %v804_v38  ;;  %v1827_v50 = vmul.f32 %v1315_v39, %v1315_v39  ;;  %v305_v38 = vld [vmem:[#allocation2 + $0x780] sm:$0xff] }
 0x1c9   :  { %v817_v39 = vld [vmem:[#allocation5 + $0x780] sm:$0xff] }
 0x1ca   :  { %v2326_v60 = vadd.f32 %v2325_v55, %v1814_v49  ;;  %v1317_v49 = vsub.f32 %v293_v42, %v805_v43  ;;  %v1828_v55 = vmul.f32 %v1316_v44, %v1316_v44  ;;  %v306_v43 = vld [vmem:[#allocation2 + $0x788] sm:$0xff] }
 0x1cb   :  { %v818_v44 = vld [vmem:[#allocation5 + $0x788] sm:$0xff] }
 0x1cc   :  { %v2327_v1 = vadd.f32 %v2326_v60, %v1815_v54  ;;  %v1318_v54 = vsub.f32 %v294_v47, %v806_v48  ;;  %v1829_v60 = vmul.f32 %v1317_v49, %v1317_v49  ;;  %v307_v48 = vld [vmem:[#allocation2 + $0x790] sm:$0xff] }
 0x1cd   :  { %v819_v49 = vld [vmem:[#allocation5 + $0x790] sm:$0xff] }
 0x1ce   :  { %v2328_v6 = vadd.f32 %v2327_v1, %v1816_v59  ;;  %v1319_v59 = vsub.f32 %v295_v52, %v807_v53  ;;  %v1830_v1 = vmul.f32 %v1318_v54, %v1318_v54  ;;  %v308_v53 = vld [vmem:[#allocation2 + $0x798] sm:$0xff] }
 0x1cf   :  { %v820_v54 = vld [vmem:[#allocation5 + $0x798] sm:$0xff] }
 0x1d0   :  { %v2329_v11 = vadd.f32 %v2328_v6, %v1817_v0  ;;  %v1320_v0 = vsub.f32 %v296_v57, %v808_v58  ;;  %v1831_v6 = vmul.f32 %v1319_v59, %v1319_v59  ;;  %v309_v58 = vld [vmem:[#allocation2 + $0x7a0] sm:$0xff] }
 0x1d1   :  { %v821_v59 = vld [vmem:[#allocation5 + $0x7a0] sm:$0xff] }
 0x1d2   :  { %v2330_v16 = vadd.f32 %v2329_v11, %v1818_v5  ;;  %v1321_v5 = vsub.f32 %v297_v62, %v809_v63  ;;  %v1832_v11 = vmul.f32 %v1320_v0, %v1320_v0  ;;  %v310_v63 = vld [vmem:[#allocation2 + $0x7a8] sm:$0xff] }
 0x1d3   :  { %v822_v0 = vld [vmem:[#allocation5 + $0x7a8] sm:$0xff] }
 0x1d4   :  { %v2331_v21 = vadd.f32 %v2330_v16, %v1819_v10  ;;  %v1322_v10 = vsub.f32 %v298_v3, %v810_v4  ;;  %v1833_v16 = vmul.f32 %v1321_v5, %v1321_v5  ;;  %v311_v4 = vld [vmem:[#allocation2 + $0x7b0] sm:$0xff] }
 0x1d5   :  { %v823_v5 = vld [vmem:[#allocation5 + $0x7b0] sm:$0xff] }
 0x1d6   :  { %v2332_v26 = vadd.f32 %v2331_v21, %v1820_v15  ;;  %v1323_v15 = vsub.f32 %v299_v8, %v811_v9  ;;  %v1834_v21 = vmul.f32 %v1322_v10, %v1322_v10  ;;  %v312_v9 = vld [vmem:[#allocation2 + $0x7b8] sm:$0xff] }
 0x1d7   :  { %v824_v10 = vld [vmem:[#allocation5 + $0x7b8] sm:$0xff] }
 0x1d8   :  { %v2333_v31 = vadd.f32 %v2332_v26, %v1821_v20  ;;  %v1324_v20 = vsub.f32 %v300_v13, %v812_v14  ;;  %v1835_v26 = vmul.f32 %v1323_v15, %v1323_v15  ;;  %v313_v14 = vld [vmem:[#allocation2 + $0x7c0] sm:$0xff] }
 0x1d9   :  { %v825_v15 = vld [vmem:[#allocation5 + $0x7c0] sm:$0xff] }
 0x1da   :  { %v2334_v36 = vadd.f32 %v2333_v31, %v1822_v25  ;;  %v1325_v25 = vsub.f32 %v301_v18, %v813_v19  ;;  %v1836_v31 = vmul.f32 %v1324_v20, %v1324_v20  ;;  %v314_v19 = vld [vmem:[#allocation2 + $0x7c8] sm:$0xff] }
 0x1db   :  { %v826_v20 = vld [vmem:[#allocation5 + $0x7c8] sm:$0xff] }
 0x1dc   :  { %v2335_v41 = vadd.f32 %v2334_v36, %v1823_v30  ;;  %v1326_v30 = vsub.f32 %v302_v23, %v814_v24  ;;  %v1837_v36 = vmul.f32 %v1325_v25, %v1325_v25  ;;  %v315_v24 = vld [vmem:[#allocation2 + $0x7d0] sm:$0xff] }
 0x1dd   :  { %v827_v25 = vld [vmem:[#allocation5 + $0x7d0] sm:$0xff] }
 0x1de   :  { %v2336_v46 = vadd.f32 %v2335_v41, %v1824_v35  ;;  %v1327_v35 = vsub.f32 %v303_v28, %v815_v29  ;;  %v1838_v41 = vmul.f32 %v1326_v30, %v1326_v30  ;;  %v316_v29 = vld [vmem:[#allocation2 + $0x7d8] sm:$0xff] }
 0x1df   :  { %v828_v30 = vld [vmem:[#allocation5 + $0x7d8] sm:$0xff] }
 0x1e0   :  { %v2337_v51 = vadd.f32 %v2336_v46, %v1825_v40  ;;  %v1328_v40 = vsub.f32 %v304_v33, %v816_v34  ;;  %v1839_v46 = vmul.f32 %v1327_v35, %v1327_v35  ;;  %v317_v34 = vld [vmem:[#allocation2 + $0x7e0] sm:$0xff] }
 0x1e1   :  { %v829_v35 = vld [vmem:[#allocation5 + $0x7e0] sm:$0xff] }
 0x1e2   :  { %v2338_v56 = vadd.f32 %v2337_v51, %v1826_v45  ;;  %v1329_v45 = vsub.f32 %v305_v38, %v817_v39  ;;  %v1840_v51 = vmul.f32 %v1328_v40, %v1328_v40  ;;  %v318_v39 = vld [vmem:[#allocation2 + $0x7e8] sm:$0xff] }
 0x1e3   :  { %v830_v40 = vld [vmem:[#allocation5 + $0x7e8] sm:$0xff] }
 0x1e4   :  { %v2339_v61 = vadd.f32 %v2338_v56, %v1827_v50  ;;  %v1330_v50 = vsub.f32 %v306_v43, %v818_v44  ;;  %v1841_v56 = vmul.f32 %v1329_v45, %v1329_v45  ;;  %v319_v44 = vld [vmem:[#allocation2 + $0x7f0] sm:$0xff] }
 0x1e5   :  { %v831_v45 = vld [vmem:[#allocation5 + $0x7f0] sm:$0xff] }
 0x1e6   :  { %v2340_v2 = vadd.f32 %v2339_v61, %v1828_v55  ;;  %v1331_v55 = vsub.f32 %v307_v48, %v819_v49  ;;  %v1842_v61 = vmul.f32 %v1330_v50, %v1330_v50  ;;  %v320_v49 = vld [vmem:[#allocation2 + $0x7f8] sm:$0xff] }
 0x1e7   :  { %v832_v50 = vld [vmem:[#allocation5 + $0x7f8] sm:$0xff] }
 0x1e8   :  { %v2341_v7 = vadd.f32 %v2340_v2, %v1829_v60  ;;  %v1332_v60 = vsub.f32 %v308_v53, %v820_v54  ;;  %v1843_v2 = vmul.f32 %v1331_v55, %v1331_v55  ;;  %v321_v54 = vld [vmem:[#allocation2 + $0x800] sm:$0xff] }
 0x1e9   :  { %v833_v55 = vld [vmem:[#allocation5 + $0x800] sm:$0xff] }
 0x1ea   :  { %v2342_v12 = vadd.f32 %v2341_v7, %v1830_v1  ;;  %v1333_v1 = vsub.f32 %v309_v58, %v821_v59  ;;  %v1844_v7 = vmul.f32 %v1332_v60, %v1332_v60  ;;  %v322_v59 = vld [vmem:[#allocation2 + $0x808] sm:$0xff] }
 0x1eb   :  { %v834_v60 = vld [vmem:[#allocation5 + $0x808] sm:$0xff] }
 0x1ec   :  { %v2343_v17 = vadd.f32 %v2342_v12, %v1831_v6  ;;  %v1334_v6 = vsub.f32 %v310_v63, %v822_v0  ;;  %v1845_v12 = vmul.f32 %v1333_v1, %v1333_v1  ;;  %v323_v0 = vld [vmem:[#allocation2 + $0x810] sm:$0xff] }
 0x1ed   :  { %v835_v1 = vld [vmem:[#allocation5 + $0x810] sm:$0xff] }
 0x1ee   :  { %v2344_v22 = vadd.f32 %v2343_v17, %v1832_v11  ;;  %v1335_v11 = vsub.f32 %v311_v4, %v823_v5  ;;  %v1846_v17 = vmul.f32 %v1334_v6, %v1334_v6  ;;  %v324_v5 = vld [vmem:[#allocation2 + $0x818] sm:$0xff] }
 0x1ef   :  { %v836_v6 = vld [vmem:[#allocation5 + $0x818] sm:$0xff] }
 0x1f0   :  { %v2345_v27 = vadd.f32 %v2344_v22, %v1833_v16  ;;  %v1336_v16 = vsub.f32 %v312_v9, %v824_v10  ;;  %v1847_v22 = vmul.f32 %v1335_v11, %v1335_v11  ;;  %v325_v10 = vld [vmem:[#allocation2 + $0x820] sm:$0xff] }
 0x1f1   :  { %v837_v11 = vld [vmem:[#allocation5 + $0x820] sm:$0xff] }
 0x1f2   :  { %v2346_v32 = vadd.f32 %v2345_v27, %v1834_v21  ;;  %v1337_v21 = vsub.f32 %v313_v14, %v825_v15  ;;  %v1848_v27 = vmul.f32 %v1336_v16, %v1336_v16  ;;  %v326_v15 = vld [vmem:[#allocation2 + $0x828] sm:$0xff] }
 0x1f3   :  { %v838_v16 = vld [vmem:[#allocation5 + $0x828] sm:$0xff] }
 0x1f4   :  { %v2347_v37 = vadd.f32 %v2346_v32, %v1835_v26  ;;  %v1338_v26 = vsub.f32 %v314_v19, %v826_v20  ;;  %v1849_v32 = vmul.f32 %v1337_v21, %v1337_v21  ;;  %v327_v20 = vld [vmem:[#allocation2 + $0x830] sm:$0xff] }
 0x1f5   :  { %v839_v21 = vld [vmem:[#allocation5 + $0x830] sm:$0xff] }
 0x1f6   :  { %v2348_v42 = vadd.f32 %v2347_v37, %v1836_v31  ;;  %v1339_v31 = vsub.f32 %v315_v24, %v827_v25  ;;  %v1850_v37 = vmul.f32 %v1338_v26, %v1338_v26  ;;  %v328_v25 = vld [vmem:[#allocation2 + $0x838] sm:$0xff] }
 0x1f7   :  { %v840_v26 = vld [vmem:[#allocation5 + $0x838] sm:$0xff] }
 0x1f8   :  { %v2349_v47 = vadd.f32 %v2348_v42, %v1837_v36  ;;  %v1340_v36 = vsub.f32 %v316_v29, %v828_v30  ;;  %v1851_v42 = vmul.f32 %v1339_v31, %v1339_v31  ;;  %v329_v30 = vld [vmem:[#allocation2 + $0x840] sm:$0xff] }
 0x1f9   :  { %v841_v31 = vld [vmem:[#allocation5 + $0x840] sm:$0xff] }
 0x1fa   :  { %v2350_v52 = vadd.f32 %v2349_v47, %v1838_v41  ;;  %v1341_v41 = vsub.f32 %v317_v34, %v829_v35  ;;  %v1852_v47 = vmul.f32 %v1340_v36, %v1340_v36  ;;  %v330_v35 = vld [vmem:[#allocation2 + $0x848] sm:$0xff] }
 0x1fb   :  { %v842_v36 = vld [vmem:[#allocation5 + $0x848] sm:$0xff] }
 0x1fc   :  { %v2351_v57 = vadd.f32 %v2350_v52, %v1839_v46  ;;  %v1342_v46 = vsub.f32 %v318_v39, %v830_v40  ;;  %v1853_v52 = vmul.f32 %v1341_v41, %v1341_v41  ;;  %v331_v40 = vld [vmem:[#allocation2 + $0x850] sm:$0xff] }
 0x1fd   :  { %v843_v41 = vld [vmem:[#allocation5 + $0x850] sm:$0xff] }
 0x1fe   :  { %v2352_v62 = vadd.f32 %v2351_v57, %v1840_v51  ;;  %v1343_v51 = vsub.f32 %v319_v44, %v831_v45  ;;  %v1854_v57 = vmul.f32 %v1342_v46, %v1342_v46  ;;  %v332_v45 = vld [vmem:[#allocation2 + $0x858] sm:$0xff] }
 0x1ff   :  { %v844_v46 = vld [vmem:[#allocation5 + $0x858] sm:$0xff] }
 0x200   :  { %v2353_v3 = vadd.f32 %v2352_v62, %v1841_v56  ;;  %v1344_v56 = vsub.f32 %v320_v49, %v832_v50  ;;  %v1855_v62 = vmul.f32 %v1343_v51, %v1343_v51  ;;  %v333_v50 = vld [vmem:[#allocation2 + $0x860] sm:$0xff] }
 0x201   :  { %v845_v51 = vld [vmem:[#allocation5 + $0x860] sm:$0xff] }
 0x202   :  { %v2354_v8 = vadd.f32 %v2353_v3, %v1842_v61  ;;  %v1345_v61 = vsub.f32 %v321_v54, %v833_v55  ;;  %v1856_v3 = vmul.f32 %v1344_v56, %v1344_v56  ;;  %v334_v55 = vld [vmem:[#allocation2 + $0x868] sm:$0xff] }
 0x203   :  { %v846_v56 = vld [vmem:[#allocation5 + $0x868] sm:$0xff] }
 0x204   :  { %v2355_v13 = vadd.f32 %v2354_v8, %v1843_v2  ;;  %v1346_v2 = vsub.f32 %v322_v59, %v834_v60  ;;  %v1857_v8 = vmul.f32 %v1345_v61, %v1345_v61  ;;  %v335_v60 = vld [vmem:[#allocation2 + $0x870] sm:$0xff] }
 0x205   :  { %v847_v61 = vld [vmem:[#allocation5 + $0x870] sm:$0xff] }
 0x206   :  { %v2356_v18 = vadd.f32 %v2355_v13, %v1844_v7  ;;  %v1347_v7 = vsub.f32 %v323_v0, %v835_v1  ;;  %v1858_v13 = vmul.f32 %v1346_v2, %v1346_v2  ;;  %v336_v1 = vld [vmem:[#allocation2 + $0x878] sm:$0xff] }
 0x207   :  { %v848_v2 = vld [vmem:[#allocation5 + $0x878] sm:$0xff] }
 0x208   :  { %v2357_v23 = vadd.f32 %v2356_v18, %v1845_v12  ;;  %v1348_v12 = vsub.f32 %v324_v5, %v836_v6  ;;  %v1859_v18 = vmul.f32 %v1347_v7, %v1347_v7  ;;  %v337_v6 = vld [vmem:[#allocation2 + $0x880] sm:$0xff] }
 0x209   :  { %v849_v7 = vld [vmem:[#allocation5 + $0x880] sm:$0xff] }
 0x20a   :  { %v2358_v28 = vadd.f32 %v2357_v23, %v1846_v17  ;;  %v1349_v17 = vsub.f32 %v325_v10, %v837_v11  ;;  %v1860_v23 = vmul.f32 %v1348_v12, %v1348_v12  ;;  %v338_v11 = vld [vmem:[#allocation2 + $0x888] sm:$0xff] }
 0x20b   :  { %v850_v12 = vld [vmem:[#allocation5 + $0x888] sm:$0xff] }
 0x20c   :  { %v2359_v33 = vadd.f32 %v2358_v28, %v1847_v22  ;;  %v1350_v22 = vsub.f32 %v326_v15, %v838_v16  ;;  %v1861_v28 = vmul.f32 %v1349_v17, %v1349_v17  ;;  %v339_v16 = vld [vmem:[#allocation2 + $0x890] sm:$0xff] }
 0x20d   :  { %v851_v17 = vld [vmem:[#allocation5 + $0x890] sm:$0xff] }
 0x20e   :  { %v2360_v38 = vadd.f32 %v2359_v33, %v1848_v27  ;;  %v1351_v27 = vsub.f32 %v327_v20, %v839_v21  ;;  %v1862_v33 = vmul.f32 %v1350_v22, %v1350_v22  ;;  %v340_v21 = vld [vmem:[#allocation2 + $0x898] sm:$0xff] }
 0x20f   :  { %v852_v22 = vld [vmem:[#allocation5 + $0x898] sm:$0xff] }
 0x210   :  { %v2361_v43 = vadd.f32 %v2360_v38, %v1849_v32  ;;  %v1352_v32 = vsub.f32 %v328_v25, %v840_v26  ;;  %v1863_v38 = vmul.f32 %v1351_v27, %v1351_v27  ;;  %v341_v26 = vld [vmem:[#allocation2 + $0x8a0] sm:$0xff] }
 0x211   :  { %v853_v27 = vld [vmem:[#allocation5 + $0x8a0] sm:$0xff] }
 0x212   :  { %v2362_v48 = vadd.f32 %v2361_v43, %v1850_v37  ;;  %v1353_v37 = vsub.f32 %v329_v30, %v841_v31  ;;  %v1864_v43 = vmul.f32 %v1352_v32, %v1352_v32  ;;  %v342_v31 = vld [vmem:[#allocation2 + $0x8a8] sm:$0xff] }
 0x213   :  { %v854_v32 = vld [vmem:[#allocation5 + $0x8a8] sm:$0xff] }
 0x214   :  { %v2363_v53 = vadd.f32 %v2362_v48, %v1851_v42  ;;  %v1354_v42 = vsub.f32 %v330_v35, %v842_v36  ;;  %v1865_v48 = vmul.f32 %v1353_v37, %v1353_v37  ;;  %v343_v36 = vld [vmem:[#allocation2 + $0x8b0] sm:$0xff] }
 0x215   :  { %v855_v37 = vld [vmem:[#allocation5 + $0x8b0] sm:$0xff] }
 0x216   :  { %v2364_v58 = vadd.f32 %v2363_v53, %v1852_v47  ;;  %v1355_v47 = vsub.f32 %v331_v40, %v843_v41  ;;  %v1866_v53 = vmul.f32 %v1354_v42, %v1354_v42  ;;  %v344_v41 = vld [vmem:[#allocation2 + $0x8b8] sm:$0xff] }
 0x217   :  { %v856_v42 = vld [vmem:[#allocation5 + $0x8b8] sm:$0xff] }
 0x218   :  { %v2365_v63 = vadd.f32 %v2364_v58, %v1853_v52  ;;  %v1356_v52 = vsub.f32 %v332_v45, %v844_v46  ;;  %v1867_v58 = vmul.f32 %v1355_v47, %v1355_v47  ;;  %v345_v46 = vld [vmem:[#allocation2 + $0x8c0] sm:$0xff] }
 0x219   :  { %v857_v47 = vld [vmem:[#allocation5 + $0x8c0] sm:$0xff] }
 0x21a   :  { %v2366_v4 = vadd.f32 %v2365_v63, %v1854_v57  ;;  %v1357_v57 = vsub.f32 %v333_v50, %v845_v51  ;;  %v1868_v63 = vmul.f32 %v1356_v52, %v1356_v52  ;;  %v346_v51 = vld [vmem:[#allocation2 + $0x8c8] sm:$0xff] }
 0x21b   :  { %v858_v52 = vld [vmem:[#allocation5 + $0x8c8] sm:$0xff] }
 0x21c   :  { %v2367_v9 = vadd.f32 %v2366_v4, %v1855_v62  ;;  %v1358_v62 = vsub.f32 %v334_v55, %v846_v56  ;;  %v1869_v4 = vmul.f32 %v1357_v57, %v1357_v57  ;;  %v347_v56 = vld [vmem:[#allocation2 + $0x8d0] sm:$0xff] }
 0x21d   :  { %v859_v57 = vld [vmem:[#allocation5 + $0x8d0] sm:$0xff] }
 0x21e   :  { %v2368_v14 = vadd.f32 %v2367_v9, %v1856_v3  ;;  %v1359_v3 = vsub.f32 %v335_v60, %v847_v61  ;;  %v1870_v9 = vmul.f32 %v1358_v62, %v1358_v62  ;;  %v348_v61 = vld [vmem:[#allocation2 + $0x8d8] sm:$0xff] }
 0x21f   :  { %v860_v62 = vld [vmem:[#allocation5 + $0x8d8] sm:$0xff] }
 0x220   :  { %v2369_v19 = vadd.f32 %v2368_v14, %v1857_v8  ;;  %v1360_v8 = vsub.f32 %v336_v1, %v848_v2  ;;  %v1871_v14 = vmul.f32 %v1359_v3, %v1359_v3  ;;  %v349_v2 = vld [vmem:[#allocation2 + $0x8e0] sm:$0xff] }
 0x221   :  { %v861_v3 = vld [vmem:[#allocation5 + $0x8e0] sm:$0xff] }
 0x222   :  { %v2370_v24 = vadd.f32 %v2369_v19, %v1858_v13  ;;  %v1361_v13 = vsub.f32 %v337_v6, %v849_v7  ;;  %v1872_v19 = vmul.f32 %v1360_v8, %v1360_v8  ;;  %v350_v7 = vld [vmem:[#allocation2 + $0x8e8] sm:$0xff] }
 0x223   :  { %v862_v8 = vld [vmem:[#allocation5 + $0x8e8] sm:$0xff] }
 0x224   :  { %v2371_v29 = vadd.f32 %v2370_v24, %v1859_v18  ;;  %v1362_v18 = vsub.f32 %v338_v11, %v850_v12  ;;  %v1873_v24 = vmul.f32 %v1361_v13, %v1361_v13  ;;  %v351_v12 = vld [vmem:[#allocation2 + $0x8f0] sm:$0xff] }
 0x225   :  { %v863_v13 = vld [vmem:[#allocation5 + $0x8f0] sm:$0xff] }
 0x226   :  { %v2372_v34 = vadd.f32 %v2371_v29, %v1860_v23  ;;  %v1363_v23 = vsub.f32 %v339_v16, %v851_v17  ;;  %v1874_v29 = vmul.f32 %v1362_v18, %v1362_v18  ;;  %v352_v17 = vld [vmem:[#allocation2 + $0x8f8] sm:$0xff] }
 0x227   :  { %v864_v18 = vld [vmem:[#allocation5 + $0x8f8] sm:$0xff] }
 0x228   :  { %v2373_v39 = vadd.f32 %v2372_v34, %v1861_v28  ;;  %v1364_v28 = vsub.f32 %v340_v21, %v852_v22  ;;  %v1875_v34 = vmul.f32 %v1363_v23, %v1363_v23  ;;  %v353_v22 = vld [vmem:[#allocation2 + $0x900] sm:$0xff] }
 0x229   :  { %v865_v23 = vld [vmem:[#allocation5 + $0x900] sm:$0xff] }
 0x22a   :  { %v2374_v44 = vadd.f32 %v2373_v39, %v1862_v33  ;;  %v1365_v33 = vsub.f32 %v341_v26, %v853_v27  ;;  %v1876_v39 = vmul.f32 %v1364_v28, %v1364_v28  ;;  %v354_v27 = vld [vmem:[#allocation2 + $0x908] sm:$0xff] }
 0x22b   :  { %v866_v28 = vld [vmem:[#allocation5 + $0x908] sm:$0xff] }
 0x22c   :  { %v2375_v49 = vadd.f32 %v2374_v44, %v1863_v38  ;;  %v1366_v38 = vsub.f32 %v342_v31, %v854_v32  ;;  %v1877_v44 = vmul.f32 %v1365_v33, %v1365_v33  ;;  %v355_v32 = vld [vmem:[#allocation2 + $0x910] sm:$0xff] }
 0x22d   :  { %v867_v33 = vld [vmem:[#allocation5 + $0x910] sm:$0xff] }
 0x22e   :  { %v2376_v54 = vadd.f32 %v2375_v49, %v1864_v43  ;;  %v1367_v43 = vsub.f32 %v343_v36, %v855_v37  ;;  %v1878_v49 = vmul.f32 %v1366_v38, %v1366_v38  ;;  %v356_v37 = vld [vmem:[#allocation2 + $0x918] sm:$0xff] }
 0x22f   :  { %v868_v38 = vld [vmem:[#allocation5 + $0x918] sm:$0xff] }
 0x230   :  { %v2377_v59 = vadd.f32 %v2376_v54, %v1865_v48  ;;  %v1368_v48 = vsub.f32 %v344_v41, %v856_v42  ;;  %v1879_v54 = vmul.f32 %v1367_v43, %v1367_v43  ;;  %v357_v42 = vld [vmem:[#allocation2 + $0x920] sm:$0xff] }
 0x231   :  { %v869_v43 = vld [vmem:[#allocation5 + $0x920] sm:$0xff] }
 0x232   :  { %v2378_v0 = vadd.f32 %v2377_v59, %v1866_v53  ;;  %v1369_v53 = vsub.f32 %v345_v46, %v857_v47  ;;  %v1880_v59 = vmul.f32 %v1368_v48, %v1368_v48  ;;  %v358_v47 = vld [vmem:[#allocation2 + $0x928] sm:$0xff] }
 0x233   :  { %v870_v48 = vld [vmem:[#allocation5 + $0x928] sm:$0xff] }
 0x234   :  { %v2379_v5 = vadd.f32 %v2378_v0, %v1867_v58  ;;  %v1370_v58 = vsub.f32 %v346_v51, %v858_v52  ;;  %v1881_v0 = vmul.f32 %v1369_v53, %v1369_v53  ;;  %v359_v52 = vld [vmem:[#allocation2 + $0x930] sm:$0xff] }
 0x235   :  { %v871_v53 = vld [vmem:[#allocation5 + $0x930] sm:$0xff] }
 0x236   :  { %v2380_v10 = vadd.f32 %v2379_v5, %v1868_v63  ;;  %v1371_v63 = vsub.f32 %v347_v56, %v859_v57  ;;  %v1882_v5 = vmul.f32 %v1370_v58, %v1370_v58  ;;  %v360_v57 = vld [vmem:[#allocation2 + $0x938] sm:$0xff] }
 0x237   :  { %v872_v58 = vld [vmem:[#allocation5 + $0x938] sm:$0xff] }
 0x238   :  { %v2381_v15 = vadd.f32 %v2380_v10, %v1869_v4  ;;  %v1372_v4 = vsub.f32 %v348_v61, %v860_v62  ;;  %v1883_v10 = vmul.f32 %v1371_v63, %v1371_v63  ;;  %v361_v62 = vld [vmem:[#allocation2 + $0x940] sm:$0xff] }
 0x239   :  { %v873_v63 = vld [vmem:[#allocation5 + $0x940] sm:$0xff] }
 0x23a   :  { %v2382_v20 = vadd.f32 %v2381_v15, %v1870_v9  ;;  %v1373_v9 = vsub.f32 %v349_v2, %v861_v3  ;;  %v1884_v15 = vmul.f32 %v1372_v4, %v1372_v4  ;;  %v362_v3 = vld [vmem:[#allocation2 + $0x948] sm:$0xff] }
 0x23b   :  { %v874_v4 = vld [vmem:[#allocation5 + $0x948] sm:$0xff] }
 0x23c   :  { %v2383_v25 = vadd.f32 %v2382_v20, %v1871_v14  ;;  %v1374_v14 = vsub.f32 %v350_v7, %v862_v8  ;;  %v1885_v20 = vmul.f32 %v1373_v9, %v1373_v9  ;;  %v363_v8 = vld [vmem:[#allocation2 + $0x950] sm:$0xff] }
 0x23d   :  { %v875_v9 = vld [vmem:[#allocation5 + $0x950] sm:$0xff] }
 0x23e   :  { %v2384_v30 = vadd.f32 %v2383_v25, %v1872_v19  ;;  %v1375_v19 = vsub.f32 %v351_v12, %v863_v13  ;;  %v1886_v25 = vmul.f32 %v1374_v14, %v1374_v14  ;;  %v364_v13 = vld [vmem:[#allocation2 + $0x958] sm:$0xff] }
 0x23f   :  { %v876_v14 = vld [vmem:[#allocation5 + $0x958] sm:$0xff] }
 0x240   :  { %v2385_v35 = vadd.f32 %v2384_v30, %v1873_v24  ;;  %v1376_v24 = vsub.f32 %v352_v17, %v864_v18  ;;  %v1887_v30 = vmul.f32 %v1375_v19, %v1375_v19  ;;  %v365_v18 = vld [vmem:[#allocation2 + $0x960] sm:$0xff] }
 0x241   :  { %v877_v19 = vld [vmem:[#allocation5 + $0x960] sm:$0xff] }
 0x242   :  { %v2386_v40 = vadd.f32 %v2385_v35, %v1874_v29  ;;  %v1377_v29 = vsub.f32 %v353_v22, %v865_v23  ;;  %v1888_v35 = vmul.f32 %v1376_v24, %v1376_v24  ;;  %v366_v23 = vld [vmem:[#allocation2 + $0x968] sm:$0xff] }
 0x243   :  { %v878_v24 = vld [vmem:[#allocation5 + $0x968] sm:$0xff] }
 0x244   :  { %v2387_v45 = vadd.f32 %v2386_v40, %v1875_v34  ;;  %v1378_v34 = vsub.f32 %v354_v27, %v866_v28  ;;  %v1889_v40 = vmul.f32 %v1377_v29, %v1377_v29  ;;  %v367_v28 = vld [vmem:[#allocation2 + $0x970] sm:$0xff] }
 0x245   :  { %v879_v29 = vld [vmem:[#allocation5 + $0x970] sm:$0xff] }
 0x246   :  { %v2388_v50 = vadd.f32 %v2387_v45, %v1876_v39  ;;  %v1379_v39 = vsub.f32 %v355_v32, %v867_v33  ;;  %v1890_v45 = vmul.f32 %v1378_v34, %v1378_v34  ;;  %v368_v33 = vld [vmem:[#allocation2 + $0x978] sm:$0xff] }
 0x247   :  { %v880_v34 = vld [vmem:[#allocation5 + $0x978] sm:$0xff] }
 0x248   :  { %v2389_v55 = vadd.f32 %v2388_v50, %v1877_v44  ;;  %v1380_v44 = vsub.f32 %v356_v37, %v868_v38  ;;  %v1891_v50 = vmul.f32 %v1379_v39, %v1379_v39  ;;  %v369_v38 = vld [vmem:[#allocation2 + $0x980] sm:$0xff] }
 0x249   :  { %v881_v39 = vld [vmem:[#allocation5 + $0x980] sm:$0xff] }
 0x24a   :  { %v2390_v60 = vadd.f32 %v2389_v55, %v1878_v49  ;;  %v1381_v49 = vsub.f32 %v357_v42, %v869_v43  ;;  %v1892_v55 = vmul.f32 %v1380_v44, %v1380_v44  ;;  %v370_v43 = vld [vmem:[#allocation2 + $0x988] sm:$0xff] }
 0x24b   :  { %v882_v44 = vld [vmem:[#allocation5 + $0x988] sm:$0xff] }
 0x24c   :  { %v2391_v1 = vadd.f32 %v2390_v60, %v1879_v54  ;;  %v1382_v54 = vsub.f32 %v358_v47, %v870_v48  ;;  %v1893_v60 = vmul.f32 %v1381_v49, %v1381_v49  ;;  %v371_v48 = vld [vmem:[#allocation2 + $0x990] sm:$0xff] }
 0x24d   :  { %v883_v49 = vld [vmem:[#allocation5 + $0x990] sm:$0xff] }
 0x24e   :  { %v2392_v6 = vadd.f32 %v2391_v1, %v1880_v59  ;;  %v1383_v59 = vsub.f32 %v359_v52, %v871_v53  ;;  %v1894_v1 = vmul.f32 %v1382_v54, %v1382_v54  ;;  %v372_v53 = vld [vmem:[#allocation2 + $0x998] sm:$0xff] }
 0x24f   :  { %v884_v54 = vld [vmem:[#allocation5 + $0x998] sm:$0xff] }
 0x250   :  { %v2393_v11 = vadd.f32 %v2392_v6, %v1881_v0  ;;  %v1384_v0 = vsub.f32 %v360_v57, %v872_v58  ;;  %v1895_v6 = vmul.f32 %v1383_v59, %v1383_v59  ;;  %v373_v58 = vld [vmem:[#allocation2 + $0x9a0] sm:$0xff] }
 0x251   :  { %v885_v59 = vld [vmem:[#allocation5 + $0x9a0] sm:$0xff] }
 0x252   :  { %v2394_v16 = vadd.f32 %v2393_v11, %v1882_v5  ;;  %v1385_v5 = vsub.f32 %v361_v62, %v873_v63  ;;  %v1896_v11 = vmul.f32 %v1384_v0, %v1384_v0  ;;  %v374_v63 = vld [vmem:[#allocation2 + $0x9a8] sm:$0xff] }
 0x253   :  { %v886_v0 = vld [vmem:[#allocation5 + $0x9a8] sm:$0xff] }
 0x254   :  { %v2395_v21 = vadd.f32 %v2394_v16, %v1883_v10  ;;  %v1386_v10 = vsub.f32 %v362_v3, %v874_v4  ;;  %v1897_v16 = vmul.f32 %v1385_v5, %v1385_v5  ;;  %v375_v4 = vld [vmem:[#allocation2 + $0x9b0] sm:$0xff] }
 0x255   :  { %v887_v5 = vld [vmem:[#allocation5 + $0x9b0] sm:$0xff] }
 0x256   :  { %v2396_v26 = vadd.f32 %v2395_v21, %v1884_v15  ;;  %v1387_v15 = vsub.f32 %v363_v8, %v875_v9  ;;  %v1898_v21 = vmul.f32 %v1386_v10, %v1386_v10  ;;  %v376_v9 = vld [vmem:[#allocation2 + $0x9b8] sm:$0xff] }
 0x257   :  { %v888_v10 = vld [vmem:[#allocation5 + $0x9b8] sm:$0xff] }
 0x258   :  { %v2397_v31 = vadd.f32 %v2396_v26, %v1885_v20  ;;  %v1388_v20 = vsub.f32 %v364_v13, %v876_v14  ;;  %v1899_v26 = vmul.f32 %v1387_v15, %v1387_v15  ;;  %v377_v14 = vld [vmem:[#allocation2 + $0x9c0] sm:$0xff] }
 0x259   :  { %v889_v15 = vld [vmem:[#allocation5 + $0x9c0] sm:$0xff] }
 0x25a   :  { %v2398_v36 = vadd.f32 %v2397_v31, %v1886_v25  ;;  %v1389_v25 = vsub.f32 %v365_v18, %v877_v19  ;;  %v1900_v31 = vmul.f32 %v1388_v20, %v1388_v20  ;;  %v378_v19 = vld [vmem:[#allocation2 + $0x9c8] sm:$0xff] }
 0x25b   :  { %v890_v20 = vld [vmem:[#allocation5 + $0x9c8] sm:$0xff] }
 0x25c   :  { %v2399_v41 = vadd.f32 %v2398_v36, %v1887_v30  ;;  %v1390_v30 = vsub.f32 %v366_v23, %v878_v24  ;;  %v1901_v36 = vmul.f32 %v1389_v25, %v1389_v25  ;;  %v379_v24 = vld [vmem:[#allocation2 + $0x9d0] sm:$0xff] }
 0x25d   :  { %v891_v25 = vld [vmem:[#allocation5 + $0x9d0] sm:$0xff] }
 0x25e   :  { %v2400_v46 = vadd.f32 %v2399_v41, %v1888_v35  ;;  %v1391_v35 = vsub.f32 %v367_v28, %v879_v29  ;;  %v1902_v41 = vmul.f32 %v1390_v30, %v1390_v30  ;;  %v380_v29 = vld [vmem:[#allocation2 + $0x9d8] sm:$0xff] }
 0x25f   :  { %v892_v30 = vld [vmem:[#allocation5 + $0x9d8] sm:$0xff] }
 0x260   :  { %v2401_v51 = vadd.f32 %v2400_v46, %v1889_v40  ;;  %v1392_v40 = vsub.f32 %v368_v33, %v880_v34  ;;  %v1903_v46 = vmul.f32 %v1391_v35, %v1391_v35  ;;  %v381_v34 = vld [vmem:[#allocation2 + $0x9e0] sm:$0xff] }
 0x261   :  { %v893_v35 = vld [vmem:[#allocation5 + $0x9e0] sm:$0xff] }
 0x262   :  { %v2402_v56 = vadd.f32 %v2401_v51, %v1890_v45  ;;  %v1393_v45 = vsub.f32 %v369_v38, %v881_v39  ;;  %v1904_v51 = vmul.f32 %v1392_v40, %v1392_v40  ;;  %v382_v39 = vld [vmem:[#allocation2 + $0x9e8] sm:$0xff] }
 0x263   :  { %v894_v40 = vld [vmem:[#allocation5 + $0x9e8] sm:$0xff] }
 0x264   :  { %v2403_v61 = vadd.f32 %v2402_v56, %v1891_v50  ;;  %v1394_v50 = vsub.f32 %v370_v43, %v882_v44  ;;  %v1905_v56 = vmul.f32 %v1393_v45, %v1393_v45  ;;  %v383_v44 = vld [vmem:[#allocation2 + $0x9f0] sm:$0xff] }
 0x265   :  { %v895_v45 = vld [vmem:[#allocation5 + $0x9f0] sm:$0xff] }
 0x266   :  { %v2404_v2 = vadd.f32 %v2403_v61, %v1892_v55  ;;  %v1395_v55 = vsub.f32 %v371_v48, %v883_v49  ;;  %v1906_v61 = vmul.f32 %v1394_v50, %v1394_v50  ;;  %v384_v49 = vld [vmem:[#allocation2 + $0x9f8] sm:$0xff] }
 0x267   :  { %v896_v50 = vld [vmem:[#allocation5 + $0x9f8] sm:$0xff] }
 0x268   :  { %v2405_v7 = vadd.f32 %v2404_v2, %v1893_v60  ;;  %v1396_v60 = vsub.f32 %v372_v53, %v884_v54  ;;  %v1907_v2 = vmul.f32 %v1395_v55, %v1395_v55  ;;  %v385_v54 = vld [vmem:[#allocation2 + $0xa00] sm:$0xff] }
 0x269   :  { %v897_v55 = vld [vmem:[#allocation5 + $0xa00] sm:$0xff] }
 0x26a   :  { %v2406_v12 = vadd.f32 %v2405_v7, %v1894_v1  ;;  %v1397_v1 = vsub.f32 %v373_v58, %v885_v59  ;;  %v1908_v7 = vmul.f32 %v1396_v60, %v1396_v60  ;;  %v386_v59 = vld [vmem:[#allocation2 + $0xa08] sm:$0xff] }
 0x26b   :  { %v898_v60 = vld [vmem:[#allocation5 + $0xa08] sm:$0xff] }
 0x26c   :  { %v2407_v17 = vadd.f32 %v2406_v12, %v1895_v6  ;;  %v1398_v6 = vsub.f32 %v374_v63, %v886_v0  ;;  %v1909_v12 = vmul.f32 %v1397_v1, %v1397_v1  ;;  %v387_v0 = vld [vmem:[#allocation2 + $0xa10] sm:$0xff] }
 0x26d   :  { %v899_v1 = vld [vmem:[#allocation5 + $0xa10] sm:$0xff] }
 0x26e   :  { %v2408_v22 = vadd.f32 %v2407_v17, %v1896_v11  ;;  %v1399_v11 = vsub.f32 %v375_v4, %v887_v5  ;;  %v1910_v17 = vmul.f32 %v1398_v6, %v1398_v6  ;;  %v388_v5 = vld [vmem:[#allocation2 + $0xa18] sm:$0xff] }
 0x26f   :  { %v900_v6 = vld [vmem:[#allocation5 + $0xa18] sm:$0xff] }
 0x270   :  { %v2409_v27 = vadd.f32 %v2408_v22, %v1897_v16  ;;  %v1400_v16 = vsub.f32 %v376_v9, %v888_v10  ;;  %v1911_v22 = vmul.f32 %v1399_v11, %v1399_v11  ;;  %v389_v10 = vld [vmem:[#allocation2 + $0xa20] sm:$0xff] }
 0x271   :  { %v901_v11 = vld [vmem:[#allocation5 + $0xa20] sm:$0xff] }
 0x272   :  { %v2410_v32 = vadd.f32 %v2409_v27, %v1898_v21  ;;  %v1401_v21 = vsub.f32 %v377_v14, %v889_v15  ;;  %v1912_v27 = vmul.f32 %v1400_v16, %v1400_v16  ;;  %v390_v15 = vld [vmem:[#allocation2 + $0xa28] sm:$0xff] }
 0x273   :  { %v902_v16 = vld [vmem:[#allocation5 + $0xa28] sm:$0xff] }
 0x274   :  { %v2411_v37 = vadd.f32 %v2410_v32, %v1899_v26  ;;  %v1402_v26 = vsub.f32 %v378_v19, %v890_v20  ;;  %v1913_v32 = vmul.f32 %v1401_v21, %v1401_v21  ;;  %v391_v20 = vld [vmem:[#allocation2 + $0xa30] sm:$0xff] }
 0x275   :  { %v903_v21 = vld [vmem:[#allocation5 + $0xa30] sm:$0xff] }
 0x276   :  { %v2412_v42 = vadd.f32 %v2411_v37, %v1900_v31  ;;  %v1403_v31 = vsub.f32 %v379_v24, %v891_v25  ;;  %v1914_v37 = vmul.f32 %v1402_v26, %v1402_v26  ;;  %v392_v25 = vld [vmem:[#allocation2 + $0xa38] sm:$0xff] }
 0x277   :  { %v904_v26 = vld [vmem:[#allocation5 + $0xa38] sm:$0xff] }
 0x278   :  { %v2413_v47 = vadd.f32 %v2412_v42, %v1901_v36  ;;  %v1404_v36 = vsub.f32 %v380_v29, %v892_v30  ;;  %v1915_v42 = vmul.f32 %v1403_v31, %v1403_v31  ;;  %v393_v30 = vld [vmem:[#allocation2 + $0xa40] sm:$0xff] }
 0x279   :  { %v905_v31 = vld [vmem:[#allocation5 + $0xa40] sm:$0xff] }
 0x27a   :  { %v2414_v52 = vadd.f32 %v2413_v47, %v1902_v41  ;;  %v1405_v41 = vsub.f32 %v381_v34, %v893_v35  ;;  %v1916_v47 = vmul.f32 %v1404_v36, %v1404_v36  ;;  %v394_v35 = vld [vmem:[#allocation2 + $0xa48] sm:$0xff] }
 0x27b   :  { %v906_v36 = vld [vmem:[#allocation5 + $0xa48] sm:$0xff] }
 0x27c   :  { %v2415_v57 = vadd.f32 %v2414_v52, %v1903_v46  ;;  %v1406_v46 = vsub.f32 %v382_v39, %v894_v40  ;;  %v1917_v52 = vmul.f32 %v1405_v41, %v1405_v41  ;;  %v395_v40 = vld [vmem:[#allocation2 + $0xa50] sm:$0xff] }
 0x27d   :  { %v907_v41 = vld [vmem:[#allocation5 + $0xa50] sm:$0xff] }
 0x27e   :  { %v2416_v62 = vadd.f32 %v2415_v57, %v1904_v51  ;;  %v1407_v51 = vsub.f32 %v383_v44, %v895_v45  ;;  %v1918_v57 = vmul.f32 %v1406_v46, %v1406_v46  ;;  %v396_v45 = vld [vmem:[#allocation2 + $0xa58] sm:$0xff] }
 0x27f   :  { %v908_v46 = vld [vmem:[#allocation5 + $0xa58] sm:$0xff] }
 0x280   :  { %v2417_v3 = vadd.f32 %v2416_v62, %v1905_v56  ;;  %v1408_v56 = vsub.f32 %v384_v49, %v896_v50  ;;  %v1919_v62 = vmul.f32 %v1407_v51, %v1407_v51  ;;  %v397_v50 = vld [vmem:[#allocation2 + $0xa60] sm:$0xff] }
 0x281   :  { %v909_v51 = vld [vmem:[#allocation5 + $0xa60] sm:$0xff] }
 0x282   :  { %v2418_v8 = vadd.f32 %v2417_v3, %v1906_v61  ;;  %v1409_v61 = vsub.f32 %v385_v54, %v897_v55  ;;  %v1920_v3 = vmul.f32 %v1408_v56, %v1408_v56  ;;  %v398_v55 = vld [vmem:[#allocation2 + $0xa68] sm:$0xff] }
 0x283   :  { %v910_v56 = vld [vmem:[#allocation5 + $0xa68] sm:$0xff] }
 0x284   :  { %v2419_v13 = vadd.f32 %v2418_v8, %v1907_v2  ;;  %v1410_v2 = vsub.f32 %v386_v59, %v898_v60  ;;  %v1921_v8 = vmul.f32 %v1409_v61, %v1409_v61  ;;  %v399_v60 = vld [vmem:[#allocation2 + $0xa70] sm:$0xff] }
 0x285   :  { %v911_v61 = vld [vmem:[#allocation5 + $0xa70] sm:$0xff] }
 0x286   :  { %v2420_v18 = vadd.f32 %v2419_v13, %v1908_v7  ;;  %v1411_v7 = vsub.f32 %v387_v0, %v899_v1  ;;  %v1922_v13 = vmul.f32 %v1410_v2, %v1410_v2  ;;  %v400_v1 = vld [vmem:[#allocation2 + $0xa78] sm:$0xff] }
 0x287   :  { %v912_v2 = vld [vmem:[#allocation5 + $0xa78] sm:$0xff] }
 0x288   :  { %v2421_v23 = vadd.f32 %v2420_v18, %v1909_v12  ;;  %v1412_v12 = vsub.f32 %v388_v5, %v900_v6  ;;  %v1923_v18 = vmul.f32 %v1411_v7, %v1411_v7  ;;  %v401_v6 = vld [vmem:[#allocation2 + $0xa80] sm:$0xff] }
 0x289   :  { %v913_v7 = vld [vmem:[#allocation5 + $0xa80] sm:$0xff] }
 0x28a   :  { %v2422_v28 = vadd.f32 %v2421_v23, %v1910_v17  ;;  %v1413_v17 = vsub.f32 %v389_v10, %v901_v11  ;;  %v1924_v23 = vmul.f32 %v1412_v12, %v1412_v12  ;;  %v402_v11 = vld [vmem:[#allocation2 + $0xa88] sm:$0xff] }
 0x28b   :  { %v914_v12 = vld [vmem:[#allocation5 + $0xa88] sm:$0xff] }
 0x28c   :  { %v2423_v33 = vadd.f32 %v2422_v28, %v1911_v22  ;;  %v1414_v22 = vsub.f32 %v390_v15, %v902_v16  ;;  %v1925_v28 = vmul.f32 %v1413_v17, %v1413_v17  ;;  %v403_v16 = vld [vmem:[#allocation2 + $0xa90] sm:$0xff] }
 0x28d   :  { %v915_v17 = vld [vmem:[#allocation5 + $0xa90] sm:$0xff] }
 0x28e   :  { %v2424_v38 = vadd.f32 %v2423_v33, %v1912_v27  ;;  %v1415_v27 = vsub.f32 %v391_v20, %v903_v21  ;;  %v1926_v33 = vmul.f32 %v1414_v22, %v1414_v22  ;;  %v404_v21 = vld [vmem:[#allocation2 + $0xa98] sm:$0xff] }
 0x28f   :  { %v916_v22 = vld [vmem:[#allocation5 + $0xa98] sm:$0xff] }
 0x290   :  { %v2425_v43 = vadd.f32 %v2424_v38, %v1913_v32  ;;  %v1416_v32 = vsub.f32 %v392_v25, %v904_v26  ;;  %v1927_v38 = vmul.f32 %v1415_v27, %v1415_v27  ;;  %v405_v26 = vld [vmem:[#allocation2 + $0xaa0] sm:$0xff] }
 0x291   :  { %v917_v27 = vld [vmem:[#allocation5 + $0xaa0] sm:$0xff] }
 0x292   :  { %v2426_v48 = vadd.f32 %v2425_v43, %v1914_v37  ;;  %v1417_v37 = vsub.f32 %v393_v30, %v905_v31  ;;  %v1928_v43 = vmul.f32 %v1416_v32, %v1416_v32  ;;  %v406_v31 = vld [vmem:[#allocation2 + $0xaa8] sm:$0xff] }
 0x293   :  { %v918_v32 = vld [vmem:[#allocation5 + $0xaa8] sm:$0xff] }
 0x294   :  { %v2427_v53 = vadd.f32 %v2426_v48, %v1915_v42  ;;  %v1418_v42 = vsub.f32 %v394_v35, %v906_v36  ;;  %v1929_v48 = vmul.f32 %v1417_v37, %v1417_v37  ;;  %v407_v36 = vld [vmem:[#allocation2 + $0xab0] sm:$0xff] }
 0x295   :  { %v919_v37 = vld [vmem:[#allocation5 + $0xab0] sm:$0xff] }
 0x296   :  { %v2428_v58 = vadd.f32 %v2427_v53, %v1916_v47  ;;  %v1419_v47 = vsub.f32 %v395_v40, %v907_v41  ;;  %v1930_v53 = vmul.f32 %v1418_v42, %v1418_v42  ;;  %v408_v41 = vld [vmem:[#allocation2 + $0xab8] sm:$0xff] }
 0x297   :  { %v920_v42 = vld [vmem:[#allocation5 + $0xab8] sm:$0xff] }
 0x298   :  { %v2429_v63 = vadd.f32 %v2428_v58, %v1917_v52  ;;  %v1420_v52 = vsub.f32 %v396_v45, %v908_v46  ;;  %v1931_v58 = vmul.f32 %v1419_v47, %v1419_v47  ;;  %v409_v46 = vld [vmem:[#allocation2 + $0xac0] sm:$0xff] }
 0x299   :  { %v921_v47 = vld [vmem:[#allocation5 + $0xac0] sm:$0xff] }
 0x29a   :  { %v2430_v4 = vadd.f32 %v2429_v63, %v1918_v57  ;;  %v1421_v57 = vsub.f32 %v397_v50, %v909_v51  ;;  %v1932_v63 = vmul.f32 %v1420_v52, %v1420_v52  ;;  %v410_v51 = vld [vmem:[#allocation2 + $0xac8] sm:$0xff] }
 0x29b   :  { %v922_v52 = vld [vmem:[#allocation5 + $0xac8] sm:$0xff] }
 0x29c   :  { %v2431_v9 = vadd.f32 %v2430_v4, %v1919_v62  ;;  %v1422_v62 = vsub.f32 %v398_v55, %v910_v56  ;;  %v1933_v4 = vmul.f32 %v1421_v57, %v1421_v57  ;;  %v411_v56 = vld [vmem:[#allocation2 + $0xad0] sm:$0xff] }
 0x29d   :  { %v923_v57 = vld [vmem:[#allocation5 + $0xad0] sm:$0xff] }
 0x29e   :  { %v2432_v14 = vadd.f32 %v2431_v9, %v1920_v3  ;;  %v1423_v3 = vsub.f32 %v399_v60, %v911_v61  ;;  %v1934_v9 = vmul.f32 %v1422_v62, %v1422_v62  ;;  %v412_v61 = vld [vmem:[#allocation2 + $0xad8] sm:$0xff] }
 0x29f   :  { %v924_v62 = vld [vmem:[#allocation5 + $0xad8] sm:$0xff] }
 0x2a0   :  { %v2433_v19 = vadd.f32 %v2432_v14, %v1921_v8  ;;  %v1424_v8 = vsub.f32 %v400_v1, %v912_v2  ;;  %v1935_v14 = vmul.f32 %v1423_v3, %v1423_v3  ;;  %v413_v2 = vld [vmem:[#allocation2 + $0xae0] sm:$0xff] }
 0x2a1   :  { %v925_v3 = vld [vmem:[#allocation5 + $0xae0] sm:$0xff] }
 0x2a2   :  { %v2434_v24 = vadd.f32 %v2433_v19, %v1922_v13  ;;  %v1425_v13 = vsub.f32 %v401_v6, %v913_v7  ;;  %v1936_v19 = vmul.f32 %v1424_v8, %v1424_v8  ;;  %v414_v7 = vld [vmem:[#allocation2 + $0xae8] sm:$0xff] }
 0x2a3   :  { %v926_v8 = vld [vmem:[#allocation5 + $0xae8] sm:$0xff] }
 0x2a4   :  { %v2435_v29 = vadd.f32 %v2434_v24, %v1923_v18  ;;  %v1426_v18 = vsub.f32 %v402_v11, %v914_v12  ;;  %v1937_v24 = vmul.f32 %v1425_v13, %v1425_v13  ;;  %v415_v12 = vld [vmem:[#allocation2 + $0xaf0] sm:$0xff] }
 0x2a5   :  { %v927_v13 = vld [vmem:[#allocation5 + $0xaf0] sm:$0xff] }
 0x2a6   :  { %v2436_v34 = vadd.f32 %v2435_v29, %v1924_v23  ;;  %v1427_v23 = vsub.f32 %v403_v16, %v915_v17  ;;  %v1938_v29 = vmul.f32 %v1426_v18, %v1426_v18  ;;  %v416_v17 = vld [vmem:[#allocation2 + $0xaf8] sm:$0xff] }
 0x2a7   :  { %v928_v18 = vld [vmem:[#allocation5 + $0xaf8] sm:$0xff] }
 0x2a8   :  { %v2437_v39 = vadd.f32 %v2436_v34, %v1925_v28  ;;  %v1428_v28 = vsub.f32 %v404_v21, %v916_v22  ;;  %v1939_v34 = vmul.f32 %v1427_v23, %v1427_v23  ;;  %v417_v22 = vld [vmem:[#allocation2 + $0xb00] sm:$0xff] }
 0x2a9   :  { %v929_v23 = vld [vmem:[#allocation5 + $0xb00] sm:$0xff] }
 0x2aa   :  { %v2438_v44 = vadd.f32 %v2437_v39, %v1926_v33  ;;  %v1429_v33 = vsub.f32 %v405_v26, %v917_v27  ;;  %v1940_v39 = vmul.f32 %v1428_v28, %v1428_v28  ;;  %v418_v27 = vld [vmem:[#allocation2 + $0xb08] sm:$0xff] }
 0x2ab   :  { %v930_v28 = vld [vmem:[#allocation5 + $0xb08] sm:$0xff] }
 0x2ac   :  { %v2439_v49 = vadd.f32 %v2438_v44, %v1927_v38  ;;  %v1430_v38 = vsub.f32 %v406_v31, %v918_v32  ;;  %v1941_v44 = vmul.f32 %v1429_v33, %v1429_v33  ;;  %v419_v32 = vld [vmem:[#allocation2 + $0xb10] sm:$0xff] }
 0x2ad   :  { %v931_v33 = vld [vmem:[#allocation5 + $0xb10] sm:$0xff] }
 0x2ae   :  { %v2440_v54 = vadd.f32 %v2439_v49, %v1928_v43  ;;  %v1431_v43 = vsub.f32 %v407_v36, %v919_v37  ;;  %v1942_v49 = vmul.f32 %v1430_v38, %v1430_v38  ;;  %v420_v37 = vld [vmem:[#allocation2 + $0xb18] sm:$0xff] }
 0x2af   :  { %v932_v38 = vld [vmem:[#allocation5 + $0xb18] sm:$0xff] }
 0x2b0   :  { %v2441_v59 = vadd.f32 %v2440_v54, %v1929_v48  ;;  %v1432_v48 = vsub.f32 %v408_v41, %v920_v42  ;;  %v1943_v54 = vmul.f32 %v1431_v43, %v1431_v43  ;;  %v421_v42 = vld [vmem:[#allocation2 + $0xb20] sm:$0xff] }
 0x2b1   :  { %v933_v43 = vld [vmem:[#allocation5 + $0xb20] sm:$0xff] }
 0x2b2   :  { %v2442_v0 = vadd.f32 %v2441_v59, %v1930_v53  ;;  %v1433_v53 = vsub.f32 %v409_v46, %v921_v47  ;;  %v1944_v59 = vmul.f32 %v1432_v48, %v1432_v48  ;;  %v422_v47 = vld [vmem:[#allocation2 + $0xb28] sm:$0xff] }
 0x2b3   :  { %v934_v48 = vld [vmem:[#allocation5 + $0xb28] sm:$0xff] }
 0x2b4   :  { %v2443_v5 = vadd.f32 %v2442_v0, %v1931_v58  ;;  %v1434_v58 = vsub.f32 %v410_v51, %v922_v52  ;;  %v1945_v0 = vmul.f32 %v1433_v53, %v1433_v53  ;;  %v423_v52 = vld [vmem:[#allocation2 + $0xb30] sm:$0xff] }
 0x2b5   :  { %v935_v53 = vld [vmem:[#allocation5 + $0xb30] sm:$0xff] }
 0x2b6   :  { %v2444_v10 = vadd.f32 %v2443_v5, %v1932_v63  ;;  %v1435_v63 = vsub.f32 %v411_v56, %v923_v57  ;;  %v1946_v5 = vmul.f32 %v1434_v58, %v1434_v58  ;;  %v424_v57 = vld [vmem:[#allocation2 + $0xb38] sm:$0xff] }
 0x2b7   :  { %v936_v58 = vld [vmem:[#allocation5 + $0xb38] sm:$0xff] }
 0x2b8   :  { %v2445_v15 = vadd.f32 %v2444_v10, %v1933_v4  ;;  %v1436_v4 = vsub.f32 %v412_v61, %v924_v62  ;;  %v1947_v10 = vmul.f32 %v1435_v63, %v1435_v63  ;;  %v425_v62 = vld [vmem:[#allocation2 + $0xb40] sm:$0xff] }
 0x2b9   :  { %v937_v63 = vld [vmem:[#allocation5 + $0xb40] sm:$0xff] }
 0x2ba   :  { %v2446_v20 = vadd.f32 %v2445_v15, %v1934_v9  ;;  %v1437_v9 = vsub.f32 %v413_v2, %v925_v3  ;;  %v1948_v15 = vmul.f32 %v1436_v4, %v1436_v4  ;;  %v426_v3 = vld [vmem:[#allocation2 + $0xb48] sm:$0xff] }
 0x2bb   :  { %v938_v4 = vld [vmem:[#allocation5 + $0xb48] sm:$0xff] }
 0x2bc   :  { %v2447_v25 = vadd.f32 %v2446_v20, %v1935_v14  ;;  %v1438_v14 = vsub.f32 %v414_v7, %v926_v8  ;;  %v1949_v20 = vmul.f32 %v1437_v9, %v1437_v9  ;;  %v427_v8 = vld [vmem:[#allocation2 + $0xb50] sm:$0xff] }
 0x2bd   :  { %v939_v9 = vld [vmem:[#allocation5 + $0xb50] sm:$0xff] }
 0x2be   :  { %v2448_v30 = vadd.f32 %v2447_v25, %v1936_v19  ;;  %v1439_v19 = vsub.f32 %v415_v12, %v927_v13  ;;  %v1950_v25 = vmul.f32 %v1438_v14, %v1438_v14  ;;  %v428_v13 = vld [vmem:[#allocation2 + $0xb58] sm:$0xff] }
 0x2bf   :  { %v940_v14 = vld [vmem:[#allocation5 + $0xb58] sm:$0xff] }
 0x2c0   :  { %v2449_v35 = vadd.f32 %v2448_v30, %v1937_v24  ;;  %v1440_v24 = vsub.f32 %v416_v17, %v928_v18  ;;  %v1951_v30 = vmul.f32 %v1439_v19, %v1439_v19  ;;  %v429_v18 = vld [vmem:[#allocation2 + $0xb60] sm:$0xff] }
 0x2c1   :  { %v941_v19 = vld [vmem:[#allocation5 + $0xb60] sm:$0xff] }
 0x2c2   :  { %v2450_v40 = vadd.f32 %v2449_v35, %v1938_v29  ;;  %v1441_v29 = vsub.f32 %v417_v22, %v929_v23  ;;  %v1952_v35 = vmul.f32 %v1440_v24, %v1440_v24  ;;  %v430_v23 = vld [vmem:[#allocation2 + $0xb68] sm:$0xff] }
 0x2c3   :  { %v942_v24 = vld [vmem:[#allocation5 + $0xb68] sm:$0xff] }
 0x2c4   :  { %v2451_v45 = vadd.f32 %v2450_v40, %v1939_v34  ;;  %v1442_v34 = vsub.f32 %v418_v27, %v930_v28  ;;  %v1953_v40 = vmul.f32 %v1441_v29, %v1441_v29  ;;  %v431_v28 = vld [vmem:[#allocation2 + $0xb70] sm:$0xff] }
 0x2c5   :  { %v943_v29 = vld [vmem:[#allocation5 + $0xb70] sm:$0xff] }
 0x2c6   :  { %v2452_v50 = vadd.f32 %v2451_v45, %v1940_v39  ;;  %v1443_v39 = vsub.f32 %v419_v32, %v931_v33  ;;  %v1954_v45 = vmul.f32 %v1442_v34, %v1442_v34  ;;  %v432_v33 = vld [vmem:[#allocation2 + $0xb78] sm:$0xff] }
 0x2c7   :  { %v944_v34 = vld [vmem:[#allocation5 + $0xb78] sm:$0xff] }
 0x2c8   :  { %v2453_v55 = vadd.f32 %v2452_v50, %v1941_v44  ;;  %v1444_v44 = vsub.f32 %v420_v37, %v932_v38  ;;  %v1955_v50 = vmul.f32 %v1443_v39, %v1443_v39  ;;  %v433_v38 = vld [vmem:[#allocation2 + $0xb80] sm:$0xff] }
 0x2c9   :  { %v945_v39 = vld [vmem:[#allocation5 + $0xb80] sm:$0xff] }
 0x2ca   :  { %v2454_v60 = vadd.f32 %v2453_v55, %v1942_v49  ;;  %v1445_v49 = vsub.f32 %v421_v42, %v933_v43  ;;  %v1956_v55 = vmul.f32 %v1444_v44, %v1444_v44  ;;  %v434_v43 = vld [vmem:[#allocation2 + $0xb88] sm:$0xff] }
 0x2cb   :  { %v946_v44 = vld [vmem:[#allocation5 + $0xb88] sm:$0xff] }
 0x2cc   :  { %v2455_v1 = vadd.f32 %v2454_v60, %v1943_v54  ;;  %v1446_v54 = vsub.f32 %v422_v47, %v934_v48  ;;  %v1957_v60 = vmul.f32 %v1445_v49, %v1445_v49  ;;  %v435_v48 = vld [vmem:[#allocation2 + $0xb90] sm:$0xff] }
 0x2cd   :  { %v947_v49 = vld [vmem:[#allocation5 + $0xb90] sm:$0xff] }
 0x2ce   :  { %v2456_v6 = vadd.f32 %v2455_v1, %v1944_v59  ;;  %v1447_v59 = vsub.f32 %v423_v52, %v935_v53  ;;  %v1958_v1 = vmul.f32 %v1446_v54, %v1446_v54  ;;  %v436_v53 = vld [vmem:[#allocation2 + $0xb98] sm:$0xff] }
 0x2cf   :  { %v948_v54 = vld [vmem:[#allocation5 + $0xb98] sm:$0xff] }
 0x2d0   :  { %v2457_v11 = vadd.f32 %v2456_v6, %v1945_v0  ;;  %v1448_v0 = vsub.f32 %v424_v57, %v936_v58  ;;  %v1959_v6 = vmul.f32 %v1447_v59, %v1447_v59  ;;  %v437_v58 = vld [vmem:[#allocation2 + $0xba0] sm:$0xff] }
 0x2d1   :  { %v949_v59 = vld [vmem:[#allocation5 + $0xba0] sm:$0xff] }
 0x2d2   :  { %v2458_v16 = vadd.f32 %v2457_v11, %v1946_v5  ;;  %v1449_v5 = vsub.f32 %v425_v62, %v937_v63  ;;  %v1960_v11 = vmul.f32 %v1448_v0, %v1448_v0  ;;  %v438_v63 = vld [vmem:[#allocation2 + $0xba8] sm:$0xff] }
 0x2d3   :  { %v950_v0 = vld [vmem:[#allocation5 + $0xba8] sm:$0xff] }
 0x2d4   :  { %v2459_v21 = vadd.f32 %v2458_v16, %v1947_v10  ;;  %v1450_v10 = vsub.f32 %v426_v3, %v938_v4  ;;  %v1961_v16 = vmul.f32 %v1449_v5, %v1449_v5  ;;  %v439_v4 = vld [vmem:[#allocation2 + $0xbb0] sm:$0xff] }
 0x2d5   :  { %v951_v5 = vld [vmem:[#allocation5 + $0xbb0] sm:$0xff] }
 0x2d6   :  { %v2460_v26 = vadd.f32 %v2459_v21, %v1948_v15  ;;  %v1451_v15 = vsub.f32 %v427_v8, %v939_v9  ;;  %v1962_v21 = vmul.f32 %v1450_v10, %v1450_v10  ;;  %v440_v9 = vld [vmem:[#allocation2 + $0xbb8] sm:$0xff] }
 0x2d7   :  { %v952_v10 = vld [vmem:[#allocation5 + $0xbb8] sm:$0xff] }
 0x2d8   :  { %v2461_v31 = vadd.f32 %v2460_v26, %v1949_v20  ;;  %v1452_v20 = vsub.f32 %v428_v13, %v940_v14  ;;  %v1963_v26 = vmul.f32 %v1451_v15, %v1451_v15  ;;  %v441_v14 = vld [vmem:[#allocation2 + $0xbc0] sm:$0xff] }
 0x2d9   :  { %v953_v15 = vld [vmem:[#allocation5 + $0xbc0] sm:$0xff] }
 0x2da   :  { %v2462_v36 = vadd.f32 %v2461_v31, %v1950_v25  ;;  %v1453_v25 = vsub.f32 %v429_v18, %v941_v19  ;;  %v1964_v31 = vmul.f32 %v1452_v20, %v1452_v20  ;;  %v442_v19 = vld [vmem:[#allocation2 + $0xbc8] sm:$0xff] }
 0x2db   :  { %v954_v20 = vld [vmem:[#allocation5 + $0xbc8] sm:$0xff] }
 0x2dc   :  { %v2463_v41 = vadd.f32 %v2462_v36, %v1951_v30  ;;  %v1454_v30 = vsub.f32 %v430_v23, %v942_v24  ;;  %v1965_v36 = vmul.f32 %v1453_v25, %v1453_v25  ;;  %v443_v24 = vld [vmem:[#allocation2 + $0xbd0] sm:$0xff] }
 0x2dd   :  { %v955_v25 = vld [vmem:[#allocation5 + $0xbd0] sm:$0xff] }
 0x2de   :  { %v2464_v46 = vadd.f32 %v2463_v41, %v1952_v35  ;;  %v1455_v35 = vsub.f32 %v431_v28, %v943_v29  ;;  %v1966_v41 = vmul.f32 %v1454_v30, %v1454_v30  ;;  %v444_v29 = vld [vmem:[#allocation2 + $0xbd8] sm:$0xff] }
 0x2df   :  { %v956_v30 = vld [vmem:[#allocation5 + $0xbd8] sm:$0xff] }
 0x2e0   :  { %v2465_v51 = vadd.f32 %v2464_v46, %v1953_v40  ;;  %v1456_v40 = vsub.f32 %v432_v33, %v944_v34  ;;  %v1967_v46 = vmul.f32 %v1455_v35, %v1455_v35  ;;  %v445_v34 = vld [vmem:[#allocation2 + $0xbe0] sm:$0xff] }
 0x2e1   :  { %v957_v35 = vld [vmem:[#allocation5 + $0xbe0] sm:$0xff] }
 0x2e2   :  { %v2466_v56 = vadd.f32 %v2465_v51, %v1954_v45  ;;  %v1457_v45 = vsub.f32 %v433_v38, %v945_v39  ;;  %v1968_v51 = vmul.f32 %v1456_v40, %v1456_v40  ;;  %v446_v39 = vld [vmem:[#allocation2 + $0xbe8] sm:$0xff] }
 0x2e3   :  { %v958_v40 = vld [vmem:[#allocation5 + $0xbe8] sm:$0xff] }
 0x2e4   :  { %v2467_v61 = vadd.f32 %v2466_v56, %v1955_v50  ;;  %v1458_v50 = vsub.f32 %v434_v43, %v946_v44  ;;  %v1969_v56 = vmul.f32 %v1457_v45, %v1457_v45  ;;  %v447_v44 = vld [vmem:[#allocation2 + $0xbf0] sm:$0xff] }
 0x2e5   :  { %v959_v45 = vld [vmem:[#allocation5 + $0xbf0] sm:$0xff] }
 0x2e6   :  { %v2468_v2 = vadd.f32 %v2467_v61, %v1956_v55  ;;  %v1459_v55 = vsub.f32 %v435_v48, %v947_v49  ;;  %v1970_v61 = vmul.f32 %v1458_v50, %v1458_v50  ;;  %v448_v49 = vld [vmem:[#allocation2 + $0xbf8] sm:$0xff] }
 0x2e7   :  { %v960_v50 = vld [vmem:[#allocation5 + $0xbf8] sm:$0xff] }
 0x2e8   :  { %v2469_v7 = vadd.f32 %v2468_v2, %v1957_v60  ;;  %v1460_v60 = vsub.f32 %v436_v53, %v948_v54  ;;  %v1971_v2 = vmul.f32 %v1459_v55, %v1459_v55  ;;  %v449_v54 = vld [vmem:[#allocation2 + $0xc00] sm:$0xff] }
 0x2e9   :  { %v961_v55 = vld [vmem:[#allocation5 + $0xc00] sm:$0xff] }
 0x2ea   :  { %v2470_v12 = vadd.f32 %v2469_v7, %v1958_v1  ;;  %v1461_v1 = vsub.f32 %v437_v58, %v949_v59  ;;  %v1972_v7 = vmul.f32 %v1460_v60, %v1460_v60  ;;  %v450_v59 = vld [vmem:[#allocation2 + $0xc08] sm:$0xff] }
 0x2eb   :  { %v962_v60 = vld [vmem:[#allocation5 + $0xc08] sm:$0xff] }
 0x2ec   :  { %v2471_v17 = vadd.f32 %v2470_v12, %v1959_v6  ;;  %v1462_v6 = vsub.f32 %v438_v63, %v950_v0  ;;  %v1973_v12 = vmul.f32 %v1461_v1, %v1461_v1  ;;  %v451_v0 = vld [vmem:[#allocation2 + $0xc10] sm:$0xff] }
 0x2ed   :  { %v963_v1 = vld [vmem:[#allocation5 + $0xc10] sm:$0xff] }
 0x2ee   :  { %v2472_v22 = vadd.f32 %v2471_v17, %v1960_v11  ;;  %v1463_v11 = vsub.f32 %v439_v4, %v951_v5  ;;  %v1974_v17 = vmul.f32 %v1462_v6, %v1462_v6  ;;  %v452_v5 = vld [vmem:[#allocation2 + $0xc18] sm:$0xff] }
 0x2ef   :  { %v964_v6 = vld [vmem:[#allocation5 + $0xc18] sm:$0xff] }
 0x2f0   :  { %v2473_v27 = vadd.f32 %v2472_v22, %v1961_v16  ;;  %v1464_v16 = vsub.f32 %v440_v9, %v952_v10  ;;  %v1975_v22 = vmul.f32 %v1463_v11, %v1463_v11  ;;  %v453_v10 = vld [vmem:[#allocation2 + $0xc20] sm:$0xff] }
 0x2f1   :  { %v965_v11 = vld [vmem:[#allocation5 + $0xc20] sm:$0xff] }
 0x2f2   :  { %v2474_v32 = vadd.f32 %v2473_v27, %v1962_v21  ;;  %v1465_v21 = vsub.f32 %v441_v14, %v953_v15  ;;  %v1976_v27 = vmul.f32 %v1464_v16, %v1464_v16  ;;  %v454_v15 = vld [vmem:[#allocation2 + $0xc28] sm:$0xff] }
 0x2f3   :  { %v966_v16 = vld [vmem:[#allocation5 + $0xc28] sm:$0xff] }
 0x2f4   :  { %v2475_v37 = vadd.f32 %v2474_v32, %v1963_v26  ;;  %v1466_v26 = vsub.f32 %v442_v19, %v954_v20  ;;  %v1977_v32 = vmul.f32 %v1465_v21, %v1465_v21  ;;  %v455_v20 = vld [vmem:[#allocation2 + $0xc30] sm:$0xff] }
 0x2f5   :  { %v967_v21 = vld [vmem:[#allocation5 + $0xc30] sm:$0xff] }
 0x2f6   :  { %v2476_v42 = vadd.f32 %v2475_v37, %v1964_v31  ;;  %v1467_v31 = vsub.f32 %v443_v24, %v955_v25  ;;  %v1978_v37 = vmul.f32 %v1466_v26, %v1466_v26  ;;  %v456_v25 = vld [vmem:[#allocation2 + $0xc38] sm:$0xff] }
 0x2f7   :  { %v968_v26 = vld [vmem:[#allocation5 + $0xc38] sm:$0xff] }
 0x2f8   :  { %v2477_v47 = vadd.f32 %v2476_v42, %v1965_v36  ;;  %v1468_v36 = vsub.f32 %v444_v29, %v956_v30  ;;  %v1979_v42 = vmul.f32 %v1467_v31, %v1467_v31  ;;  %v457_v30 = vld [vmem:[#allocation2 + $0xc40] sm:$0xff] }
 0x2f9   :  { %v969_v31 = vld [vmem:[#allocation5 + $0xc40] sm:$0xff] }
 0x2fa   :  { %v2478_v52 = vadd.f32 %v2477_v47, %v1966_v41  ;;  %v1469_v41 = vsub.f32 %v445_v34, %v957_v35  ;;  %v1980_v47 = vmul.f32 %v1468_v36, %v1468_v36  ;;  %v458_v35 = vld [vmem:[#allocation2 + $0xc48] sm:$0xff] }
 0x2fb   :  { %v970_v36 = vld [vmem:[#allocation5 + $0xc48] sm:$0xff] }
 0x2fc   :  { %v2479_v57 = vadd.f32 %v2478_v52, %v1967_v46  ;;  %v1470_v46 = vsub.f32 %v446_v39, %v958_v40  ;;  %v1981_v52 = vmul.f32 %v1469_v41, %v1469_v41  ;;  %v459_v40 = vld [vmem:[#allocation2 + $0xc50] sm:$0xff] }
 0x2fd   :  { %v971_v41 = vld [vmem:[#allocation5 + $0xc50] sm:$0xff] }
 0x2fe   :  { %v2480_v62 = vadd.f32 %v2479_v57, %v1968_v51  ;;  %v1471_v51 = vsub.f32 %v447_v44, %v959_v45  ;;  %v1982_v57 = vmul.f32 %v1470_v46, %v1470_v46  ;;  %v460_v45 = vld [vmem:[#allocation2 + $0xc58] sm:$0xff] }
 0x2ff   :  { %v972_v46 = vld [vmem:[#allocation5 + $0xc58] sm:$0xff] }
 0x300   :  { %v2481_v3 = vadd.f32 %v2480_v62, %v1969_v56  ;;  %v1472_v56 = vsub.f32 %v448_v49, %v960_v50  ;;  %v1983_v62 = vmul.f32 %v1471_v51, %v1471_v51  ;;  %v461_v50 = vld [vmem:[#allocation2 + $0xc60] sm:$0xff] }
 0x301   :  { %v973_v51 = vld [vmem:[#allocation5 + $0xc60] sm:$0xff] }
 0x302   :  { %v2482_v8 = vadd.f32 %v2481_v3, %v1970_v61  ;;  %v1473_v61 = vsub.f32 %v449_v54, %v961_v55  ;;  %v1984_v3 = vmul.f32 %v1472_v56, %v1472_v56  ;;  %v462_v55 = vld [vmem:[#allocation2 + $0xc68] sm:$0xff] }
 0x303   :  { %v974_v56 = vld [vmem:[#allocation5 + $0xc68] sm:$0xff] }
 0x304   :  { %v2483_v13 = vadd.f32 %v2482_v8, %v1971_v2  ;;  %v1474_v2 = vsub.f32 %v450_v59, %v962_v60  ;;  %v1985_v8 = vmul.f32 %v1473_v61, %v1473_v61  ;;  %v463_v60 = vld [vmem:[#allocation2 + $0xc70] sm:$0xff] }
 0x305   :  { %v975_v61 = vld [vmem:[#allocation5 + $0xc70] sm:$0xff] }
 0x306   :  { %v2484_v18 = vadd.f32 %v2483_v13, %v1972_v7  ;;  %v1475_v7 = vsub.f32 %v451_v0, %v963_v1  ;;  %v1986_v13 = vmul.f32 %v1474_v2, %v1474_v2  ;;  %v464_v1 = vld [vmem:[#allocation2 + $0xc78] sm:$0xff] }
 0x307   :  { %v976_v2 = vld [vmem:[#allocation5 + $0xc78] sm:$0xff] }
 0x308   :  { %v2485_v23 = vadd.f32 %v2484_v18, %v1973_v12  ;;  %v1476_v12 = vsub.f32 %v452_v5, %v964_v6  ;;  %v1987_v18 = vmul.f32 %v1475_v7, %v1475_v7  ;;  %v465_v6 = vld [vmem:[#allocation2 + $0xc80] sm:$0xff] }
 0x309   :  { %v977_v7 = vld [vmem:[#allocation5 + $0xc80] sm:$0xff] }
 0x30a   :  { %v2486_v28 = vadd.f32 %v2485_v23, %v1974_v17  ;;  %v1477_v17 = vsub.f32 %v453_v10, %v965_v11  ;;  %v1988_v23 = vmul.f32 %v1476_v12, %v1476_v12  ;;  %v466_v11 = vld [vmem:[#allocation2 + $0xc88] sm:$0xff] }
 0x30b   :  { %v978_v12 = vld [vmem:[#allocation5 + $0xc88] sm:$0xff] }
 0x30c   :  { %v2487_v33 = vadd.f32 %v2486_v28, %v1975_v22  ;;  %v1478_v22 = vsub.f32 %v454_v15, %v966_v16  ;;  %v1989_v28 = vmul.f32 %v1477_v17, %v1477_v17  ;;  %v467_v16 = vld [vmem:[#allocation2 + $0xc90] sm:$0xff] }
 0x30d   :  { %v979_v17 = vld [vmem:[#allocation5 + $0xc90] sm:$0xff] }
 0x30e   :  { %v2488_v38 = vadd.f32 %v2487_v33, %v1976_v27  ;;  %v1479_v27 = vsub.f32 %v455_v20, %v967_v21  ;;  %v1990_v33 = vmul.f32 %v1478_v22, %v1478_v22  ;;  %v468_v21 = vld [vmem:[#allocation2 + $0xc98] sm:$0xff] }
 0x30f   :  { %v980_v22 = vld [vmem:[#allocation5 + $0xc98] sm:$0xff] }
 0x310   :  { %v2489_v43 = vadd.f32 %v2488_v38, %v1977_v32  ;;  %v1480_v32 = vsub.f32 %v456_v25, %v968_v26  ;;  %v1991_v38 = vmul.f32 %v1479_v27, %v1479_v27  ;;  %v469_v26 = vld [vmem:[#allocation2 + $0xca0] sm:$0xff] }
 0x311   :  { %v981_v27 = vld [vmem:[#allocation5 + $0xca0] sm:$0xff] }
 0x312   :  { %v2490_v48 = vadd.f32 %v2489_v43, %v1978_v37  ;;  %v1481_v37 = vsub.f32 %v457_v30, %v969_v31  ;;  %v1992_v43 = vmul.f32 %v1480_v32, %v1480_v32  ;;  %v470_v31 = vld [vmem:[#allocation2 + $0xca8] sm:$0xff] }
 0x313   :  { %v982_v32 = vld [vmem:[#allocation5 + $0xca8] sm:$0xff] }
 0x314   :  { %v2491_v53 = vadd.f32 %v2490_v48, %v1979_v42  ;;  %v1482_v42 = vsub.f32 %v458_v35, %v970_v36  ;;  %v1993_v48 = vmul.f32 %v1481_v37, %v1481_v37  ;;  %v471_v36 = vld [vmem:[#allocation2 + $0xcb0] sm:$0xff] }
 0x315   :  { %v983_v37 = vld [vmem:[#allocation5 + $0xcb0] sm:$0xff] }
 0x316   :  { %v2492_v58 = vadd.f32 %v2491_v53, %v1980_v47  ;;  %v1483_v47 = vsub.f32 %v459_v40, %v971_v41  ;;  %v1994_v53 = vmul.f32 %v1482_v42, %v1482_v42  ;;  %v472_v41 = vld [vmem:[#allocation2 + $0xcb8] sm:$0xff] }
 0x317   :  { %v984_v42 = vld [vmem:[#allocation5 + $0xcb8] sm:$0xff] }
 0x318   :  { %v2493_v63 = vadd.f32 %v2492_v58, %v1981_v52  ;;  %v1484_v52 = vsub.f32 %v460_v45, %v972_v46  ;;  %v1995_v58 = vmul.f32 %v1483_v47, %v1483_v47  ;;  %v473_v46 = vld [vmem:[#allocation2 + $0xcc0] sm:$0xff] }
 0x319   :  { %v985_v47 = vld [vmem:[#allocation5 + $0xcc0] sm:$0xff] }
 0x31a   :  { %v2494_v4 = vadd.f32 %v2493_v63, %v1982_v57  ;;  %v1485_v57 = vsub.f32 %v461_v50, %v973_v51  ;;  %v1996_v63 = vmul.f32 %v1484_v52, %v1484_v52  ;;  %v474_v51 = vld [vmem:[#allocation2 + $0xcc8] sm:$0xff] }
 0x31b   :  { %v986_v52 = vld [vmem:[#allocation5 + $0xcc8] sm:$0xff] }
 0x31c   :  { %v2495_v9 = vadd.f32 %v2494_v4, %v1983_v62  ;;  %v1486_v62 = vsub.f32 %v462_v55, %v974_v56  ;;  %v1997_v4 = vmul.f32 %v1485_v57, %v1485_v57  ;;  %v475_v56 = vld [vmem:[#allocation2 + $0xcd0] sm:$0xff] }
 0x31d   :  { %v987_v57 = vld [vmem:[#allocation5 + $0xcd0] sm:$0xff] }
 0x31e   :  { %v2496_v14 = vadd.f32 %v2495_v9, %v1984_v3  ;;  %v1487_v3 = vsub.f32 %v463_v60, %v975_v61  ;;  %v1998_v9 = vmul.f32 %v1486_v62, %v1486_v62  ;;  %v476_v61 = vld [vmem:[#allocation2 + $0xcd8] sm:$0xff] }
 0x31f   :  { %v988_v62 = vld [vmem:[#allocation5 + $0xcd8] sm:$0xff] }
 0x320   :  { %v2497_v19 = vadd.f32 %v2496_v14, %v1985_v8  ;;  %v1488_v8 = vsub.f32 %v464_v1, %v976_v2  ;;  %v1999_v14 = vmul.f32 %v1487_v3, %v1487_v3  ;;  %v477_v2 = vld [vmem:[#allocation2 + $0xce0] sm:$0xff] }
 0x321   :  { %v989_v3 = vld [vmem:[#allocation5 + $0xce0] sm:$0xff] }
 0x322   :  { %v2498_v24 = vadd.f32 %v2497_v19, %v1986_v13  ;;  %v1489_v13 = vsub.f32 %v465_v6, %v977_v7  ;;  %v2000_v19 = vmul.f32 %v1488_v8, %v1488_v8  ;;  %v478_v7 = vld [vmem:[#allocation2 + $0xce8] sm:$0xff] }
 0x323   :  { %v990_v8 = vld [vmem:[#allocation5 + $0xce8] sm:$0xff] }
 0x324   :  { %v2499_v29 = vadd.f32 %v2498_v24, %v1987_v18  ;;  %v1490_v18 = vsub.f32 %v466_v11, %v978_v12  ;;  %v2001_v24 = vmul.f32 %v1489_v13, %v1489_v13  ;;  %v479_v12 = vld [vmem:[#allocation2 + $0xcf0] sm:$0xff] }
 0x325   :  { %v991_v13 = vld [vmem:[#allocation5 + $0xcf0] sm:$0xff] }
 0x326   :  { %v2500_v34 = vadd.f32 %v2499_v29, %v1988_v23  ;;  %v1491_v23 = vsub.f32 %v467_v16, %v979_v17  ;;  %v2002_v29 = vmul.f32 %v1490_v18, %v1490_v18  ;;  %v480_v17 = vld [vmem:[#allocation2 + $0xcf8] sm:$0xff] }
 0x327   :  { %v992_v18 = vld [vmem:[#allocation5 + $0xcf8] sm:$0xff] }
 0x328   :  { %v2501_v39 = vadd.f32 %v2500_v34, %v1989_v28  ;;  %v1492_v28 = vsub.f32 %v468_v21, %v980_v22  ;;  %v2003_v34 = vmul.f32 %v1491_v23, %v1491_v23  ;;  %v481_v22 = vld [vmem:[#allocation2 + $0xd00] sm:$0xff] }
 0x329   :  { %v993_v23 = vld [vmem:[#allocation5 + $0xd00] sm:$0xff] }
 0x32a   :  { %v2502_v44 = vadd.f32 %v2501_v39, %v1990_v33  ;;  %v1493_v33 = vsub.f32 %v469_v26, %v981_v27  ;;  %v2004_v39 = vmul.f32 %v1492_v28, %v1492_v28  ;;  %v482_v27 = vld [vmem:[#allocation2 + $0xd08] sm:$0xff] }
 0x32b   :  { %v994_v28 = vld [vmem:[#allocation5 + $0xd08] sm:$0xff] }
 0x32c   :  { %v2503_v49 = vadd.f32 %v2502_v44, %v1991_v38  ;;  %v1494_v38 = vsub.f32 %v470_v31, %v982_v32  ;;  %v2005_v44 = vmul.f32 %v1493_v33, %v1493_v33  ;;  %v483_v32 = vld [vmem:[#allocation2 + $0xd10] sm:$0xff] }
 0x32d   :  { %v995_v33 = vld [vmem:[#allocation5 + $0xd10] sm:$0xff] }
 0x32e   :  { %v2504_v54 = vadd.f32 %v2503_v49, %v1992_v43  ;;  %v1495_v43 = vsub.f32 %v471_v36, %v983_v37  ;;  %v2006_v49 = vmul.f32 %v1494_v38, %v1494_v38  ;;  %v484_v37 = vld [vmem:[#allocation2 + $0xd18] sm:$0xff] }
 0x32f   :  { %v996_v38 = vld [vmem:[#allocation5 + $0xd18] sm:$0xff] }
 0x330   :  { %v2505_v59 = vadd.f32 %v2504_v54, %v1993_v48  ;;  %v1496_v48 = vsub.f32 %v472_v41, %v984_v42  ;;  %v2007_v54 = vmul.f32 %v1495_v43, %v1495_v43  ;;  %v485_v42 = vld [vmem:[#allocation2 + $0xd20] sm:$0xff] }
 0x331   :  { %v997_v43 = vld [vmem:[#allocation5 + $0xd20] sm:$0xff] }
 0x332   :  { %v2506_v0 = vadd.f32 %v2505_v59, %v1994_v53  ;;  %v1497_v53 = vsub.f32 %v473_v46, %v985_v47  ;;  %v2008_v59 = vmul.f32 %v1496_v48, %v1496_v48  ;;  %v486_v47 = vld [vmem:[#allocation2 + $0xd28] sm:$0xff] }
 0x333   :  { %v998_v48 = vld [vmem:[#allocation5 + $0xd28] sm:$0xff] }
 0x334   :  { %v2507_v5 = vadd.f32 %v2506_v0, %v1995_v58  ;;  %v1498_v58 = vsub.f32 %v474_v51, %v986_v52  ;;  %v2009_v0 = vmul.f32 %v1497_v53, %v1497_v53  ;;  %v487_v52 = vld [vmem:[#allocation2 + $0xd30] sm:$0xff] }
 0x335   :  { %v999_v53 = vld [vmem:[#allocation5 + $0xd30] sm:$0xff] }
 0x336   :  { %v2508_v10 = vadd.f32 %v2507_v5, %v1996_v63  ;;  %v1499_v63 = vsub.f32 %v475_v56, %v987_v57  ;;  %v2010_v5 = vmul.f32 %v1498_v58, %v1498_v58  ;;  %v488_v57 = vld [vmem:[#allocation2 + $0xd38] sm:$0xff] }
 0x337   :  { %v1000_v58 = vld [vmem:[#allocation5 + $0xd38] sm:$0xff] }
 0x338   :  { %v2509_v15 = vadd.f32 %v2508_v10, %v1997_v4  ;;  %v1500_v4 = vsub.f32 %v476_v61, %v988_v62  ;;  %v2011_v10 = vmul.f32 %v1499_v63, %v1499_v63  ;;  %v489_v62 = vld [vmem:[#allocation2 + $0xd40] sm:$0xff] }
 0x339   :  { %v1001_v63 = vld [vmem:[#allocation5 + $0xd40] sm:$0xff] }
 0x33a   :  { %v2510_v20 = vadd.f32 %v2509_v15, %v1998_v9  ;;  %v1501_v9 = vsub.f32 %v477_v2, %v989_v3  ;;  %v2012_v15 = vmul.f32 %v1500_v4, %v1500_v4  ;;  %v490_v3 = vld [vmem:[#allocation2 + $0xd48] sm:$0xff] }
 0x33b   :  { %v1002_v4 = vld [vmem:[#allocation5 + $0xd48] sm:$0xff] }
 0x33c   :  { %v2511_v25 = vadd.f32 %v2510_v20, %v1999_v14  ;;  %v1502_v14 = vsub.f32 %v478_v7, %v990_v8  ;;  %v2013_v20 = vmul.f32 %v1501_v9, %v1501_v9  ;;  %v491_v8 = vld [vmem:[#allocation2 + $0xd50] sm:$0xff] }
 0x33d   :  { %v1003_v9 = vld [vmem:[#allocation5 + $0xd50] sm:$0xff] }
 0x33e   :  { %v2512_v30 = vadd.f32 %v2511_v25, %v2000_v19  ;;  %v1503_v19 = vsub.f32 %v479_v12, %v991_v13  ;;  %v2014_v25 = vmul.f32 %v1502_v14, %v1502_v14  ;;  %v492_v13 = vld [vmem:[#allocation2 + $0xd58] sm:$0xff] }
 0x33f   :  { %v1004_v14 = vld [vmem:[#allocation5 + $0xd58] sm:$0xff] }
 0x340   :  { %v2513_v35 = vadd.f32 %v2512_v30, %v2001_v24  ;;  %v1504_v24 = vsub.f32 %v480_v17, %v992_v18  ;;  %v2015_v30 = vmul.f32 %v1503_v19, %v1503_v19  ;;  %v493_v18 = vld [vmem:[#allocation2 + $0xd60] sm:$0xff] }
 0x341   :  { %v1005_v19 = vld [vmem:[#allocation5 + $0xd60] sm:$0xff] }
 0x342   :  { %v2514_v40 = vadd.f32 %v2513_v35, %v2002_v29  ;;  %v1505_v29 = vsub.f32 %v481_v22, %v993_v23  ;;  %v2016_v35 = vmul.f32 %v1504_v24, %v1504_v24  ;;  %v494_v23 = vld [vmem:[#allocation2 + $0xd68] sm:$0xff] }
 0x343   :  { %v1006_v24 = vld [vmem:[#allocation5 + $0xd68] sm:$0xff] }
 0x344   :  { %v2515_v45 = vadd.f32 %v2514_v40, %v2003_v34  ;;  %v1506_v34 = vsub.f32 %v482_v27, %v994_v28  ;;  %v2017_v40 = vmul.f32 %v1505_v29, %v1505_v29  ;;  %v495_v28 = vld [vmem:[#allocation2 + $0xd70] sm:$0xff] }
 0x345   :  { %v1007_v29 = vld [vmem:[#allocation5 + $0xd70] sm:$0xff] }
 0x346   :  { %v2516_v50 = vadd.f32 %v2515_v45, %v2004_v39  ;;  %v1507_v39 = vsub.f32 %v483_v32, %v995_v33  ;;  %v2018_v45 = vmul.f32 %v1506_v34, %v1506_v34  ;;  %v496_v33 = vld [vmem:[#allocation2 + $0xd78] sm:$0xff] }
 0x347   :  { %v1008_v34 = vld [vmem:[#allocation5 + $0xd78] sm:$0xff] }
 0x348   :  { %v2517_v55 = vadd.f32 %v2516_v50, %v2005_v44  ;;  %v1508_v44 = vsub.f32 %v484_v37, %v996_v38  ;;  %v2019_v50 = vmul.f32 %v1507_v39, %v1507_v39  ;;  %v497_v38 = vld [vmem:[#allocation2 + $0xd80] sm:$0xff] }
 0x349   :  { %v1009_v39 = vld [vmem:[#allocation5 + $0xd80] sm:$0xff] }
 0x34a   :  { %v2518_v60 = vadd.f32 %v2517_v55, %v2006_v49  ;;  %v1509_v49 = vsub.f32 %v485_v42, %v997_v43  ;;  %v2020_v55 = vmul.f32 %v1508_v44, %v1508_v44  ;;  %v498_v43 = vld [vmem:[#allocation2 + $0xd88] sm:$0xff] }
 0x34b   :  { %v1010_v44 = vld [vmem:[#allocation5 + $0xd88] sm:$0xff] }
 0x34c   :  { %v2519_v1 = vadd.f32 %v2518_v60, %v2007_v54  ;;  %v1510_v54 = vsub.f32 %v486_v47, %v998_v48  ;;  %v2021_v60 = vmul.f32 %v1509_v49, %v1509_v49  ;;  %v499_v48 = vld [vmem:[#allocation2 + $0xd90] sm:$0xff] }
 0x34d   :  { %v1011_v49 = vld [vmem:[#allocation5 + $0xd90] sm:$0xff] }
 0x34e   :  { %v2520_v6 = vadd.f32 %v2519_v1, %v2008_v59  ;;  %v1511_v59 = vsub.f32 %v487_v52, %v999_v53  ;;  %v2022_v1 = vmul.f32 %v1510_v54, %v1510_v54  ;;  %v500_v53 = vld [vmem:[#allocation2 + $0xd98] sm:$0xff] }
 0x34f   :  { %v1012_v54 = vld [vmem:[#allocation5 + $0xd98] sm:$0xff] }
 0x350   :  { %v2521_v11 = vadd.f32 %v2520_v6, %v2009_v0  ;;  %v1512_v0 = vsub.f32 %v488_v57, %v1000_v58  ;;  %v2023_v6 = vmul.f32 %v1511_v59, %v1511_v59  ;;  %v501_v58 = vld [vmem:[#allocation2 + $0xda0] sm:$0xff] }
 0x351   :  { %v1013_v59 = vld [vmem:[#allocation5 + $0xda0] sm:$0xff] }
 0x352   :  { %v2522_v16 = vadd.f32 %v2521_v11, %v2010_v5  ;;  %v1513_v5 = vsub.f32 %v489_v62, %v1001_v63  ;;  %v2024_v11 = vmul.f32 %v1512_v0, %v1512_v0  ;;  %v502_v63 = vld [vmem:[#allocation2 + $0xda8] sm:$0xff] }
 0x353   :  { %v1014_v0 = vld [vmem:[#allocation5 + $0xda8] sm:$0xff] }
 0x354   :  { %v2523_v21 = vadd.f32 %v2522_v16, %v2011_v10  ;;  %v1514_v10 = vsub.f32 %v490_v3, %v1002_v4  ;;  %v2025_v16 = vmul.f32 %v1513_v5, %v1513_v5  ;;  %v503_v4 = vld [vmem:[#allocation2 + $0xdb0] sm:$0xff] }
 0x355   :  { %v1015_v5 = vld [vmem:[#allocation5 + $0xdb0] sm:$0xff] }
 0x356   :  { %v2524_v26 = vadd.f32 %v2523_v21, %v2012_v15  ;;  %v1515_v15 = vsub.f32 %v491_v8, %v1003_v9  ;;  %v2026_v21 = vmul.f32 %v1514_v10, %v1514_v10  ;;  %v504_v9 = vld [vmem:[#allocation2 + $0xdb8] sm:$0xff] }
 0x357   :  { %v1016_v10 = vld [vmem:[#allocation5 + $0xdb8] sm:$0xff] }
 0x358   :  { %v2525_v31 = vadd.f32 %v2524_v26, %v2013_v20  ;;  %v1516_v20 = vsub.f32 %v492_v13, %v1004_v14  ;;  %v2027_v26 = vmul.f32 %v1515_v15, %v1515_v15  ;;  %v505_v14 = vld [vmem:[#allocation2 + $0xdc0] sm:$0xff] }
 0x359   :  { %v1017_v15 = vld [vmem:[#allocation5 + $0xdc0] sm:$0xff] }
 0x35a   :  { %v2526_v36 = vadd.f32 %v2525_v31, %v2014_v25  ;;  %v1517_v25 = vsub.f32 %v493_v18, %v1005_v19  ;;  %v2028_v31 = vmul.f32 %v1516_v20, %v1516_v20  ;;  %v506_v19 = vld [vmem:[#allocation2 + $0xdc8] sm:$0xff] }
 0x35b   :  { %v1018_v20 = vld [vmem:[#allocation5 + $0xdc8] sm:$0xff] }
 0x35c   :  { %v2527_v41 = vadd.f32 %v2526_v36, %v2015_v30  ;;  %v1518_v30 = vsub.f32 %v494_v23, %v1006_v24  ;;  %v2029_v36 = vmul.f32 %v1517_v25, %v1517_v25  ;;  %v507_v24 = vld [vmem:[#allocation2 + $0xdd0] sm:$0xff] }
 0x35d   :  { %v1019_v25 = vld [vmem:[#allocation5 + $0xdd0] sm:$0xff] }
 0x35e   :  { %v2528_v46 = vadd.f32 %v2527_v41, %v2016_v35  ;;  %v1519_v35 = vsub.f32 %v495_v28, %v1007_v29  ;;  %v2030_v41 = vmul.f32 %v1518_v30, %v1518_v30  ;;  %v508_v29 = vld [vmem:[#allocation2 + $0xdd8] sm:$0xff] }
 0x35f   :  { %v1020_v30 = vld [vmem:[#allocation5 + $0xdd8] sm:$0xff] }
 0x360   :  { %v2529_v51 = vadd.f32 %v2528_v46, %v2017_v40  ;;  %v1520_v40 = vsub.f32 %v496_v33, %v1008_v34  ;;  %v2031_v46 = vmul.f32 %v1519_v35, %v1519_v35  ;;  %v509_v34 = vld [vmem:[#allocation2 + $0xde0] sm:$0xff] }
 0x361   :  { %v1021_v35 = vld [vmem:[#allocation5 + $0xde0] sm:$0xff] }
 0x362   :  { %v2530_v56 = vadd.f32 %v2529_v51, %v2018_v45  ;;  %v1521_v45 = vsub.f32 %v497_v38, %v1009_v39  ;;  %v2032_v51 = vmul.f32 %v1520_v40, %v1520_v40  ;;  %v510_v39 = vld [vmem:[#allocation2 + $0xde8] sm:$0xff] }
 0x363   :  { %v1022_v40 = vld [vmem:[#allocation5 + $0xde8] sm:$0xff] }
 0x364   :  { %v2531_v61 = vadd.f32 %v2530_v56, %v2019_v50  ;;  %v1522_v50 = vsub.f32 %v498_v43, %v1010_v44  ;;  %v2033_v56 = vmul.f32 %v1521_v45, %v1521_v45  ;;  %v511_v44 = vld [vmem:[#allocation2 + $0xdf0] sm:$0xff] }
 0x365   :  { %v1023_v45 = vld [vmem:[#allocation5 + $0xdf0] sm:$0xff] }
 0x366   :  { %v2532_v2 = vadd.f32 %v2531_v61, %v2020_v55  ;;  %v1523_v55 = vsub.f32 %v499_v48, %v1011_v49  ;;  %v2034_v61 = vmul.f32 %v1522_v50, %v1522_v50  ;;  %v512_v49 = vld [vmem:[#allocation2 + $0xdf8] sm:$0xff] }
 0x367   :  { %v1024_v50 = vld [vmem:[#allocation5 + $0xdf8] sm:$0xff] }
 0x368   :  { %v2533_v7 = vadd.f32 %v2532_v2, %v2021_v60  ;;  %v1524_v60 = vsub.f32 %v500_v53, %v1012_v54  ;;  %v2035_v2 = vmul.f32 %v1523_v55, %v1523_v55  ;;  %v513_v54 = vld [vmem:[#allocation2 + $0xe00] sm:$0xff] }
 0x369   :  { %v1025_v55 = vld [vmem:[#allocation5 + $0xe00] sm:$0xff] }
 0x36a   :  { %v2534_v12 = vadd.f32 %v2533_v7, %v2022_v1  ;;  %v1525_v1 = vsub.f32 %v501_v58, %v1013_v59  ;;  %v2036_v7 = vmul.f32 %v1524_v60, %v1524_v60  ;;  %v514_v59 = vld [vmem:[#allocation2 + $0xe08] sm:$0xff] }
 0x36b   :  { %v1026_v60 = vld [vmem:[#allocation5 + $0xe08] sm:$0xff] }
 0x36c   :  { %v2535_v17 = vadd.f32 %v2534_v12, %v2023_v6  ;;  %v1526_v6 = vsub.f32 %v502_v63, %v1014_v0  ;;  %v2037_v12 = vmul.f32 %v1525_v1, %v1525_v1  ;;  %v515_v0 = vld [vmem:[#allocation2 + $0xe10] sm:$0xff] }
 0x36d   :  { %v1027_v1 = vld [vmem:[#allocation5 + $0xe10] sm:$0xff] }
 0x36e   :  { %v2536_v22 = vadd.f32 %v2535_v17, %v2024_v11  ;;  %v1527_v11 = vsub.f32 %v503_v4, %v1015_v5  ;;  %v2038_v17 = vmul.f32 %v1526_v6, %v1526_v6  ;;  %v516_v5 = vld [vmem:[#allocation2 + $0xe18] sm:$0xff] }
 0x36f   :  { %v1028_v6 = vld [vmem:[#allocation5 + $0xe18] sm:$0xff] }
 0x370   :  { %v2537_v27 = vadd.f32 %v2536_v22, %v2025_v16  ;;  %v1528_v16 = vsub.f32 %v504_v9, %v1016_v10  ;;  %v2039_v22 = vmul.f32 %v1527_v11, %v1527_v11  ;;  %v517_v10 = vld [vmem:[#allocation2 + $0xe20] sm:$0xff] }
 0x371   :  { %v1029_v11 = vld [vmem:[#allocation5 + $0xe20] sm:$0xff] }
 0x372   :  { %v2538_v32 = vadd.f32 %v2537_v27, %v2026_v21  ;;  %v1529_v21 = vsub.f32 %v505_v14, %v1017_v15  ;;  %v2040_v27 = vmul.f32 %v1528_v16, %v1528_v16  ;;  %v518_v15 = vld [vmem:[#allocation2 + $0xe28] sm:$0xff] }
 0x373   :  { %v1030_v16 = vld [vmem:[#allocation5 + $0xe28] sm:$0xff] }
 0x374   :  { %v2539_v37 = vadd.f32 %v2538_v32, %v2027_v26  ;;  %v1530_v26 = vsub.f32 %v506_v19, %v1018_v20  ;;  %v2041_v32 = vmul.f32 %v1529_v21, %v1529_v21  ;;  %v519_v20 = vld [vmem:[#allocation2 + $0xe30] sm:$0xff] }
 0x375   :  { %v1031_v21 = vld [vmem:[#allocation5 + $0xe30] sm:$0xff] }
 0x376   :  { %v2540_v42 = vadd.f32 %v2539_v37, %v2028_v31  ;;  %v1531_v31 = vsub.f32 %v507_v24, %v1019_v25  ;;  %v2042_v37 = vmul.f32 %v1530_v26, %v1530_v26  ;;  %v520_v25 = vld [vmem:[#allocation2 + $0xe38] sm:$0xff] }
 0x377   :  { %v1032_v26 = vld [vmem:[#allocation5 + $0xe38] sm:$0xff] }
 0x378   :  { %v2541_v47 = vadd.f32 %v2540_v42, %v2029_v36  ;;  %v1532_v36 = vsub.f32 %v508_v29, %v1020_v30  ;;  %v2043_v42 = vmul.f32 %v1531_v31, %v1531_v31  ;;  %v521_v30 = vld [vmem:[#allocation2 + $0xe40] sm:$0xff] }
 0x379   :  { %v1033_v31 = vld [vmem:[#allocation5 + $0xe40] sm:$0xff] }
 0x37a   :  { %v2542_v52 = vadd.f32 %v2541_v47, %v2030_v41  ;;  %v1533_v41 = vsub.f32 %v509_v34, %v1021_v35  ;;  %v2044_v47 = vmul.f32 %v1532_v36, %v1532_v36  ;;  %v522_v35 = vld [vmem:[#allocation2 + $0xe48] sm:$0xff] }
 0x37b   :  { %v1034_v36 = vld [vmem:[#allocation5 + $0xe48] sm:$0xff] }
 0x37c   :  { %v2543_v57 = vadd.f32 %v2542_v52, %v2031_v46  ;;  %v1534_v46 = vsub.f32 %v510_v39, %v1022_v40  ;;  %v2045_v52 = vmul.f32 %v1533_v41, %v1533_v41  ;;  %v523_v40 = vld [vmem:[#allocation2 + $0xe50] sm:$0xff] }
 0x37d   :  { %v1035_v41 = vld [vmem:[#allocation5 + $0xe50] sm:$0xff] }
 0x37e   :  { %v2544_v62 = vadd.f32 %v2543_v57, %v2032_v51  ;;  %v1535_v51 = vsub.f32 %v511_v44, %v1023_v45  ;;  %v2046_v57 = vmul.f32 %v1534_v46, %v1534_v46  ;;  %v524_v45 = vld [vmem:[#allocation2 + $0xe58] sm:$0xff] }
 0x37f   :  { %v1036_v46 = vld [vmem:[#allocation5 + $0xe58] sm:$0xff] }
 0x380   :  { %v2545_v3 = vadd.f32 %v2544_v62, %v2033_v56  ;;  %v1536_v56 = vsub.f32 %v512_v49, %v1024_v50  ;;  %v2047_v62 = vmul.f32 %v1535_v51, %v1535_v51  ;;  %v525_v50 = vld [vmem:[#allocation2 + $0xe60] sm:$0xff] }
 0x381   :  { %v1037_v51 = vld [vmem:[#allocation5 + $0xe60] sm:$0xff] }
 0x382   :  { %v2546_v8 = vadd.f32 %v2545_v3, %v2034_v61  ;;  %v1537_v61 = vsub.f32 %v513_v54, %v1025_v55  ;;  %v2048_v3 = vmul.f32 %v1536_v56, %v1536_v56  ;;  %v526_v55 = vld [vmem:[#allocation2 + $0xe68] sm:$0xff] }
 0x383   :  { %v1038_v56 = vld [vmem:[#allocation5 + $0xe68] sm:$0xff] }
 0x384   :  { %v2547_v13 = vadd.f32 %v2546_v8, %v2035_v2  ;;  %v1538_v2 = vsub.f32 %v514_v59, %v1026_v60  ;;  %v2049_v8 = vmul.f32 %v1537_v61, %v1537_v61  ;;  %v527_v60 = vld [vmem:[#allocation2 + $0xe70] sm:$0xff] }
 0x385   :  { %v1039_v61 = vld [vmem:[#allocation5 + $0xe70] sm:$0xff] }
 0x386   :  { %v2548_v18 = vadd.f32 %v2547_v13, %v2036_v7  ;;  %v1539_v7 = vsub.f32 %v515_v0, %v1027_v1  ;;  %v2050_v13 = vmul.f32 %v1538_v2, %v1538_v2  ;;  %v528_v1 = vld [vmem:[#allocation2 + $0xe78] sm:$0xff] }
 0x387   :  { %v1040_v2 = vld [vmem:[#allocation5 + $0xe78] sm:$0xff] }
 0x388   :  { %v2549_v23 = vadd.f32 %v2548_v18, %v2037_v12  ;;  %v1540_v12 = vsub.f32 %v516_v5, %v1028_v6  ;;  %v2051_v18 = vmul.f32 %v1539_v7, %v1539_v7  ;;  %v529_v6 = vld [vmem:[#allocation2 + $0xe80] sm:$0xff] }
 0x389   :  { %v1041_v7 = vld [vmem:[#allocation5 + $0xe80] sm:$0xff] }
 0x38a   :  { %v2550_v28 = vadd.f32 %v2549_v23, %v2038_v17  ;;  %v1541_v17 = vsub.f32 %v517_v10, %v1029_v11  ;;  %v2052_v23 = vmul.f32 %v1540_v12, %v1540_v12  ;;  %v530_v11 = vld [vmem:[#allocation2 + $0xe88] sm:$0xff] }
 0x38b   :  { %v1042_v12 = vld [vmem:[#allocation5 + $0xe88] sm:$0xff] }
 0x38c   :  { %v2551_v33 = vadd.f32 %v2550_v28, %v2039_v22  ;;  %v1542_v22 = vsub.f32 %v518_v15, %v1030_v16  ;;  %v2053_v28 = vmul.f32 %v1541_v17, %v1541_v17  ;;  %v531_v16 = vld [vmem:[#allocation2 + $0xe90] sm:$0xff] }
 0x38d   :  { %v1043_v17 = vld [vmem:[#allocation5 + $0xe90] sm:$0xff] }
 0x38e   :  { %v2552_v38 = vadd.f32 %v2551_v33, %v2040_v27  ;;  %v1543_v27 = vsub.f32 %v519_v20, %v1031_v21  ;;  %v2054_v33 = vmul.f32 %v1542_v22, %v1542_v22  ;;  %v532_v21 = vld [vmem:[#allocation2 + $0xe98] sm:$0xff] }
 0x38f   :  { %v1044_v22 = vld [vmem:[#allocation5 + $0xe98] sm:$0xff] }
 0x390   :  { %v2553_v43 = vadd.f32 %v2552_v38, %v2041_v32  ;;  %v1544_v32 = vsub.f32 %v520_v25, %v1032_v26  ;;  %v2055_v38 = vmul.f32 %v1543_v27, %v1543_v27  ;;  %v533_v26 = vld [vmem:[#allocation2 + $0xea0] sm:$0xff] }
 0x391   :  { %v1045_v27 = vld [vmem:[#allocation5 + $0xea0] sm:$0xff] }
 0x392   :  { %v2554_v48 = vadd.f32 %v2553_v43, %v2042_v37  ;;  %v1545_v37 = vsub.f32 %v521_v30, %v1033_v31  ;;  %v2056_v43 = vmul.f32 %v1544_v32, %v1544_v32  ;;  %v534_v31 = vld [vmem:[#allocation2 + $0xea8] sm:$0xff] }
 0x393   :  { %v1046_v32 = vld [vmem:[#allocation5 + $0xea8] sm:$0xff] }
 0x394   :  { %v2555_v53 = vadd.f32 %v2554_v48, %v2043_v42  ;;  %v1546_v42 = vsub.f32 %v522_v35, %v1034_v36  ;;  %v2057_v48 = vmul.f32 %v1545_v37, %v1545_v37  ;;  %v535_v36 = vld [vmem:[#allocation2 + $0xeb0] sm:$0xff] }
 0x395   :  { %v1047_v37 = vld [vmem:[#allocation5 + $0xeb0] sm:$0xff] }
 0x396   :  { %v2556_v58 = vadd.f32 %v2555_v53, %v2044_v47  ;;  %v1547_v47 = vsub.f32 %v523_v40, %v1035_v41  ;;  %v2058_v53 = vmul.f32 %v1546_v42, %v1546_v42  ;;  %v536_v41 = vld [vmem:[#allocation2 + $0xeb8] sm:$0xff] }
 0x397   :  { %v1048_v42 = vld [vmem:[#allocation5 + $0xeb8] sm:$0xff] }
 0x398   :  { %v2557_v63 = vadd.f32 %v2556_v58, %v2045_v52  ;;  %v1548_v52 = vsub.f32 %v524_v45, %v1036_v46  ;;  %v2059_v58 = vmul.f32 %v1547_v47, %v1547_v47  ;;  %v537_v46 = vld [vmem:[#allocation2 + $0xec0] sm:$0xff] }
 0x399   :  { %v1049_v47 = vld [vmem:[#allocation5 + $0xec0] sm:$0xff] }
 0x39a   :  { %v2558_v4 = vadd.f32 %v2557_v63, %v2046_v57  ;;  %v1549_v57 = vsub.f32 %v525_v50, %v1037_v51  ;;  %v2060_v63 = vmul.f32 %v1548_v52, %v1548_v52  ;;  %v538_v51 = vld [vmem:[#allocation2 + $0xec8] sm:$0xff] }
 0x39b   :  { %v1050_v52 = vld [vmem:[#allocation5 + $0xec8] sm:$0xff] }
 0x39c   :  { %v2559_v9 = vadd.f32 %v2558_v4, %v2047_v62  ;;  %v1550_v62 = vsub.f32 %v526_v55, %v1038_v56  ;;  %v2061_v4 = vmul.f32 %v1549_v57, %v1549_v57  ;;  %v539_v56 = vld [vmem:[#allocation2 + $0xed0] sm:$0xff] }
 0x39d   :  { %v1051_v57 = vld [vmem:[#allocation5 + $0xed0] sm:$0xff] }
 0x39e   :  { %v2560_v14 = vadd.f32 %v2559_v9, %v2048_v3  ;;  %v1551_v3 = vsub.f32 %v527_v60, %v1039_v61  ;;  %v2062_v9 = vmul.f32 %v1550_v62, %v1550_v62  ;;  %v540_v61 = vld [vmem:[#allocation2 + $0xed8] sm:$0xff] }
 0x39f   :  { %v1052_v62 = vld [vmem:[#allocation5 + $0xed8] sm:$0xff] }
 0x3a0   :  { %v2561_v19 = vadd.f32 %v2560_v14, %v2049_v8  ;;  %v1552_v8 = vsub.f32 %v528_v1, %v1040_v2  ;;  %v2063_v14 = vmul.f32 %v1551_v3, %v1551_v3  ;;  %v541_v2 = vld [vmem:[#allocation2 + $0xee0] sm:$0xff] }
 0x3a1   :  { %v1053_v3 = vld [vmem:[#allocation5 + $0xee0] sm:$0xff] }
 0x3a2   :  { %v2562_v24 = vadd.f32 %v2561_v19, %v2050_v13  ;;  %v1553_v13 = vsub.f32 %v529_v6, %v1041_v7  ;;  %v2064_v19 = vmul.f32 %v1552_v8, %v1552_v8  ;;  %v542_v7 = vld [vmem:[#allocation2 + $0xee8] sm:$0xff] }
 0x3a3   :  { %v1054_v8 = vld [vmem:[#allocation5 + $0xee8] sm:$0xff] }
 0x3a4   :  { %v2563_v29 = vadd.f32 %v2562_v24, %v2051_v18  ;;  %v1554_v18 = vsub.f32 %v530_v11, %v1042_v12  ;;  %v2065_v24 = vmul.f32 %v1553_v13, %v1553_v13  ;;  %v543_v12 = vld [vmem:[#allocation2 + $0xef0] sm:$0xff] }
 0x3a5   :  { %v1055_v13 = vld [vmem:[#allocation5 + $0xef0] sm:$0xff] }
 0x3a6   :  { %v2564_v34 = vadd.f32 %v2563_v29, %v2052_v23  ;;  %v1555_v23 = vsub.f32 %v531_v16, %v1043_v17  ;;  %v2066_v29 = vmul.f32 %v1554_v18, %v1554_v18  ;;  %v544_v17 = vld [vmem:[#allocation2 + $0xef8] sm:$0xff] }
 0x3a7   :  { %v1056_v18 = vld [vmem:[#allocation5 + $0xef8] sm:$0xff] }
 0x3a8   :  { %v2565_v39 = vadd.f32 %v2564_v34, %v2053_v28  ;;  %v1556_v28 = vsub.f32 %v532_v21, %v1044_v22  ;;  %v2067_v34 = vmul.f32 %v1555_v23, %v1555_v23  ;;  %v545_v22 = vld [vmem:[#allocation2 + $0xf00] sm:$0xff] }
 0x3a9   :  { %v1057_v23 = vld [vmem:[#allocation5 + $0xf00] sm:$0xff] }
 0x3aa   :  { %v2566_v44 = vadd.f32 %v2565_v39, %v2054_v33  ;;  %v1557_v33 = vsub.f32 %v533_v26, %v1045_v27  ;;  %v2068_v39 = vmul.f32 %v1556_v28, %v1556_v28  ;;  %v546_v27 = vld [vmem:[#allocation2 + $0xf08] sm:$0xff] }
 0x3ab   :  { %v1058_v28 = vld [vmem:[#allocation5 + $0xf08] sm:$0xff] }
 0x3ac   :  { %v2567_v49 = vadd.f32 %v2566_v44, %v2055_v38  ;;  %v1558_v38 = vsub.f32 %v534_v31, %v1046_v32  ;;  %v2069_v44 = vmul.f32 %v1557_v33, %v1557_v33  ;;  %v547_v32 = vld [vmem:[#allocation2 + $0xf10] sm:$0xff] }
 0x3ad   :  { %v1059_v33 = vld [vmem:[#allocation5 + $0xf10] sm:$0xff] }
 0x3ae   :  { %v2568_v54 = vadd.f32 %v2567_v49, %v2056_v43  ;;  %v1559_v43 = vsub.f32 %v535_v36, %v1047_v37  ;;  %v2070_v49 = vmul.f32 %v1558_v38, %v1558_v38  ;;  %v548_v37 = vld [vmem:[#allocation2 + $0xf18] sm:$0xff] }
 0x3af   :  { %v1060_v38 = vld [vmem:[#allocation5 + $0xf18] sm:$0xff] }
 0x3b0   :  { %v2569_v59 = vadd.f32 %v2568_v54, %v2057_v48  ;;  %v1560_v48 = vsub.f32 %v536_v41, %v1048_v42  ;;  %v2071_v54 = vmul.f32 %v1559_v43, %v1559_v43  ;;  %v549_v42 = vld [vmem:[#allocation2 + $0xf20] sm:$0xff] }
 0x3b1   :  { %v1061_v43 = vld [vmem:[#allocation5 + $0xf20] sm:$0xff] }
 0x3b2   :  { %v2570_v0 = vadd.f32 %v2569_v59, %v2058_v53  ;;  %v1561_v53 = vsub.f32 %v537_v46, %v1049_v47  ;;  %v2072_v59 = vmul.f32 %v1560_v48, %v1560_v48  ;;  %v550_v47 = vld [vmem:[#allocation2 + $0xf28] sm:$0xff] }
 0x3b3   :  { %v1062_v48 = vld [vmem:[#allocation5 + $0xf28] sm:$0xff] }
 0x3b4   :  { %v2571_v5 = vadd.f32 %v2570_v0, %v2059_v58  ;;  %v1562_v58 = vsub.f32 %v538_v51, %v1050_v52  ;;  %v2073_v0 = vmul.f32 %v1561_v53, %v1561_v53  ;;  %v551_v52 = vld [vmem:[#allocation2 + $0xf30] sm:$0xff] }
 0x3b5   :  { %v1063_v53 = vld [vmem:[#allocation5 + $0xf30] sm:$0xff] }
 0x3b6   :  { %v2572_v10 = vadd.f32 %v2571_v5, %v2060_v63  ;;  %v1563_v63 = vsub.f32 %v539_v56, %v1051_v57  ;;  %v2074_v5 = vmul.f32 %v1562_v58, %v1562_v58  ;;  %v552_v57 = vld [vmem:[#allocation2 + $0xf38] sm:$0xff] }
 0x3b7   :  { %v1064_v58 = vld [vmem:[#allocation5 + $0xf38] sm:$0xff] }
 0x3b8   :  { %v2573_v15 = vadd.f32 %v2572_v10, %v2061_v4  ;;  %v1564_v4 = vsub.f32 %v540_v61, %v1052_v62  ;;  %v2075_v10 = vmul.f32 %v1563_v63, %v1563_v63  ;;  %v553_v62 = vld [vmem:[#allocation2 + $0xf40] sm:$0xff] }
 0x3b9   :  { %v1065_v63 = vld [vmem:[#allocation5 + $0xf40] sm:$0xff] }
 0x3ba   :  { %v2574_v20 = vadd.f32 %v2573_v15, %v2062_v9  ;;  %v1565_v9 = vsub.f32 %v541_v2, %v1053_v3  ;;  %v2076_v15 = vmul.f32 %v1564_v4, %v1564_v4  ;;  %v554_v3 = vld [vmem:[#allocation2 + $0xf48] sm:$0xff] }
 0x3bb   :  { %v1066_v4 = vld [vmem:[#allocation5 + $0xf48] sm:$0xff] }
 0x3bc   :  { %v2575_v25 = vadd.f32 %v2574_v20, %v2063_v14  ;;  %v1566_v14 = vsub.f32 %v542_v7, %v1054_v8  ;;  %v2077_v20 = vmul.f32 %v1565_v9, %v1565_v9  ;;  %v555_v8 = vld [vmem:[#allocation2 + $0xf50] sm:$0xff] }
 0x3bd   :  { %v1067_v9 = vld [vmem:[#allocation5 + $0xf50] sm:$0xff] }
 0x3be   :  { %v2576_v30 = vadd.f32 %v2575_v25, %v2064_v19  ;;  %v1567_v19 = vsub.f32 %v543_v12, %v1055_v13  ;;  %v2078_v25 = vmul.f32 %v1566_v14, %v1566_v14  ;;  %v556_v13 = vld [vmem:[#allocation2 + $0xf58] sm:$0xff] }
 0x3bf   :  { %v1068_v14 = vld [vmem:[#allocation5 + $0xf58] sm:$0xff] }
 0x3c0   :  { %v2577_v35 = vadd.f32 %v2576_v30, %v2065_v24  ;;  %v1568_v24 = vsub.f32 %v544_v17, %v1056_v18  ;;  %v2079_v30 = vmul.f32 %v1567_v19, %v1567_v19  ;;  %v557_v18 = vld [vmem:[#allocation2 + $0xf60] sm:$0xff] }
 0x3c1   :  { %v1069_v19 = vld [vmem:[#allocation5 + $0xf60] sm:$0xff] }
 0x3c2   :  { %v2578_v40 = vadd.f32 %v2577_v35, %v2066_v29  ;;  %v1569_v29 = vsub.f32 %v545_v22, %v1057_v23  ;;  %v2080_v35 = vmul.f32 %v1568_v24, %v1568_v24  ;;  %v558_v23 = vld [vmem:[#allocation2 + $0xf68] sm:$0xff] }
 0x3c3   :  { %v1070_v24 = vld [vmem:[#allocation5 + $0xf68] sm:$0xff] }
 0x3c4   :  { %v2579_v45 = vadd.f32 %v2578_v40, %v2067_v34  ;;  %v1570_v34 = vsub.f32 %v546_v27, %v1058_v28  ;;  %v2081_v40 = vmul.f32 %v1569_v29, %v1569_v29  ;;  %v559_v28 = vld [vmem:[#allocation2 + $0xf70] sm:$0xff] }
 0x3c5   :  { %v1071_v29 = vld [vmem:[#allocation5 + $0xf70] sm:$0xff] }
 0x3c6   :  { %v2580_v50 = vadd.f32 %v2579_v45, %v2068_v39  ;;  %v1571_v39 = vsub.f32 %v547_v32, %v1059_v33  ;;  %v2082_v45 = vmul.f32 %v1570_v34, %v1570_v34  ;;  %v560_v33 = vld [vmem:[#allocation2 + $0xf78] sm:$0xff] }
 0x3c7   :  { %v1072_v34 = vld [vmem:[#allocation5 + $0xf78] sm:$0xff] }
 0x3c8   :  { %v2581_v55 = vadd.f32 %v2580_v50, %v2069_v44  ;;  %v1572_v44 = vsub.f32 %v548_v37, %v1060_v38  ;;  %v2083_v50 = vmul.f32 %v1571_v39, %v1571_v39  ;;  %v561_v38 = vld [vmem:[#allocation2 + $0xf80] sm:$0xff] }
 0x3c9   :  { %v1073_v39 = vld [vmem:[#allocation5 + $0xf80] sm:$0xff] }
 0x3ca   :  { %v2582_v60 = vadd.f32 %v2581_v55, %v2070_v49  ;;  %v1573_v49 = vsub.f32 %v549_v42, %v1061_v43  ;;  %v2084_v55 = vmul.f32 %v1572_v44, %v1572_v44  ;;  %v562_v43 = vld [vmem:[#allocation2 + $0xf88] sm:$0xff] }
 0x3cb   :  { %v1074_v44 = vld [vmem:[#allocation5 + $0xf88] sm:$0xff] }
 0x3cc   :  { %v2583_v1 = vadd.f32 %v2582_v60, %v2071_v54  ;;  %v1574_v54 = vsub.f32 %v550_v47, %v1062_v48  ;;  %v2085_v60 = vmul.f32 %v1573_v49, %v1573_v49  ;;  %v563_v48 = vld [vmem:[#allocation2 + $0xf90] sm:$0xff] }
 0x3cd   :  { %v1075_v49 = vld [vmem:[#allocation5 + $0xf90] sm:$0xff] }
 0x3ce   :  { %v2584_v6 = vadd.f32 %v2583_v1, %v2072_v59  ;;  %v1575_v59 = vsub.f32 %v551_v52, %v1063_v53  ;;  %v2086_v1 = vmul.f32 %v1574_v54, %v1574_v54  ;;  %v564_v53 = vld [vmem:[#allocation2 + $0xf98] sm:$0xff] }
 0x3cf   :  { %v1076_v54 = vld [vmem:[#allocation5 + $0xf98] sm:$0xff] }
 0x3d0   :  { %v2585_v11 = vadd.f32 %v2584_v6, %v2073_v0  ;;  %v1576_v0 = vsub.f32 %v552_v57, %v1064_v58  ;;  %v2087_v6 = vmul.f32 %v1575_v59, %v1575_v59  ;;  %v565_v58 = vld [vmem:[#allocation2 + $0xfa0] sm:$0xff] }
 0x3d1   :  { %v1077_v59 = vld [vmem:[#allocation5 + $0xfa0] sm:$0xff] }
 0x3d2   :  { %v2586_v16 = vadd.f32 %v2585_v11, %v2074_v5  ;;  %v1577_v5 = vsub.f32 %v553_v62, %v1065_v63  ;;  %v2088_v11 = vmul.f32 %v1576_v0, %v1576_v0  ;;  %v566_v63 = vld [vmem:[#allocation2 + $0xfa8] sm:$0xff] }
 0x3d3   :  { %v1078_v0 = vld [vmem:[#allocation5 + $0xfa8] sm:$0xff] }
 0x3d4   :  { %v2587_v21 = vadd.f32 %v2586_v16, %v2075_v10  ;;  %v1578_v10 = vsub.f32 %v554_v3, %v1066_v4  ;;  %v2089_v16 = vmul.f32 %v1577_v5, %v1577_v5  ;;  %v567_v4 = vld [vmem:[#allocation2 + $0xfb0] sm:$0xff] }
 0x3d5   :  { %v1079_v5 = vld [vmem:[#allocation5 + $0xfb0] sm:$0xff] }
 0x3d6   :  { %v2588_v26 = vadd.f32 %v2587_v21, %v2076_v15  ;;  %v1579_v15 = vsub.f32 %v555_v8, %v1067_v9  ;;  %v2090_v21 = vmul.f32 %v1578_v10, %v1578_v10  ;;  %v568_v9 = vld [vmem:[#allocation2 + $0xfb8] sm:$0xff] }
 0x3d7   :  { %v1080_v10 = vld [vmem:[#allocation5 + $0xfb8] sm:$0xff] }
 0x3d8   :  { %v2589_v31 = vadd.f32 %v2588_v26, %v2077_v20  ;;  %v1580_v20 = vsub.f32 %v556_v13, %v1068_v14  ;;  %v2091_v26 = vmul.f32 %v1579_v15, %v1579_v15  ;;  %v569_v14 = vld [vmem:[#allocation2 + $0xfc0] sm:$0xff] }
 0x3d9   :  { %v1081_v15 = vld [vmem:[#allocation5 + $0xfc0] sm:$0xff] }
 0x3da   :  { %v2590_v36 = vadd.f32 %v2589_v31, %v2078_v25  ;;  %v1581_v25 = vsub.f32 %v557_v18, %v1069_v19  ;;  %v2092_v31 = vmul.f32 %v1580_v20, %v1580_v20  ;;  %v570_v19 = vld [vmem:[#allocation2 + $0xfc8] sm:$0xff] }
 0x3db   :  { %v1082_v20 = vld [vmem:[#allocation5 + $0xfc8] sm:$0xff] }
 0x3dc   :  { %v2591_v41 = vadd.f32 %v2590_v36, %v2079_v30  ;;  %v1582_v30 = vsub.f32 %v558_v23, %v1070_v24  ;;  %v2093_v36 = vmul.f32 %v1581_v25, %v1581_v25  ;;  %v571_v24 = vld [vmem:[#allocation2 + $0xfd0] sm:$0xff] }
 0x3dd   :  { %v1083_v25 = vld [vmem:[#allocation5 + $0xfd0] sm:$0xff] }
 0x3de   :  { %v2592_v46 = vadd.f32 %v2591_v41, %v2080_v35  ;;  %v1583_v35 = vsub.f32 %v559_v28, %v1071_v29  ;;  %v2094_v41 = vmul.f32 %v1582_v30, %v1582_v30  ;;  %v572_v29 = vld [vmem:[#allocation2 + $0xfd8] sm:$0xff] }
 0x3df   :  { %v1084_v30 = vld [vmem:[#allocation5 + $0xfd8] sm:$0xff] }
 0x3e0   :  { %v2593_v51 = vadd.f32 %v2592_v46, %v2081_v40  ;;  %v1584_v40 = vsub.f32 %v560_v33, %v1072_v34  ;;  %v2095_v46 = vmul.f32 %v1583_v35, %v1583_v35  ;;  %v573_v34 = vld [vmem:[#allocation2 + $0xfe0] sm:$0xff] }
 0x3e1   :  { %v1085_v35 = vld [vmem:[#allocation5 + $0xfe0] sm:$0xff] }
 0x3e2   :  { %v2594_v56 = vadd.f32 %v2593_v51, %v2082_v45  ;;  %v1585_v45 = vsub.f32 %v561_v38, %v1073_v39  ;;  %v2096_v51 = vmul.f32 %v1584_v40, %v1584_v40  ;;  %v574_v39 = vld [vmem:[#allocation2 + $0xfe8] sm:$0xff] }
 0x3e3   :  { %v1086_v40 = vld [vmem:[#allocation5 + $0xfe8] sm:$0xff] }
 0x3e4   :  { %v2595_v61 = vadd.f32 %v2594_v56, %v2083_v50  ;;  %v1586_v50 = vsub.f32 %v562_v43, %v1074_v44  ;;  %v2097_v56 = vmul.f32 %v1585_v45, %v1585_v45  ;;  %v575_v44 = vld [vmem:[#allocation2 + $0xff0] sm:$0xff] }
 0x3e5   :  { %v1087_v45 = vld [vmem:[#allocation5 + $0xff0] sm:$0xff] }
 0x3e6   :  { %v2596_v2 = vadd.f32 %v2595_v61, %v2084_v55  ;;  %v1587_v55 = vsub.f32 %v563_v48, %v1075_v49  ;;  %v2098_v61 = vmul.f32 %v1586_v50, %v1586_v50  ;;  %v576_v49 = vld [vmem:[#allocation2 + $0xff8] sm:$0xff] }
 0x3e7   :  { %v1088_v50 = vld [vmem:[#allocation5 + $0xff8] sm:$0xff] }
 0x3e8   :  { %v2597_v7 = vadd.f32 %v2596_v2, %v2085_v60  ;;  %v1588_v60 = vsub.f32 %v564_v53, %v1076_v54  ;;  %v2099_v2 = vmul.f32 %v1587_v55, %v1587_v55  ;;  %v1600_v54 = vsub.f32 %v576_v49, %v1088_v50 }
 0x3ea   :  { %v2598_v12 = vadd.f32 %v2597_v7, %v2086_v1  ;;  %v1589_v1 = vsub.f32 %v565_v58, %v1077_v59  ;;  %v2100_v7 = vmul.f32 %v1588_v60, %v1588_v60  ;;  %v2112_v59 = vmul.f32 %v1600_v54, %v1600_v54 }
 0x3ec   :  { %v2599_v17 = vadd.f32 %v2598_v12, %v2087_v6  ;;  %v1590_v6 = vsub.f32 %v566_v63, %v1078_v0  ;;  %v2101_v12 = vmul.f32 %v1589_v1, %v1589_v1 }
 0x3ee   :  { %v2600_v22 = vadd.f32 %v2599_v17, %v2088_v11  ;;  %v1591_v11 = vsub.f32 %v567_v4, %v1079_v5  ;;  %v2102_v17 = vmul.f32 %v1590_v6, %v1590_v6 }
 0x3f0   :  { %v2601_v27 = vadd.f32 %v2600_v22, %v2089_v16  ;;  %v1592_v16 = vsub.f32 %v568_v9, %v1080_v10  ;;  %v2103_v22 = vmul.f32 %v1591_v11, %v1591_v11 }
 0x3f2   :  { %v2602_v32 = vadd.f32 %v2601_v27, %v2090_v21  ;;  %v1593_v21 = vsub.f32 %v569_v14, %v1081_v15  ;;  %v2104_v27 = vmul.f32 %v1592_v16, %v1592_v16 }
 0x3f4   :  { %v2603_v37 = vadd.f32 %v2602_v32, %v2091_v26  ;;  %v1594_v26 = vsub.f32 %v570_v19, %v1082_v20  ;;  %v2105_v32 = vmul.f32 %v1593_v21, %v1593_v21 }
 0x3f6   :  { %v2604_v42 = vadd.f32 %v2603_v37, %v2092_v31  ;;  %v1595_v31 = vsub.f32 %v571_v24, %v1083_v25  ;;  %v2106_v37 = vmul.f32 %v1594_v26, %v1594_v26 }
 0x3f8   :  { %v2605_v47 = vadd.f32 %v2604_v42, %v2093_v36  ;;  %v1596_v36 = vsub.f32 %v572_v29, %v1084_v30  ;;  %v2107_v42 = vmul.f32 %v1595_v31, %v1595_v31 }
 0x3fa   :  { %v2606_v52 = vadd.f32 %v2605_v47, %v2094_v41  ;;  %v1597_v41 = vsub.f32 %v573_v34, %v1085_v35  ;;  %v2108_v47 = vmul.f32 %v1596_v36, %v1596_v36 }
 0x3fc   :  { %v2607_v57 = vadd.f32 %v2606_v52, %v2095_v46  ;;  %v1598_v46 = vsub.f32 %v574_v39, %v1086_v40  ;;  %v2109_v52 = vmul.f32 %v1597_v41, %v1597_v41 }
 0x3fe   :  { %v2608_v62 = vadd.f32 %v2607_v57, %v2096_v51  ;;  %v1599_v51 = vsub.f32 %v575_v44, %v1087_v45  ;;  %v2110_v55 = vmul.f32 %v1598_v46, %v1598_v46 }
 0x400   :  { %v2609_v3 = vadd.f32 %v2608_v62, %v2097_v56  ;;  %v2111_v57 = vmul.f32 %v1599_v51, %v1599_v51 }
 0x402   :  { %v2610_v8 = vadd.f32 %v2609_v3, %v2098_v61 }
 0x404   :  { %v2611_v13 = vadd.f32 %v2610_v8, %v2099_v2 }
 0x406   :  { %v2612_v18 = vadd.f32 %v2611_v13, %v2100_v7 }
 0x408   :  { %v2613_v23 = vadd.f32 %v2612_v18, %v2101_v12 }
 0x40a   :  { %v2614_v28 = vadd.f32 %v2613_v23, %v2102_v17 }
 0x40c   :  { %v2615_v33 = vadd.f32 %v2614_v28, %v2103_v22 }
 0x40e   :  { %v2616_v38 = vadd.f32 %v2615_v33, %v2104_v27 }
 0x410   :  { %v2617_v43 = vadd.f32 %v2616_v38, %v2105_v32 }
 0x412   :  { %v2618_v48 = vadd.f32 %v2617_v43, %v2106_v37 }
 0x414   :  { %v2619_v53 = vadd.f32 %v2618_v48, %v2107_v42 }
 0x416   :  { %v2620_v56 = vadd.f32 %v2619_v53, %v2108_v47 }
 0x418   :  { %v2621_v58 = vadd.f32 %v2620_v56, %v2109_v52 }
 0x41a   :  { %v2622_v60 = vadd.f32 %v2621_v58, %v2110_v55 }
 0x41c   :  { %v2623_v61 = vadd.f32 %v2622_v60, %v2111_v57 }
 0x41e   :  { %v2624_v62 = vadd.f32 %v2623_v61, %v2112_v59 }
 0x420   :  { %2626 = vst [vmem:[#allocation7] sm:$0xff] %v2624_v62 }
 0x421   :  { %2704 = shalt.err (!%p2701_p0)
}
 0x422   :  { %2636 = dma.vmem_to_hbm [thread:$0]  %s2634_s1, 128, %s2750_s2, [#allocation4]  }
 0x423   :  { %2717 = dma.done.wait [#allocation4], 128  }
 0x424   :  { %2718 = vsyncadd [#allocation4], 4294967168 }
 0x425   :  { %2640 = vsyncpa [#allocation3], 1 }
 0x426   :  { %2641 = vsyncpa [#allocation6], 1 }
 0x427   :  { %2642 = vsyncpa [#allocation4], 1 }

</bundles_post_ra>
